<compile_context>
chip_gen: v5e
topology: v5e:2x2
jax: 0.10.0
libtpu: 0.0.40
codegen_flags: <defaults>
</compile_context>

<pallas_src>
import functools

import jax
import jax.numpy as jnp
import numpy as np
from jax import lax
from jax.experimental import pallas as pl
from jax.experimental.pallas import tpu as pltpu

CP = 128          # channel padding (lane dim)
M2 = 24           # row margin around the 16x16 conv2 grid (>= 17, mult. of 8)
M3 = 16           # row margin around the 8x8 conv3 grid  (>= 9,  mult. of 8)
WM2_ROWS = 192    # pool-2 window-max rows ever selected (max needed = 187)

# tap row-shifts on the 16x16 / 8x8 grids, and the 9 stride-2 conv3 output rows
_SHIFTS2 = tuple(16 * (dh - 1) + (dw - 1) for dh in range(3) for dw in range(3))
_SHIFTS3 = tuple(8 * (dh - 1) + (dw - 1) for dh in range(3) for dw in range(3))
_DELTAS_FC = tuple(8 * (2 * oh + 1) + (2 * ow + 1)
                   for oh in range(3) for ow in range(3))


# ------------------------------ fused kernel -------------------------------

def _classifier_kernel(patches_ref, w1_ref, b1_ref, w2_ref, b2_ref,
                       w3_ref, b3_ref, wfc_ref, bfc_ref,
                       wfc1_ref, bfc1_ref, wfc2_ref, bfc2_ref, s2_ref,
                       out_ref):
    f32 = jnp.float32
    bf16 = jnp.bfloat16

    # conv1 (5x5, valid) + bias + ReLU: one K=32 matmul on im2col patches.
    h1 = jnp.dot(patches_ref[...], w1_ref[...], preferred_element_type=f32)
    h1 = jnp.maximum(h1 + b1_ref[...], 0.0)                        # (576, 128)

    # 2x2/2 max-pool #1: the four pool taps are contiguous 144-row blocks
    # (patch rows were ordered that way on the host).
    pool1 = jnp.maximum(jnp.maximum(h1[0:144], h1[144:288]),
                        jnp.maximum(h1[288:432], h1[432:576]))      # (144, 128)

    # Place the pooled 12x12 map on conv2's zero-padded 16x16 grid (+ slice
    # margins) with plain row copies; only ring/margin rows are zeros
    # (no full-buffer zero fill, no selection matmul).
    z1 = jnp.zeros((1, CP), f32)
    z3 = jnp.zeros((3, CP), f32)
    pieces = [jnp.zeros((M2 + 16, CP), f32)]          # top margin + row h=0
    for g in range(12):                               # h = g + 1
        pieces += [z1, pool1[12 * g:12 * (g + 1)], z3]
    pieces.append(jnp.zeros((48 + M2, CP), f32))      # rows h=13..15 + margin
    a2pad = jnp.concatenate(pieces, axis=0)           # (M2 + 256 + M2, 128)

    # conv2 (3x3, pad 1): the 9 taps are folded (lane-aligned) into the
    # contraction dim -> ONE K=9*128 matmul instead of 9 small dots.
    im2 = jnp.concatenate(
        [a2pad[M2 + s:M2 + s + 256] for s in _SHIFTS2], axis=1).astype(bf16)
    h2 = jnp.dot(im2, w2_ref[...], preferred_element_type=f32)
    h2 = jnp.maximum(h2 + b2_ref[...], 0.0)                         # (256, 128)

    # 2x2/2 max-pool #2: window max via 4 shifted row slices; the stride-2 row
    # gather + zero-ring placement onto conv3's 8x8 grid is one per-sample
    # (64 x 192) one-hot dot (O(1) in batch -- replaces the old O(B^2) s2).
    wm2 = jnp.maximum(jnp.maximum(h2[0:WM2_ROWS], h2[1:WM2_ROWS + 1]),
                      jnp.maximum(h2[16:WM2_ROWS + 16], h2[17:WM2_ROWS + 17]))
    a3 = jnp.dot(s2_ref[...], wm2.astype(bf16), preferred_element_type=f32)
    a3pad = jnp.concatenate(
        [jnp.zeros((M3, CP), f32), a3, jnp.zeros((M3, CP), f32)], axis=0)

    # conv3 (3x3, stride 2, pad 1) computed as a stride-1 conv on the 8x8
    # grid, taps folded into one K=9*128 matmul.
    im3 = jnp.concatenate(
        [a3pad[M3 + s:M3 + s + 64] for s in _SHIFTS3], axis=1).astype(bf16)
    h3 = jnp.dot(im3, w3_ref[...], preferred_element_type=f32)
    h3 = jnp.maximum(h3 + b3_ref[...], 0.0)                         # (64, 128)

    # encoder fc (576 -> latent): gather the 9 stride-2 conv3 output rows into
    # the contraction dim -> one matmul.  Only row 0 of the (8, 128) result is
    # the real latent; rows 1..7 are don't-care and dropped by the wrapper.
    imf = jnp.concatenate(
        [h3[d:d + 8] for d in _DELTAS_FC], axis=1).astype(bf16)     # (8, 1152)
    z = jnp.dot(imf, wfc_ref[...], preferred_element_type=f32) + bfc_ref[...]

    # classifier head: fc1 + ReLU, fc2.
    h4 = jnp.dot(z.astype(bf16), wfc1_ref[...], preferred_element_type=f32)
    h4 = jnp.maximum(h4 + bfc1_ref[...], 0.0)
    logits = jnp.dot(h4.astype(bf16), wfc2_ref[...], preferred_element_type=f32)
    out_ref[...] = logits + bfc2_ref[...]


# --------------------------- host-side preparation -------------------------

def _pad_to(a, shape):
    out = np.zeros(shape, np.float32)
    out[tuple(slice(0, s) for s in a.shape)] = np.asarray(a, np.float32)
    return out


def prepare_params(params):
    """One-time host repack: PyTorch layouts -> lane-dense, 128-channel padded
    bf16 matmul operands with the 3x3 / fc-position taps folded into K."""
    bf16 = jnp.bfloat16
    p = {}
    # conv1: (16,1,5,5) -> (K=25 pad 32, OC pad 128); feature order = 5*kh+kw.
    w1 = np.asarray(params["conv1_w"], np.float32).reshape(16, 25).T
    p["w1"] = jnp.asarray(_pad_to(w1, (32, CP)), bf16)
    p["b1"] = jnp.asarray(_pad_to(np.asarray(params["conv1_b"])[None, :], (1, CP)))
    # conv2: (32,16,3,3) -> taps folded into K: (9*128, 128), chunk k = 3*dh+dw.
    w2 = np.asarray(params["conv2_w"], np.float32).transpose(2, 3, 1, 0)  # (3,3,16,32)
    w2p = np.zeros((9, CP, CP), np.float32)
    w2p[:, :16, :32] = w2.reshape(9, 16, 32)
    p["w2"] = jnp.asarray(w2p.reshape(9 * CP, CP), bf16)
    p["b2"] = jnp.asarray(_pad_to(np.asarray(params["conv2_b"])[None, :], (1, CP)))
    # conv3: (64,32,3,3) -> (9*128, 128).
    w3 = np.asarray(params["conv3_w"], np.float32).transpose(2, 3, 1, 0)  # (3,3,32,64)
    w3p = np.zeros((9, CP, CP), np.float32)
    w3p[:, :32, :64] = w3.reshape(9, 32, 64)
    p["w3"] = jnp.asarray(w3p.reshape(9 * CP, CP), bf16)
    p["b3"] = jnp.asarray(_pad_to(np.asarray(params["conv3_b"])[None, :], (1, CP)))
    # encoder fc (576 -> latent): 9 per-position (64 -> latent) slices folded
    # into K; chunk p = 3*oh+ow matches the kernel's row gather (_DELTAS_FC).
    ld = params["fc_w"].shape[0]
    wfc = np.asarray(params["fc_w"], np.float32).reshape(ld, 64, 9).transpose(2, 1, 0)
    wfcp = np.zeros((9, CP, CP), np.float32)
    wfcp[:, :64, :ld] = wfc
    p["wfc"] = jnp.asarray(wfcp.reshape(9 * CP, CP), bf16)
    p["bfc"] = jnp.asarray(_pad_to(np.asarray(params["fc_b"])[None, :], (1, CP)))
    # head
    p["wfc1"] = jnp.asarray(_pad_to(np.asarray(params["fc1_w"]).T, (CP, CP)), bf16)
    p["bfc1"] = jnp.asarray(_pad_to(np.asarray(params["fc1_b"])[None, :], (1, CP)))
    p["wfc2"] = jnp.asarray(_pad_to(np.asarray(params["fc2_w"]).T, (CP, CP)), bf16)
    p["bfc2"] = jnp.asarray(_pad_to(np.asarray(params["fc2_b"])[None, :], (1, CP)))
    # pool-2 gather + zero-ring placement: per-sample constant, O(1) in batch.
    s2 = np.zeros((64, WM2_ROWS), np.float32)
    for g in range(6):
        for f in range(6):
            s2[8 * (g + 1) + (f + 1), 16 * (2 * g + 1) + (2 * f + 1)] = 1.0
    p["s2"] = jnp.asarray(s2, bf16)
    return p


_PARAM_ORDER = ("w1", "b1", "w2", "b2", "w3", "b3",
                "wfc", "bfc", "wfc1", "bfc1", "wfc2", "bfc2", "s2")


# ------------------------------ forward (glue) ------------------------------

def classifier_forward(prep, x, num_classes=10):
    """x: (B, 1, 28, 28) NCHW -> (B, num_classes)."""
    B = x.shape[0]
    # Single-op im2col for conv1 (5x5, valid); rows reordered so that the four
    # 2x2-max-pool taps are contiguous 144-row blocks:
    #   row = 144*(2i+j) + 12*g + f   <->   conv1 output position (2g+i, 2f+j)
    # TODO(synk): conv1's patch extraction stays in XLA -- doing it in-kernel
    # needs a lane<->sublane transpose of the 28x28 image with no cheap op.
    pt = lax.conv_general_dilated_patches(x, (5, 5), (1, 1), "VALID")  # (B,25,24,24)
    pt = pt.transpose(0, 2, 3, 1)                                      # (B,24,24,25)
    pt = pt.reshape(B, 12, 2, 12, 2, 25).transpose(0, 2, 4, 1, 3, 5)
    pt = pt.reshape(B, 576, 25)
    patches = jnp.pad(pt, ((0, 0), (0, 0), (0, 7))).astype(jnp.bfloat16)

    def wspec(a):
        return pl.BlockSpec(a.shape, lambda b, n=a.ndim: (0,) * n)

    weights = tuple(prep[k] for k in _PARAM_ORDER)
    out = pl.pallas_call(
        _classifier_kernel,
        grid=(B,),
        out_shape=jax.ShapeDtypeStruct((B, 8, CP), jnp.float32),
        in_specs=[pl.BlockSpec((None, 576, 32), lambda b: (b, 0, 0))] +
                 [wspec(a) for a in weights],
        out_specs=pl.BlockSpec((None, 8, CP), lambda b: (b, 0, 0)),
        compiler_params=pltpu.CompilerParams(
            dimension_semantics=("parallel",)),
    )(patches, *weights)
    return out[:, 0, :num_classes]


# ---------------------------- params / reference ----------------------------

def init_params(key, latent_dim=12, num_classes=10):
    ks = jax.random.split(key, 12)
    s = 0.05
    return {
        "conv1_w": s * jax.random.normal(ks[0], (16, 1, 5, 5), jnp.float32),
        "conv1_b": s * jax.random.normal(ks[1], (16,), jnp.float32),
        "conv2_w": s * jax.random.normal(ks[2], (32, 16, 3, 3), jnp.float32),
        "conv2_b": s * jax.random.normal(ks[3], (32,), jnp.float32),
        "conv3_w": s * jax.random.normal(ks[4], (64, 32, 3, 3), jnp.float32),
        "conv3_b": s * jax.random.normal(ks[5], (64,), jnp.float32),
        "fc_w":   s * jax.random.normal(ks[6], (latent_dim, 64 * 3 * 3), jnp.float32),
        "fc_b":   s * jax.random.normal(ks[7], (latent_dim,), jnp.float32),
        "fc1_w":  s * jax.random.normal(ks[8], (64, latent_dim), jnp.float32),
        "fc1_b":  s * jax.random.normal(ks[9], (64,), jnp.float32),
        "fc2_w":  s * jax.random.normal(ks[10], (num_classes, 64), jnp.float32),
        "fc2_b":  s * jax.random.normal(ks[11], (num_classes,), jnp.float32),
    }


def reference_forward(params, x):
    """Plain-XLA reference (f32), used only for a sanity check."""
    dn = ("NCHW", "OIHW", "NCHW")
    def conv(y, w, b, stride, pad):
        d = jax.lax.conv_dimension_numbers(y.shape, w.shape, dn)
        y = jax.lax.conv_general_dilated(y, w, (stride, stride), pad,
                                         dimension_numbers=d)
        return jax.nn.relu(y + b[None, :, None, None])
    y = conv(x, params["conv1_w"], params["conv1_b"], 1, "VALID")
    y = jax.lax.reduce_window(y, -jnp.inf, jax.lax.max,
                              (1, 1, 2, 2), (1, 1, 2, 2), "VALID")
    y = conv(y, params["conv2_w"], params["conv2_b"], 1, [(1, 1), (1, 1)])
    y = jax.lax.reduce_window(y, -jnp.inf, jax.lax.max,
                              (1, 1, 2, 2), (1, 1, 2, 2), "VALID")
    y = conv(y, params["conv3_w"], params["conv3_b"], 2, [(1, 1), (1, 1)])
    y = y.reshape(y.shape[0], -1)
    y = y @ params["fc_w"].T + params["fc_b"]
    y = jax.nn.relu(y @ params["fc1_w"].T + params["fc1_b"])
    y = y @ params["fc2_w"].T + params["fc2_b"]
    return y


# ----------------------------------- main -----------------------------------

if __name__ == "__main__":
    key = jax.random.PRNGKey(0)
    k_params, k_x = jax.random.split(key)
    params = init_params(k_params, latent_dim=12, num_classes=10)

    batch = 2
    x = jax.random.normal(k_x, (batch, 1, 28, 28), jnp.float32)

    prep = prepare_params(params)            # one-time host-side weight repack

    fwd = jax.jit(functools.partial(classifier_forward, num_classes=10))
    out = jax.block_until_ready(fwd(prep, x))
    assert out.shape == (batch, 10), out.shape

    # sanity check against plain XLA (loose tolerance: bf16 matmul operands)
    ref = jax.block_until_ready(reference_forward(params, x))
    assert jnp.allclose(out, ref, atol=5e-2, rtol=1e-1), (out, ref)

    print("KERNEL_OK")
</pallas_src>

<mosaic_0001>
module attributes {stable_mosaic.version = 11 : i64} {
  func.func @_classifier_kernel(%arg0: i32, %arg1: memref<1x576x32xbf16, #tpu.memory_space<vmem>>, %arg2: memref<32x128xbf16, #tpu.memory_space<vmem>>, %arg3: memref<1x128xf32, #tpu.memory_space<vmem>>, %arg4: memref<1152x128xbf16, #tpu.memory_space<vmem>>, %arg5: memref<1x128xf32, #tpu.memory_space<vmem>>, %arg6: memref<1152x128xbf16, #tpu.memory_space<vmem>>, %arg7: memref<1x128xf32, #tpu.memory_space<vmem>>, %arg8: memref<1152x128xbf16, #tpu.memory_space<vmem>>, %arg9: memref<1x128xf32, #tpu.memory_space<vmem>>, %arg10: memref<128x128xbf16, #tpu.memory_space<vmem>>, %arg11: memref<1x128xf32, #tpu.memory_space<vmem>>, %arg12: memref<128x128xbf16, #tpu.memory_space<vmem>>, %arg13: memref<1x128xf32, #tpu.memory_space<vmem>>, %arg14: memref<64x192xbf16, #tpu.memory_space<vmem>>, %arg15: memref<1x8x128xf32, #tpu.memory_space<vmem>>) attributes {dimension_semantics = [#tpu.dimension_semantics<parallel>], iteration_bounds = array<i64: 2>, scalar_prefetch = 0 : i64, scratch_operands = 0 : i64, tpu.core_type = #tpu.core_type<tc>, window_params = [{transform_indices = @transform_0, window_bounds = array<i64: 1, 576, 32>}, {pipeline_mode = #tpu.pipeline_mode<synchronous>, transform_indices = @transform_1, window_bounds = array<i64: 32, 128>}, {pipeline_mode = #tpu.pipeline_mode<synchronous>, transform_indices = @transform_2, window_bounds = array<i64: 1, 128>}, {pipeline_mode = #tpu.pipeline_mode<synchronous>, transform_indices = @transform_3, window_bounds = array<i64: 1152, 128>}, {pipeline_mode = #tpu.pipeline_mode<synchronous>, transform_indices = @transform_4, window_bounds = array<i64: 1, 128>}, {pipeline_mode = #tpu.pipeline_mode<synchronous>, transform_indices = @transform_5, window_bounds = array<i64: 1152, 128>}, {pipeline_mode = #tpu.pipeline_mode<synchronous>, transform_indices = @transform_6, window_bounds = array<i64: 1, 128>}, {pipeline_mode = #tpu.pipeline_mode<synchronous>, transform_indices = @transform_7, window_bounds = array<i64: 1152, 128>}, {pipeline_mode = #tpu.pipeline_mode<synchronous>, transform_indices = @transform_8, window_bounds = array<i64: 1, 128>}, {pipeline_mode = #tpu.pipeline_mode<synchronous>, transform_indices = @transform_9, window_bounds = array<i64: 128, 128>}, {pipeline_mode = #tpu.pipeline_mode<synchronous>, transform_indices = @transform_10, window_bounds = array<i64: 1, 128>}, {pipeline_mode = #tpu.pipeline_mode<synchronous>, transform_indices = @transform_11, window_bounds = array<i64: 128, 128>}, {pipeline_mode = #tpu.pipeline_mode<synchronous>, transform_indices = @transform_12, window_bounds = array<i64: 1, 128>}, {pipeline_mode = #tpu.pipeline_mode<synchronous>, transform_indices = @transform_13, window_bounds = array<i64: 64, 192>}, {transform_indices = @transform_14, window_bounds = array<i64: 1, 8, 128>}]} {
    %c0 = arith.constant 0 : index
    %c0_0 = arith.constant 0 : index
    %c0_1 = arith.constant 0 : index
    %0 = vector.load %arg1[%c0, %c0_0, %c0_1] : memref<1x576x32xbf16, #tpu.memory_space<vmem>>, vector<1x576x32xbf16>
    %1 = vector.shape_cast %0 : vector<1x576x32xbf16> to vector<576x32xbf16>
    %c0_2 = arith.constant 0 : index
    %c0_3 = arith.constant 0 : index
    %2 = vector.load %arg2[%c0_2, %c0_3] : memref<32x128xbf16, #tpu.memory_space<vmem>>, vector<32x128xbf16>
    %cst = arith.constant dense<0.000000e+00> : vector<576x128xf32>
    %3 = tpu.matmul %1, %2, %cst {dimension_numbers = #tpu.dot_dimension_numbers<[1], [0], [0], [1], [0, 0, 1, 1], [], []>} : vector<576x32xbf16>, vector<32x128xbf16>, vector<576x128xf32> -> vector<576x128xf32>
    %c0_4 = arith.constant 0 : index
    %c0_5 = arith.constant 0 : index
    %4 = vector.load %arg3[%c0_4, %c0_5] : memref<1x128xf32, #tpu.memory_space<vmem>>, vector<1x128xf32>
    %5 = vector.broadcast %4 : vector<1x128xf32> to vector<576x128xf32>
    %6 = arith.addf %3, %5 : vector<576x128xf32>
    %cst_6 = arith.constant 0.000000e+00 : f32
    %7 = vector.broadcast %cst_6 : f32 to vector<576x128xf32>
    %8 = arith.maximumf %6, %7 : vector<576x128xf32>
    %9 = vector.extract_strided_slice %8 {offsets = [0, 0], sizes = [144, 128], strides = [1, 1]} : vector<576x128xf32> to vector<144x128xf32>
    %10 = vector.extract_strided_slice %8 {offsets = [144, 0], sizes = [144, 128], strides = [1, 1]} : vector<576x128xf32> to vector<144x128xf32>
    %11 = arith.maximumf %9, %10 : vector<144x128xf32>
    %12 = vector.extract_strided_slice %8 {offsets = [288, 0], sizes = [144, 128], strides = [1, 1]} : vector<576x128xf32> to vector<144x128xf32>
    %13 = vector.extract_strided_slice %8 {offsets = [432, 0], sizes = [144, 128], strides = [1, 1]} : vector<576x128xf32> to vector<144x128xf32>
    %14 = arith.maximumf %12, %13 : vector<144x128xf32>
    %15 = arith.maximumf %11, %14 : vector<144x128xf32>
    %cst_7 = arith.constant 0.000000e+00 : f32
    %16 = vector.broadcast %cst_7 : f32 to vector<1x128xf32>
    %cst_8 = arith.constant 0.000000e+00 : f32
    %17 = vector.broadcast %cst_8 : f32 to vector<3x128xf32>
    %cst_9 = arith.constant 0.000000e+00 : f32
    %18 = vector.broadcast %cst_9 : f32 to vector<40x128xf32>
    %19 = vector.extract_strided_slice %15 {offsets = [0, 0], sizes = [12, 128], strides = [1, 1]} : vector<144x128xf32> to vector<12x128xf32>
    %20 = vector.extract_strided_slice %15 {offsets = [12, 0], sizes = [12, 128], strides = [1, 1]} : vector<144x128xf32> to vector<12x128xf32>
    %21 = vector.extract_strided_slice %15 {offsets = [24, 0], sizes = [12, 128], strides = [1, 1]} : vector<144x128xf32> to vector<12x128xf32>
    %22 = vector.extract_strided_slice %15 {offsets = [36, 0], sizes = [12, 128], strides = [1, 1]} : vector<144x128xf32> to vector<12x128xf32>
    %23 = vector.extract_strided_slice %15 {offsets = [48, 0], sizes = [12, 128], strides = [1, 1]} : vector<144x128xf32> to vector<12x128xf32>
    %24 = vector.extract_strided_slice %15 {offsets = [60, 0], sizes = [12, 128], strides = [1, 1]} : vector<144x128xf32> to vector<12x128xf32>
    %25 = vector.extract_strided_slice %15 {offsets = [72, 0], sizes = [12, 128], strides = [1, 1]} : vector<144x128xf32> to vector<12x128xf32>
    %26 = vector.extract_strided_slice %15 {offsets = [84, 0], sizes = [12, 128], strides = [1, 1]} : vector<144x128xf32> to vector<12x128xf32>
    %27 = vector.extract_strided_slice %15 {offsets = [96, 0], sizes = [12, 128], strides = [1, 1]} : vector<144x128xf32> to vector<12x128xf32>
    %28 = vector.extract_strided_slice %15 {offsets = [108, 0], sizes = [12, 128], strides = [1, 1]} : vector<144x128xf32> to vector<12x128xf32>
    %29 = vector.extract_strided_slice %15 {offsets = [120, 0], sizes = [12, 128], strides = [1, 1]} : vector<144x128xf32> to vector<12x128xf32>
    %30 = vector.extract_strided_slice %15 {offsets = [132, 0], sizes = [12, 128], strides = [1, 1]} : vector<144x128xf32> to vector<12x128xf32>
    %cst_10 = arith.constant 0.000000e+00 : f32
    %31 = vector.broadcast %cst_10 : f32 to vector<72x128xf32>
    %32 = tpu.concatenate %18, %16, %19, %17, %16, %20, %17, %16, %21, %17, %16, %22, %17, %16, %23, %17 in 0 : vector<40x128xf32>, vector<1x128xf32>, vector<12x128xf32>, vector<3x128xf32>, vector<1x128xf32>, vector<12x128xf32>, vector<3x128xf32>, vector<1x128xf32>, vector<12x128xf32>, vector<3x128xf32>, vector<1x128xf32>, vector<12x128xf32>, vector<3x128xf32>, vector<1x128xf32>, vector<12x128xf32>, vector<3x128xf32> -> vector<120x128xf32>
    %33 = tpu.concatenate %16, %24, %17, %16, %25, %17, %16, %26, %17, %16, %27, %17, %16, %28, %17, %16 in 0 : vector<1x128xf32>, vector<12x128xf32>, vector<3x128xf32>, vector<1x128xf32>, vector<12x128xf32>, vector<3x128xf32>, vector<1x128xf32>, vector<12x128xf32>, vector<3x128xf32>, vector<1x128xf32>, vector<12x128xf32>, vector<3x128xf32>, vector<1x128xf32>, vector<12x128xf32>, vector<3x128xf32>, vector<1x128xf32> -> vector<81x128xf32>
    %34 = tpu.concatenate %29, %17, %16, %30, %17, %31 in 0 : vector<12x128xf32>, vector<3x128xf32>, vector<1x128xf32>, vector<12x128xf32>, vector<3x128xf32>, vector<72x128xf32> -> vector<103x128xf32>
    %35 = tpu.concatenate %32, %33, %34 in 0 : vector<120x128xf32>, vector<81x128xf32>, vector<103x128xf32> -> vector<304x128xf32>
    %36 = vector.extract_strided_slice %35 {offsets = [7, 0], sizes = [256, 128], strides = [1, 1]} : vector<304x128xf32> to vector<256x128xf32>
    %37 = vector.extract_strided_slice %35 {offsets = [8, 0], sizes = [256, 128], strides = [1, 1]} : vector<304x128xf32> to vector<256x128xf32>
    %38 = vector.extract_strided_slice %35 {offsets = [9, 0], sizes = [256, 128], strides = [1, 1]} : vector<304x128xf32> to vector<256x128xf32>
    %39 = vector.extract_strided_slice %35 {offsets = [23, 0], sizes = [256, 128], strides = [1, 1]} : vector<304x128xf32> to vector<256x128xf32>
    %40 = vector.extract_strided_slice %35 {offsets = [24, 0], sizes = [256, 128], strides = [1, 1]} : vector<304x128xf32> to vector<256x128xf32>
    %41 = vector.extract_strided_slice %35 {offsets = [25, 0], sizes = [256, 128], strides = [1, 1]} : vector<304x128xf32> to vector<256x128xf32>
    %42 = vector.extract_strided_slice %35 {offsets = [39, 0], sizes = [256, 128], strides = [1, 1]} : vector<304x128xf32> to vector<256x128xf32>
    %43 = vector.extract_strided_slice %35 {offsets = [40, 0], sizes = [256, 128], strides = [1, 1]} : vector<304x128xf32> to vector<256x128xf32>
    %44 = vector.extract_strided_slice %35 {offsets = [41, 0], sizes = [256, 128], strides = [1, 1]} : vector<304x128xf32> to vector<256x128xf32>
    %45 = tpu.concatenate %36, %37, %38, %39, %40, %41, %42, %43, %44 in 1 : vector<256x128xf32>, vector<256x128xf32>, vector<256x128xf32>, vector<256x128xf32>, vector<256x128xf32>, vector<256x128xf32>, vector<256x128xf32>, vector<256x128xf32>, vector<256x128xf32> -> vector<256x1152xf32>
    %46 = arith.truncf %45 : vector<256x1152xf32> to vector<256x1152xbf16>
    %c0_11 = arith.constant 0 : index
    %c0_12 = arith.constant 0 : index
    %47 = vector.load %arg4[%c0_11, %c0_12] : memref<1152x128xbf16, #tpu.memory_space<vmem>>, vector<1152x128xbf16>
    %cst_13 = arith.constant dense<0.000000e+00> : vector<256x128xf32>
    %48 = tpu.matmul %46, %47, %cst_13 {dimension_numbers = #tpu.dot_dimension_numbers<[1], [0], [0], [1], [0, 0, 1, 1], [], []>} : vector<256x1152xbf16>, vector<1152x128xbf16>, vector<256x128xf32> -> vector<256x128xf32>
    %c0_14 = arith.constant 0 : index
    %c0_15 = arith.constant 0 : index
    %49 = vector.load %arg5[%c0_14, %c0_15] : memref<1x128xf32, #tpu.memory_space<vmem>>, vector<1x128xf32>
    %50 = vector.broadcast %49 : vector<1x128xf32> to vector<256x128xf32>
    %51 = arith.addf %48, %50 : vector<256x128xf32>
    %cst_16 = arith.constant 0.000000e+00 : f32
    %52 = vector.broadcast %cst_16 : f32 to vector<256x128xf32>
    %53 = arith.maximumf %51, %52 : vector<256x128xf32>
    %54 = vector.extract_strided_slice %53 {offsets = [0, 0], sizes = [192, 128], strides = [1, 1]} : vector<256x128xf32> to vector<192x128xf32>
    %55 = vector.extract_strided_slice %53 {offsets = [1, 0], sizes = [192, 128], strides = [1, 1]} : vector<256x128xf32> to vector<192x128xf32>
    %56 = arith.maximumf %54, %55 : vector<192x128xf32>
    %57 = vector.extract_strided_slice %53 {offsets = [16, 0], sizes = [192, 128], strides = [1, 1]} : vector<256x128xf32> to vector<192x128xf32>
    %58 = vector.extract_strided_slice %53 {offsets = [17, 0], sizes = [192, 128], strides = [1, 1]} : vector<256x128xf32> to vector<192x128xf32>
    %59 = arith.maximumf %57, %58 : vector<192x128xf32>
    %60 = arith.maximumf %56, %59 : vector<192x128xf32>
    %c0_17 = arith.constant 0 : index
    %c0_18 = arith.constant 0 : index
    %61 = vector.load %arg14[%c0_17, %c0_18] : memref<64x192xbf16, #tpu.memory_space<vmem>>, vector<64x192xbf16>
    %62 = arith.truncf %60 : vector<192x128xf32> to vector<192x128xbf16>
    %cst_19 = arith.constant dense<0.000000e+00> : vector<64x128xf32>
    %63 = tpu.matmul %61, %62, %cst_19 {dimension_numbers = #tpu.dot_dimension_numbers<[1], [0], [0], [1], [0, 0, 1, 1], [], []>} : vector<64x192xbf16>, vector<192x128xbf16>, vector<64x128xf32> -> vector<64x128xf32>
    %cst_20 = arith.constant 0.000000e+00 : f32
    %64 = vector.broadcast %cst_20 : f32 to vector<16x128xf32>
    %cst_21 = arith.constant 0.000000e+00 : f32
    %65 = vector.broadcast %cst_21 : f32 to vector<16x128xf32>
    %66 = tpu.concatenate %64, %63, %65 in 0 : vector<16x128xf32>, vector<64x128xf32>, vector<16x128xf32> -> vector<96x128xf32>
    %67 = vector.extract_strided_slice %66 {offsets = [7, 0], sizes = [64, 128], strides = [1, 1]} : vector<96x128xf32> to vector<64x128xf32>
    %68 = vector.extract_strided_slice %66 {offsets = [8, 0], sizes = [64, 128], strides = [1, 1]} : vector<96x128xf32> to vector<64x128xf32>
    %69 = vector.extract_strided_slice %66 {offsets = [9, 0], sizes = [64, 128], strides = [1, 1]} : vector<96x128xf32> to vector<64x128xf32>
    %70 = vector.extract_strided_slice %66 {offsets = [15, 0], sizes = [64, 128], strides = [1, 1]} : vector<96x128xf32> to vector<64x128xf32>
    %71 = vector.extract_strided_slice %66 {offsets = [16, 0], sizes = [64, 128], strides = [1, 1]} : vector<96x128xf32> to vector<64x128xf32>
    %72 = vector.extract_strided_slice %66 {offsets = [17, 0], sizes = [64, 128], strides = [1, 1]} : vector<96x128xf32> to vector<64x128xf32>
    %73 = vector.extract_strided_slice %66 {offsets = [23, 0], sizes = [64, 128], strides = [1, 1]} : vector<96x128xf32> to vector<64x128xf32>
    %74 = vector.extract_strided_slice %66 {offsets = [24, 0], sizes = [64, 128], strides = [1, 1]} : vector<96x128xf32> to vector<64x128xf32>
    %75 = vector.extract_strided_slice %66 {offsets = [25, 0], sizes = [64, 128], strides = [1, 1]} : vector<96x128xf32> to vector<64x128xf32>
    %76 = tpu.concatenate %67, %68, %69, %70, %71, %72, %73, %74, %75 in 1 : vector<64x128xf32>, vector<64x128xf32>, vector<64x128xf32>, vector<64x128xf32>, vector<64x128xf32>, vector<64x128xf32>, vector<64x128xf32>, vector<64x128xf32>, vector<64x128xf32> -> vector<64x1152xf32>
    %77 = arith.truncf %76 : vector<64x1152xf32> to vector<64x1152xbf16>
    %c0_22 = arith.constant 0 : index
    %c0_23 = arith.constant 0 : index
    %78 = vector.load %arg6[%c0_22, %c0_23] : memref<1152x128xbf16, #tpu.memory_space<vmem>>, vector<1152x128xbf16>
    %cst_24 = arith.constant dense<0.000000e+00> : vector<64x128xf32>
    %79 = tpu.matmul %77, %78, %cst_24 {dimension_numbers = #tpu.dot_dimension_numbers<[1], [0], [0], [1], [0, 0, 1, 1], [], []>} : vector<64x1152xbf16>, vector<1152x128xbf16>, vector<64x128xf32> -> vector<64x128xf32>
    %c0_25 = arith.constant 0 : index
    %c0_26 = arith.constant 0 : index
    %80 = vector.load %arg7[%c0_25, %c0_26] : memref<1x128xf32, #tpu.memory_space<vmem>>, vector<1x128xf32>
    %81 = vector.broadcast %80 : vector<1x128xf32> to vector<64x128xf32>
    %82 = arith.addf %79, %81 : vector<64x128xf32>
    %cst_27 = arith.constant 0.000000e+00 : f32
    %83 = vector.broadcast %cst_27 : f32 to vector<64x128xf32>
    %84 = arith.maximumf %82, %83 : vector<64x128xf32>
    %85 = vector.extract_strided_slice %84 {offsets = [9, 0], sizes = [8, 128], strides = [1, 1]} : vector<64x128xf32> to vector<8x128xf32>
    %86 = vector.extract_strided_slice %84 {offsets = [11, 0], sizes = [8, 128], strides = [1, 1]} : vector<64x128xf32> to vector<8x128xf32>
    %87 = vector.extract_strided_slice %84 {offsets = [13, 0], sizes = [8, 128], strides = [1, 1]} : vector<64x128xf32> to vector<8x128xf32>
    %88 = vector.extract_strided_slice %84 {offsets = [25, 0], sizes = [8, 128], strides = [1, 1]} : vector<64x128xf32> to vector<8x128xf32>
    %89 = vector.extract_strided_slice %84 {offsets = [27, 0], sizes = [8, 128], strides = [1, 1]} : vector<64x128xf32> to vector<8x128xf32>
    %90 = vector.extract_strided_slice %84 {offsets = [29, 0], sizes = [8, 128], strides = [1, 1]} : vector<64x128xf32> to vector<8x128xf32>
    %91 = vector.extract_strided_slice %84 {offsets = [41, 0], sizes = [8, 128], strides = [1, 1]} : vector<64x128xf32> to vector<8x128xf32>
    %92 = vector.extract_strided_slice %84 {offsets = [43, 0], sizes = [8, 128], strides = [1, 1]} : vector<64x128xf32> to vector<8x128xf32>
    %93 = vector.extract_strided_slice %84 {offsets = [45, 0], sizes = [8, 128], strides = [1, 1]} : vector<64x128xf32> to vector<8x128xf32>
    %94 = tpu.concatenate %85, %86, %87, %88, %89, %90, %91, %92, %93 in 1 : vector<8x128xf32>, vector<8x128xf32>, vector<8x128xf32>, vector<8x128xf32>, vector<8x128xf32>, vector<8x128xf32>, vector<8x128xf32>, vector<8x128xf32>, vector<8x128xf32> -> vector<8x1152xf32>
    %95 = arith.truncf %94 : vector<8x1152xf32> to vector<8x1152xbf16>
    %c0_28 = arith.constant 0 : index
    %c0_29 = arith.constant 0 : index
    %96 = vector.load %arg8[%c0_28, %c0_29] : memref<1152x128xbf16, #tpu.memory_space<vmem>>, vector<1152x128xbf16>
    %cst_30 = arith.constant dense<0.000000e+00> : vector<8x128xf32>
    %97 = tpu.matmul %95, %96, %cst_30 {dimension_numbers = #tpu.dot_dimension_numbers<[1], [0], [0], [1], [0, 0, 1, 1], [], []>} : vector<8x1152xbf16>, vector<1152x128xbf16>, vector<8x128xf32> -> vector<8x128xf32>
    %c0_31 = arith.constant 0 : index
    %c0_32 = arith.constant 0 : index
    %98 = vector.load %arg9[%c0_31, %c0_32] : memref<1x128xf32, #tpu.memory_space<vmem>>, vector<1x128xf32>
    %99 = vector.broadcast %98 : vector<1x128xf32> to vector<8x128xf32>
    %100 = arith.addf %97, %99 : vector<8x128xf32>
    %101 = arith.truncf %100 : vector<8x128xf32> to vector<8x128xbf16>
    %c0_33 = arith.constant 0 : index
    %c0_34 = arith.constant 0 : index
    %102 = vector.load %arg10[%c0_33, %c0_34] : memref<128x128xbf16, #tpu.memory_space<vmem>>, vector<128x128xbf16>
    %cst_35 = arith.constant dense<0.000000e+00> : vector<8x128xf32>
    %103 = tpu.matmul %101, %102, %cst_35 {dimension_numbers = #tpu.dot_dimension_numbers<[1], [0], [0], [1], [0, 0, 1, 1], [], []>} : vector<8x128xbf16>, vector<128x128xbf16>, vector<8x128xf32> -> vector<8x128xf32>
    %c0_36 = arith.constant 0 : index
    %c0_37 = arith.constant 0 : index
    %104 = vector.load %arg11[%c0_36, %c0_37] : memref<1x128xf32, #tpu.memory_space<vmem>>, vector<1x128xf32>
    %105 = vector.broadcast %104 : vector<1x128xf32> to vector<8x128xf32>
    %106 = arith.addf %103, %105 : vector<8x128xf32>
    %cst_38 = arith.constant 0.000000e+00 : f32
    %107 = vector.broadcast %cst_38 : f32 to vector<8x128xf32>
    %108 = arith.maximumf %106, %107 : vector<8x128xf32>
    %109 = arith.truncf %108 : vector<8x128xf32> to vector<8x128xbf16>
    %c0_39 = arith.constant 0 : index
    %c0_40 = arith.constant 0 : index
    %110 = vector.load %arg12[%c0_39, %c0_40] : memref<128x128xbf16, #tpu.memory_space<vmem>>, vector<128x128xbf16>
    %cst_41 = arith.constant dense<0.000000e+00> : vector<8x128xf32>
    %111 = tpu.matmul %109, %110, %cst_41 {dimension_numbers = #tpu.dot_dimension_numbers<[1], [0], [0], [1], [0, 0, 1, 1], [], []>} : vector<8x128xbf16>, vector<128x128xbf16>, vector<8x128xf32> -> vector<8x128xf32>
    %c0_42 = arith.constant 0 : index
    %c0_43 = arith.constant 0 : index
    %112 = vector.load %arg13[%c0_42, %c0_43] : memref<1x128xf32, #tpu.memory_space<vmem>>, vector<1x128xf32>
    %113 = vector.broadcast %112 : vector<1x128xf32> to vector<8x128xf32>
    %114 = arith.addf %111, %113 : vector<8x128xf32>
    %c0_44 = arith.constant 0 : index
    %c0_45 = arith.constant 0 : index
    %c0_46 = arith.constant 0 : index
    %115 = vector.load %arg15[%c0_44, %c0_45, %c0_46] : memref<1x8x128xf32, #tpu.memory_space<vmem>>, vector<1x8x128xf32>
    %116 = vector.shape_cast %115 : vector<1x8x128xf32> to vector<8x128xf32>
    %117 = vector.shape_cast %114 : vector<8x128xf32> to vector<1x8x128xf32>
    tpu.vector_store %arg15[%c0_44, %c0_45, %c0_46], %117 {strides = array<i32>} : memref<1x8x128xf32, #tpu.memory_space<vmem>>, vector<1x8x128xf32>,
    return
  }
  func.func @transform_0(%arg0: i32) -> (i32, i32, i32) {
    %c0_i32 = arith.constant 0 : i32
    %c0_i32_0 = arith.constant 0 : i32
    %c0_i32_1 = arith.constant 0 : i32
    return %arg0, %c0_i32, %c0_i32_0 : i32, i32, i32
  }
  func.func @transform_1(%arg0: i32) -> (i32, i32) {
    %c0_i32 = arith.constant 0 : i32
    %c0_i32_0 = arith.constant 0 : i32
    %c0_i32_1 = arith.constant 0 : i32
    return %c0_i32, %c0_i32_0 : i32, i32
  }
  func.func @transform_2(%arg0: i32) -> (i32, i32) {
    %c0_i32 = arith.constant 0 : i32
    %c0_i32_0 = arith.constant 0 : i32
    %c0_i32_1 = arith.constant 0 : i32
    return %c0_i32, %c0_i32_0 : i32, i32
  }
  func.func @transform_3(%arg0: i32) -> (i32, i32) {
    %c0_i32 = arith.constant 0 : i32
    %c0_i32_0 = arith.constant 0 : i32
    %c0_i32_1 = arith.constant 0 : i32
    return %c0_i32, %c0_i32_0 : i32, i32
  }
  func.func @transform_4(%arg0: i32) -> (i32, i32) {
    %c0_i32 = arith.constant 0 : i32
    %c0_i32_0 = arith.constant 0 : i32
    %c0_i32_1 = arith.constant 0 : i32
    return %c0_i32, %c0_i32_0 : i32, i32
  }
  func.func @transform_5(%arg0: i32) -> (i32, i32) {
    %c0_i32 = arith.constant 0 : i32
    %c0_i32_0 = arith.constant 0 : i32
    %c0_i32_1 = arith.constant 0 : i32
    return %c0_i32, %c0_i32_0 : i32, i32
  }
  func.func @transform_6(%arg0: i32) -> (i32, i32) {
    %c0_i32 = arith.constant 0 : i32
    %c0_i32_0 = arith.constant 0 : i32
    %c0_i32_1 = arith.constant 0 : i32
    return %c0_i32, %c0_i32_0 : i32, i32
  }
  func.func @transform_7(%arg0: i32) -> (i32, i32) {
    %c0_i32 = arith.constant 0 : i32
    %c0_i32_0 = arith.constant 0 : i32
    %c0_i32_1 = arith.constant 0 : i32
    return %c0_i32, %c0_i32_0 : i32, i32
  }
  func.func @transform_8(%arg0: i32) -> (i32, i32) {
    %c0_i32 = arith.constant 0 : i32
    %c0_i32_0 = arith.constant 0 : i32
    %c0_i32_1 = arith.constant 0 : i32
    return %c0_i32, %c0_i32_0 : i32, i32
  }
  func.func @transform_9(%arg0: i32) -> (i32, i32) {
    %c0_i32 = arith.constant 0 : i32
    %c0_i32_0 = arith.constant 0 : i32
    %c0_i32_1 = arith.constant 0 : i32
    return %c0_i32, %c0_i32_0 : i32, i32
  }
  func.func @transform_10(%arg0: i32) -> (i32, i32) {
    %c0_i32 = arith.constant 0 : i32
    %c0_i32_0 = arith.constant 0 : i32
    %c0_i32_1 = arith.constant 0 : i32
    return %c0_i32, %c0_i32_0 : i32, i32
  }
  func.func @transform_11(%arg0: i32) -> (i32, i32) {
    %c0_i32 = arith.constant 0 : i32
    %c0_i32_0 = arith.constant 0 : i32
    %c0_i32_1 = arith.constant 0 : i32
    return %c0_i32, %c0_i32_0 : i32, i32
  }
  func.func @transform_12(%arg0: i32) -> (i32, i32) {
    %c0_i32 = arith.constant 0 : i32
    %c0_i32_0 = arith.constant 0 : i32
    %c0_i32_1 = arith.constant 0 : i32
    return %c0_i32, %c0_i32_0 : i32, i32
  }
  func.func @transform_13(%arg0: i32) -> (i32, i32) {
    %c0_i32 = arith.constant 0 : i32
    %c0_i32_0 = arith.constant 0 : i32
    %c0_i32_1 = arith.constant 0 : i32
    return %c0_i32, %c0_i32_0 : i32, i32
  }
  func.func @transform_14(%arg0: i32) -> (i32, i32, i32) {
    %c0_i32 = arith.constant 0 : i32
    %c0_i32_0 = arith.constant 0 : i32
    %c0_i32_1 = arith.constant 0 : i32
    return %arg0, %c0_i32, %c0_i32_0 : i32, i32, i32
  }
}

</mosaic_0001>

<bundles_post_ra>
// kernel: classifier_forward.1
= control target key start
LH: loop header
LB: loop body
LE: loop exit
PB: predicated region body
PF: predicated region fallthrough
CT: control target
= control target key end

     0   :  { %s7528_s29 = smov 0   ;;  %s9758_s0 = inlined_call_operand.vmem [shape: bf16[2,576,32], index: 0, kind: input, shape index: {}]   ;;  %s9759_s1 = inlined_call_operand.vmem [shape: bf16[32,128], index: 1, kind: input, shape index: {}]   ;;  %s9760_s2 = inlined_call_operand.vmem [shape: f32[1,128], index: 2, kind: input, shape index: {}]   ;;  %s9761_s3 = inlined_call_operand.vmem [shape: bf16[1152,128], index: 3, kind: input, shape index: {}]   ;;  %s9762_s4 = inlined_call_operand.vmem [shape: f32[1,128], index: 4, kind: input, shape index: {}]   ;;  %s9763_s5 = inlined_call_operand.vmem [shape: bf16[1152,128], index: 5, kind: input, shape index: {}]   ;;  %s9764_s6 = inlined_call_operand.vmem [shape: f32[1,128], index: 6, kind: input, shape index: {}]   ;;  %s9765_s7 = inlined_call_operand.vmem [shape: bf16[1152,128], index: 7, kind: input, shape index: {}]   ;;  %s9766_s8 = inlined_call_operand.vmem [shape: f32[1,128], index: 8, kind: input, shape index: {}]   ;;  %s9767_s9 = inlined_call_operand.vmem [shape: bf16[128,128], index: 9, kind: input, shape index: {}]   ;;  %s9768_s10 = inlined_call_operand.vmem [shape: f32[1,128], index: 10, kind: input, shape index: {}]   ;;  %s9769_s11 = inlined_call_operand.vmem [shape: bf16[128,128], index: 11, kind: input, shape index: {}]   ;;  %s9770_s12 = inlined_call_operand.vmem [shape: f32[1,128], index: 12, kind: input, shape index: {}]   ;;  %s9771_s13 = inlined_call_operand.vmem [shape: bf16[64,192], index: 13, kind: input, shape index: {}]   ;;  %s9772_s14 = inlined_call_operand.vmem [shape: f32[2,8,128], index: 14, kind: output, shape index: {}]  }
   0x1 LB: > { %s5986_s30 = sadd.s32 4294967295, %s7449_s29   ;;  %p5990_p0 = scmp.ge.s32.totalorder %s7449_s29, 1  ;;  %s7449_s29 = sphi %s7528_s29, %s24_s29  }
   0x2   : > { %p412_p1 = scmp.lt.s32.totalorder %s7449_s29, 3 }
   0x4   : > { %p413_p2 = pnand %p5990_p0, %p412_p1 }
   0x6   : > { %416 = sbr.rel (%p413_p2) target bundleno = 2370 (0x942), region = 76 }
   0xb   : > { %v7184_v0 = vld [vmem:[%s9759_s1 + $0x8] sm:$0xff]  ;;  %p457_p3 = scmp.lt.s32.totalorder %s5986_s30, 1  ;;  %v7183_v1 = vld [vmem:[%s9759_s1] sm:$0xff]  ;;  %vm739_vm0 = vcmask 261120   ;;  %vm1165_vm1 = vcmask 1040384   ;;  %vm1172_vm2 = vcmask 1044480  }
   0xc   : > { %854 = vmatpush.bf16.msra.mxu0 %v7184_v0  ;;  %v7611_v37 = vld [vmem:[%s9760_s2] ss:$0 sm:$0xff]  ;;  %vm1674_vm3 = vsmask.f32 4352  ;;  %vm1258_vm4 = vcmask 1046528   ;;  %vm1389_vm5 = vcmask 1045504  }
   0xd   : > { %s9898_s30 = smov (!%p457_p3, %s5986_s30), 1  ;;  %vm1252_vm6 = vcmask 1043456   ;;  %vm3608_vm7 = vcmask 523264  }
   0xe   : > { %s7425_s19 = smul.u32 288, %s9898_s30  ;;  %s5992_s16 = sshll.u32 %s9898_s30, 3 }
   0xf   : > { %s465_s20 = scalar_lea.vmem %s9772_s14, %s5992_s16 }
  0x10   : > { %855 = vmatpush.bf16.msra.mxu0 %v7183_v1  ;;  %s7548_s22 = scalar_lea.vmem %s9758_s0, %s7425_s19 }
  0x11   : > { %v7147_v2 = vld [vmem:[%s7548_s22] sm:$0xff]  ;;  %v7148_v3 = vld [vmem:[%s7548_s22 + $0x8] sm:$0xff]  ;;  %v7149_v4 = vld [vmem:[%s7548_s22 + $0x10] sm:$0xff] }
  0x12   : > { %v7150_v5 = vld [vmem:[%s7548_s22 + $0x18] sm:$0xff]  ;;  %v7151_v6 = vld [vmem:[%s7548_s22 + $0x20] sm:$0xff]  ;;  %v7152_v7 = vld [vmem:[%s7548_s22 + $0x28] sm:$0xff] }
  0x13   : > { %6145 = vmatmul.msk.bf16.vlgmr.msra.gmra.mxu0 %vm739_vm0, %v7147_v2  ;;  %v7153_v8 = vld [vmem:[%s7548_s22 + $0x30] sm:$0xff]  ;;  %v7154_v9 = vld [vmem:[%s7548_s22 + $0x38] sm:$0xff]  ;;  %v7155_v10 = vld [vmem:[%s7548_s22 + $0x40] sm:$0xff] }
  0x14   : > { %v7156_v13 = vld [vmem:[%s7548_s22 + $0x48] sm:$0xff]  ;;  %v7157_v16 = vld [vmem:[%s7548_s22 + $0x50] sm:$0xff]  ;;  %v7158_v19 = vld [vmem:[%s7548_s22 + $0x58] sm:$0xff] }
  0x15   : > { %v7159_v22 = vld [vmem:[%s7548_s22 + $0x60] sm:$0xff]  ;;  %v7160_v25 = vld [vmem:[%s7548_s22 + $0x68] sm:$0xff]  ;;  %v7161_v28 = vld [vmem:[%s7548_s22 + $0x70] sm:$0xff] }
  0x16   : > { %v7162_v31 = vld [vmem:[%s7548_s22 + $0x78] sm:$0xff]  ;;  %v7163_v34 = vld [vmem:[%s7548_s22 + $0x80] sm:$0xff]  ;;  %v7164_v39 = vld [vmem:[%s7548_s22 + $0x88] sm:$0xff] }
  0x17   : > { %v7165_v52 = vld [vmem:[%s7548_s22 + $0x90] sm:$0xff]  ;;  %v7166_v1 = vld [vmem:[%s7548_s22 + $0x98] sm:$0xff] }
  0x23   : > { %6146 = vmatmul.msk.bf16.gmra.mxu0 %vm739_vm0, %v7148_v3 }
  0x33   : > { %6147 = vmatmul.msk.bf16.gmra.mxu0 %vm739_vm0, %v7149_v4 }
  0x43   : > { %6148 = vmatmul.msk.bf16.gmra.mxu0 %vm739_vm0, %v7150_v5 }
  0x53   : > { %6149 = vmatmul.msk.bf16.gmra.mxu0 %vm739_vm0, %v7151_v6 }
  0x63   : > { %6150 = vmatmul.msk.bf16.gmra.mxu0 %vm739_vm0, %v7152_v7 }
  0x73   : > { %6151 = vmatmul.msk.bf16.gmra.mxu0 %vm739_vm0, %v7153_v8 }
  0x83   : > { %6152 = vmatmul.msk.bf16.gmra.mxu0 %vm739_vm0, %v7154_v9 }
  0x90   : > { %v857_v11 = vpop.f32.mrf.mxu0 }
  0x91   : > { %v858_v38 = vadd.f32 %v7611_v37, %v857_v11 }
  0x93   : > { %6153 = vmatmul.msk.bf16.gmra.mxu0 %vm739_vm0, %v7155_v10  ;;  %v1037_v42 = vmax.f32 %v858_v38, 0.0 }
  0x98   : > { %v859_v12 = vpop.f32.mrf.mxu0 }
  0x99   : > { %v860_v45 = vadd.f32 %v7611_v37, %v859_v12 }
  0x9b   : > { %v1038_v48 = vmax.f32 %v860_v45, 0.0 }
  0xa0   : > { %v862_v14 = vpop.f32.mrf.mxu0 }
  0xa1   : > { %v863_v51 = vadd.f32 %v7611_v37, %v862_v14  ;;  %v7167_v14 = vld [vmem:[%s7548_s22 + $0xa0] sm:$0xff] }
  0xa3   : > { %6154 = vmatmul.msk.bf16.gmra.mxu0 %vm739_vm0, %v7156_v13  ;;  %v1039_v55 = vmax.f32 %v863_v51, 0.0 }
  0xa8   : > { %v864_v15 = vpop.f32.mrf.mxu0 }
  0xa9   : > { %v865_v58 = vadd.f32 %v7611_v37, %v864_v15 }
  0xab   : > { %v1040_v61 = vmax.f32 %v865_v58, 0.0 }
  0xb0   : > { %v867_v17 = vpop.f32.mrf.mxu0 }
  0xb1   : > { %v868_v0 = vadd.f32 %v7611_v37, %v867_v17 }
  0xb3   : > { %6155 = vmatmul.msk.bf16.gmra.mxu0 %vm739_vm0, %v7157_v16  ;;  %v1041_v4 = vmax.f32 %v868_v0, 0.0 }
  0xb8   : > { %v869_v18 = vpop.f32.mrf.mxu0 }
  0xb9   : > { %v870_v7 = vadd.f32 %v7611_v37, %v869_v18 }
  0xbb   : > { %v1042_v10 = vmax.f32 %v870_v7, 0.0 }
  0xc0   : > { %v7573_v20 = vpop.f32.mrf.mxu0 }
  0xc1   : > { %v873_v13 = vadd.f32 %v7611_v37, %v7573_v20 }
  0xc3   : > { %6156 = vmatmul.msk.bf16.gmra.mxu0 %vm739_vm0, %v7158_v19  ;;  %v1043_v17 = vmax.f32 %v873_v13, 0.0 }
  0xc8   : > { %v7576_v21 = vpop.f32.mrf.mxu0 }
  0xd0   : > { %v7579_v23 = vpop.f32.mrf.mxu0 }
  0xd1   : > { %v878_v20 = vadd.f32 %v7611_v37, %v7579_v23 }
  0xd3   : > { %6157 = vmatmul.msk.bf16.gmra.mxu0 %vm739_vm0, %v7159_v22  ;;  %v875_v22 = vadd.f32 %v7611_v37, %v7576_v21 }
  0xd8   : > { %v7582_v24 = vpop.f32.mrf.mxu0 }
  0xd9   : > { %v880_v45 = vadd.f32 %v7611_v37, %v7582_v24 }
  0xe0   : > { %v7585_v26 = vpop.f32.mrf.mxu0 }
  0xe1   : > { %v883_v23 = vadd.f32 %v7611_v37, %v7585_v26 }
  0xe3   : > { %6158 = vmatmul.msk.bf16.gmra.mxu0 %vm739_vm0, %v7160_v25 }
  0xe8   : > { %v7588_v27 = vpop.f32.mrf.mxu0 }
  0xe9   : > { %v885_v58 = vadd.f32 %v7611_v37, %v7588_v27 }
  0xf0   : > { %v7591_v29 = vpop.f32.mrf.mxu0 }
  0xf1   : > { %v888_v26 = vadd.f32 %v7611_v37, %v7591_v29 }
  0xf3   : > { %6159 = vmatmul.msk.bf16.gmra.mxu0 %vm739_vm0, %v7161_v28 }
  0xf8   : > { %v7594_v30 = vpop.f32.mrf.mxu0 }
  0xf9   : > { %v890_v7 = vadd.f32 %v7611_v37, %v7594_v30 }
 0x100   : > { %v7597_v32 = vpop.f32.mrf.mxu0 }
 0x101   : > { %v893_v29 = vadd.f32 %v7611_v37, %v7597_v32 }
 0x103   : > { %6160 = vmatmul.msk.bf16.gmra.mxu0 %vm739_vm0, %v7162_v31  ;;  %v1044_v31 = vmax.f32 %v875_v22, 0.0 }
 0x108   : > { %v7600_v33 = vpop.f32.mrf.mxu0 }
 0x109   : > { %v895_v22 = vadd.f32 %v7611_v37, %v7600_v33 }
 0x110   : > { %v7603_v35 = vpop.f32.mrf.mxu0 }
 0x113   : > { %6161 = vmatmul.msk.bf16.gmra.mxu0 %vm739_vm0, %v7163_v34 }
 0x118   : > { %v7606_v36 = vpop.f32.mrf.mxu0 }
 0x120   : > { %v902_v40 = vpop.f32.mrf.mxu0 }
 0x121   : > { %v903_v41 = vadd.f32 %v7611_v37, %v902_v40 }
 0x123   : > { %v1055_v43 = vmax.f32 %v903_v41, 0.0  ;;  %6162 = vmatmul.msk.bf16.gmra.mxu0 %vm739_vm0, %v7164_v39  ;;  %v7168_v39 = vld [vmem:[%s7548_s22 + $0xa8] sm:$0xff] }
 0x125   : > { %v7617_v44 = vmax.f32 %v1037_v42, %v1055_v43  ;;  %v1045_v42 = vmax.f32 %v878_v20, 0.0  ;;  %v898_v20 = vadd.f32 %v7611_v37, %v7603_v35 }
 0x128   : > { %v904_v46 = vpop.f32.mrf.mxu0 }
 0x129   : > { %v905_v47 = vadd.f32 %v7611_v37, %v904_v46 }
 0x12b   : > { %v1056_v49 = vmax.f32 %v905_v47, 0.0 }
 0x12d   : > { %v7621_v50 = vmax.f32 %v1038_v48, %v1056_v49  ;;  %v1046_v48 = vmax.f32 %v880_v45, 0.0  ;;  %v900_v45 = vadd.f32 %v7611_v37, %v7606_v36 }
 0x12f   : > { %v1054_v35 = vmax.f32 %v900_v45, 0.0  ;;  %v7180_v45 = vld [vmem:[%s7548_s22 + $0x108] sm:$0xff] }
 0x130   : > { %v907_v53 = vpop.f32.mrf.mxu0 }
 0x131   : > { %v908_v54 = vadd.f32 %v7611_v37, %v907_v53 }
 0x133   : > { %v1057_v56 = vmax.f32 %v908_v54, 0.0  ;;  %6163 = vmatmul.msk.bf16.gmra.mxu0 %vm739_vm0, %v7165_v52  ;;  %v7169_v52 = vld [vmem:[%s7548_s22 + $0xb0] sm:$0xff] }
 0x135   : > { %v7627_v57 = vmax.f32 %v1039_v55, %v1057_v56  ;;  %v1047_v55 = vmax.f32 %v883_v23, 0.0  ;;  %v7173_v23 = vld [vmem:[%s7548_s22 + $0xd0] sm:$0xff] }
 0x138   : > { %v909_v59 = vpop.f32.mrf.mxu0 }
 0x139   : > { %v910_v60 = vadd.f32 %v7611_v37, %v909_v59 }
 0x13b   : > { %v1058_v62 = vmax.f32 %v910_v60, 0.0 }
 0x13d   : > { %v7631_v63 = vmax.f32 %v1040_v61, %v1058_v62  ;;  %v1048_v61 = vmax.f32 %v885_v58, 0.0 }
 0x140   : > { %v912_v2 = vpop.f32.mrf.mxu0 }
 0x141   : > { %v913_v3 = vadd.f32 %v7611_v37, %v912_v2 }
 0x143   : > { %v1059_v5 = vmax.f32 %v913_v3, 0.0  ;;  %6164 = vmatmul.msk.bf16.gmra.mxu0 %vm739_vm0, %v7166_v1  ;;  %v7170_v1 = vld [vmem:[%s7548_s22 + $0xb8] sm:$0xff] }
 0x145   : > { %v7637_v6 = vmax.f32 %v1041_v4, %v1059_v5  ;;  %v1049_v4 = vmax.f32 %v888_v26, 0.0  ;;  %v7177_v26 = vld [vmem:[%s7548_s22 + $0xf0] sm:$0xff] }
 0x148   : > { %v914_v8 = vpop.f32.mrf.mxu0 }
 0x149   : > { %v915_v9 = vadd.f32 %v7611_v37, %v914_v8 }
 0x14b   : > { %v1060_v11 = vmax.f32 %v915_v9, 0.0 }
 0x14d   : > { %v7641_v12 = vmax.f32 %v1042_v10, %v1060_v11  ;;  %v1050_v10 = vmax.f32 %v890_v7, 0.0 }
 0x150   : > { %v917_v15 = vpop.f32.mrf.mxu0 }
 0x151   : > { %v918_v16 = vadd.f32 %v7611_v37, %v917_v15 }
 0x153   : > { %v1061_v19 = vmax.f32 %v918_v16, 0.0  ;;  %6165 = vmatmul.msk.bf16.gmra.mxu0 %vm739_vm0, %v7167_v14  ;;  %v7171_v14 = vld [vmem:[%s7548_s22 + $0xc0] sm:$0xff] }
 0x155   : > { %v7648_v18 = vmax.f32 %v1043_v17, %v1061_v19  ;;  %v1051_v17 = vmax.f32 %v893_v29, 0.0  ;;  %v7199_v29 = vld [vmem:[%s9761_s3 + $0x70] sm:$0xff] }
 0x158   : > { %v919_v25 = vpop.f32.mrf.mxu0 }
 0x159   : > { %v920_v28 = vadd.f32 %v7611_v37, %v919_v25 }
 0x15b   : > { %v1062_v34 = vmax.f32 %v920_v28, 0.0 }
 0x15d   : > { %v7653_v38 = vmax.f32 %v1044_v31, %v1062_v34  ;;  %v1052_v31 = vmax.f32 %v895_v22, 0.0  ;;  %v7206_v22 = vld [vmem:[%s9761_s3 + $0xa8] sm:$0xff] }
 0x160   : > { %v922_v40 = vpop.f32.mrf.mxu0 }
 0x161   : > { %v923_v41 = vadd.f32 %v7611_v37, %v922_v40 }
 0x163   : > { %v1063_v43 = vmax.f32 %v923_v41, 0.0  ;;  %6166 = vmatmul.msk.bf16.gmra.mxu0 %vm739_vm0, %v7168_v39  ;;  %v7172_v39 = vld [vmem:[%s7548_s22 + $0xc8] sm:$0xff] }
 0x165   : > { %v7660_v21 = vmax.f32 %v1045_v42, %v1063_v43  ;;  %v1053_v42 = vmax.f32 %v898_v20, 0.0  ;;  %v7187_v20 = vld [vmem:[%s9761_s3 + $0x10] sm:$0xff] }
 0x168   : > { %v924_v46 = vpop.f32.mrf.mxu0 }
 0x169   : > { %v925_v47 = vadd.f32 %v7611_v37, %v924_v46 }
 0x16b   : > { %v1064_v49 = vmax.f32 %v925_v47, 0.0 }
 0x16d   : > { %v7665_v51 = vmax.f32 %v1046_v48, %v1064_v49 }
 0x170   : > { %v927_v53 = vpop.f32.mrf.mxu0 }
 0x171   : > { %v928_v54 = vadd.f32 %v7611_v37, %v927_v53 }
 0x173   : > { %v1065_v56 = vmax.f32 %v928_v54, 0.0  ;;  %6167 = vmatmul.msk.bf16.gmra.mxu0 %vm739_vm0, %v7169_v52  ;;  %v7174_v54 = vld [vmem:[%s7548_s22 + $0xd8] sm:$0xff] }
 0x175   : > { %v7672_v24 = vmax.f32 %v1047_v55, %v1065_v56  ;;  %v7175_v56 = vld [vmem:[%s7548_s22 + $0xe0] sm:$0xff] }
 0x178   : > { %v929_v59 = vpop.f32.mrf.mxu0 }
 0x179   : > { %v930_v60 = vadd.f32 %v7611_v37, %v929_v59 }
 0x17b   : > { %v1066_v62 = vmax.f32 %v930_v60, 0.0  ;;  %v7176_v60 = vld [vmem:[%s7548_s22 + $0xe8] sm:$0xff] }
 0x17d   : > { %v7677_v0 = vmax.f32 %v1048_v61, %v1066_v62 }
 0x180   : > { %v932_v2 = vpop.f32.mrf.mxu0 }
 0x181   : > { %v933_v3 = vadd.f32 %v7611_v37, %v932_v2 }
 0x183   : > { %v1067_v5 = vmax.f32 %v933_v3, 0.0  ;;  %6168 = vmatmul.msk.bf16.gmra.mxu0 %vm739_vm0, %v7170_v1  ;;  %v7178_v3 = vld [vmem:[%s7548_s22 + $0xf8] sm:$0xff] }
 0x185   : > { %v7684_v27 = vmax.f32 %v1049_v4, %v1067_v5  ;;  %v7192_v5 = vld [vmem:[%s9761_s3 + $0x38] sm:$0xff] }
 0x186   : > { %2613 = vmatpush.bf16.msra.mxu1 %v7192_v5 }
 0x188   : > { %v934_v8 = vpop.f32.mrf.mxu0 }
 0x189   : > { %v935_v9 = vadd.f32 %v7611_v37, %v934_v8  ;;  %v7191_v8 = vld [vmem:[%s9761_s3 + $0x30] sm:$0xff] }
 0x18a   : > { %2614 = vmatpush.bf16.msra.mxu1 %v7191_v8 }
 0x18b   : > { %v1068_v11 = vmax.f32 %v935_v9, 0.0  ;;  %v7200_v9 = vld [vmem:[%s9761_s3 + $0x78] sm:$0xff] }
 0x18c   : > { %2697 = vmatpush.bf16.msra.mxu2 %v7200_v9 }
 0x18d   : > { %v7689_v13 = vmax.f32 %v1050_v10, %v1068_v11  ;;  %v7208_v10 = vld [vmem:[%s9761_s3 + $0xb8] sm:$0xff]  ;;  %v7190_v11 = vld [vmem:[%s9761_s3 + $0x28] sm:$0xff] }
 0x18e   : > { %2781 = vmatpush.bf16.msra.mxu3 %v7208_v10  ;;  %2615 = vmatpush.bf16.msra.mxu1 %v7190_v11  ;;  %v7193_v11 = vld [vmem:[%s9761_s3 + $0x40] sm:$0xff] }
 0x190   : > { %v937_v15 = vpop.f32.mrf.mxu0  ;;  %2698 = vmatpush.bf16.msra.mxu2 %v7199_v29 }
 0x191   : > { %v938_v16 = vadd.f32 %v7611_v37, %v937_v15  ;;  %v7179_v15 = vld [vmem:[%s7548_s22 + $0x100] sm:$0xff] }
 0x193   : > { %v1069_v19 = vmax.f32 %v938_v16, 0.0  ;;  %6169 = vmatmul.msk.bf16.gmra.mxu0 %vm739_vm0, %v7171_v14  ;;  %v7207_v14 = vld [vmem:[%s9761_s3 + $0xb0] sm:$0xff] }
 0x194   : > { %2782 = vmatpush.bf16.msra.mxu3 %v7207_v14 }
 0x195   : > { %v7696_v30 = vmax.f32 %v1051_v17, %v1069_v19  ;;  %v7189_v17 = vld [vmem:[%s9761_s3 + $0x20] sm:$0xff]  ;;  %v7198_v19 = vld [vmem:[%s9761_s3 + $0x68] sm:$0xff] }
 0x196   : > { %2616 = vmatpush.bf16.msra.mxu1 %v7189_v17  ;;  %2699 = vmatpush.bf16.msra.mxu2 %v7198_v19  ;;  %v7201_v17 = vld [vmem:[%s9761_s3 + $0x80] sm:$0xff] }
 0x198   : > { %v939_v25 = vpop.f32.mrf.mxu0  ;;  %2783 = vmatpush.bf16.msra.mxu3 %v7206_v22 }
 0x199   : > { %v940_v28 = vadd.f32 %v7611_v37, %v939_v25  ;;  %v7188_v25 = vld [vmem:[%s9761_s3 + $0x18] sm:$0xff] }
 0x19a   : > { %2617 = vmatpush.bf16.msra.mxu1 %v7188_v25 }
 0x19b   : > { %v1070_v34 = vmax.f32 %v940_v28, 0.0  ;;  %v7197_v28 = vld [vmem:[%s9761_s3 + $0x60] sm:$0xff] }
 0x19c   : > { %2700 = vmatpush.bf16.msra.mxu2 %v7197_v28 }
 0x19d   : > { %v7701_v32 = vmax.f32 %v1052_v31, %v1070_v34  ;;  %v7205_v31 = vld [vmem:[%s9761_s3 + $0xa0] sm:$0xff] }
 0x19e   : > { %2784 = vmatpush.bf16.msra.mxu3 %v7205_v31  ;;  %2618 = vmatpush.bf16.msra.mxu1 %v7187_v20 }
 0x19f   : > { %9813 = vst [vmem:[#allocation2_spill] sm:$0xff] %v7701_v32 }
 0x1a0   : > { %v942_v40 = vpop.f32.mrf.mxu0 }
 0x1a1   : > { %v943_v41 = vadd.f32 %v7611_v37, %v942_v40  ;;  %v7204_v40 = vld [vmem:[%s9761_s3 + $0x98] sm:$0xff] }
 0x1a2   : > { %2785 = vmatpush.bf16.msra.mxu3 %v7204_v40  ;;  %v7181_v40 = vld [vmem:[%s7548_s22 + $0x110] sm:$0xff] }
 0x1a3   : > { %v1071_v43 = vmax.f32 %v943_v41, 0.0  ;;  %6170 = vmatmul.msk.bf16.gmra.mxu0 %vm739_vm0, %v7172_v39  ;;  %v7196_v39 = vld [vmem:[%s9761_s3 + $0x58] sm:$0xff]  ;;  %v7186_v41 = vld [vmem:[%s9761_s3 + $0x8] sm:$0xff] }
 0x1a4   : > { %2701 = vmatpush.bf16.msra.mxu2 %v7196_v39  ;;  %2619 = vmatpush.bf16.msra.mxu1 %v7186_v41 }
 0x1a5   : > { %v7708_v33 = vmax.f32 %v1053_v42, %v1071_v43  ;;  %v7195_v42 = vld [vmem:[%s9761_s3 + $0x50] sm:$0xff] }
 0x1a6   : > { %v7203_v43 = vld [vmem:[%s9761_s3 + $0x90] sm:$0xff] }
 0x1a7   : > { %9814 = vst [vmem:[#allocation3_spill] sm:$0xff] %v7708_v33  ;;  %2786 = vmatpush.bf16.msra.mxu3 %v7203_v43 }
 0x1a8   : > { %v944_v46 = vpop.f32.mrf.mxu0  ;;  %2702 = vmatpush.bf16.msra.mxu2 %v7195_v42 }
 0x1a9   : > { %v945_v47 = vadd.f32 %v7611_v37, %v944_v46  ;;  %v9773_v46 = vmov 0.0  }
 0x1aa   : > { %v7832_v5 = vrot.slane %v9773_v46, 2 }
 0x1ab   : > { %v1072_v48 = vmax.f32 %v945_v47, 0.0  ;;  %v7816_v47 = vrot.slane %v9773_v46, 1 }
 0x1ac   : > { %9817 = vst [vmem:[#allocation6_spill] sm:$0xff] %v7832_v5  ;;  %v1478_v29 = vpack.c.bf16 %v7832_v5, %v7832_v5 }
 0x1ad   : > { %v7713_v49 = vmax.f32 %v1054_v35, %v1072_v48  ;;  %9816 = vst [vmem:[#allocation5_spill] sm:$0xff] %v7816_v47  ;;  %v7185_v48 = vld [vmem:[%s9761_s3] sm:$0xff] }
 0x1ae   : > { %2620 = vmatpush.bf16.msra.mxu1 %v7185_v48  ;;  %v1702_v19 = vshrl.u32 %v1478_v29, 16  ;;  %v1705_v22 = vshll.u32 %v1478_v29, 16 }
 0x1af   : > { %9815 = vst [vmem:[#allocation4_spill] sm:$0xff] %v7713_v49 }
 0x1b0   : > { %v7716_v52 = vpop.f32.mrf.mxu0  ;;  %v1704_v31 = vrot.slane %v1702_v19, 3  ;;  %v1707_v20 = vrot.slane %v1705_v22, 4 }
 0x1b1   : > { %v948_v43 = vadd.f32 %v7611_v37, %v7716_v52 }
 0x1b2   : > { %v7851_v39 = vor.u32 %v1707_v20, %v1704_v31 }
 0x1b3   : > { %6171 = vmatmul.msk.bf16.gmra.mxu0 %vm739_vm0, %v7173_v23  ;;  %v7194_v23 = vld [vmem:[%s9761_s3 + $0x48] sm:$0xff] }
 0x1b4   : > { %2703 = vmatpush.bf16.msra.mxu2 %v7194_v23  ;;  %9820 = vst [vmem:[#allocation9_spill] sm:$0xff] %v7851_v39 }
 0x1b8   : > { %v7719_v53 = vpop.f32.mrf.mxu0  ;;  %2704 = vmatpush.bf16.msra.mxu2 %v7193_v11 }
 0x1c0   : > { %v7722_v55 = vpop.f32.mrf.mxu0 }
 0x1c3   : > { %6172 = vmatmul.msk.bf16.gmra.mxu0 %vm739_vm0, %v7174_v54  ;;  %v7452_v54 = vmov 0  }
 0x1c8   : > { %v7725_v36 = vpop.f32.mrf.mxu0 }
 0x1c9   : > { %v955_v20 = vadd.f32 %v7611_v37, %v7725_v36 }
 0x1d0   : > { %v7728_v58 = vpop.f32.mrf.mxu0 }
 0x1d3   : > { %6173 = vmatmul.msk.bf16.gmra.mxu0 %vm739_vm0, %v7175_v56  ;;  %v1678_v56 = vrot.slane %v7452_v54, 3 }
 0x1d8   : > { %v7731_v59 = vpop.f32.mrf.mxu0 }
 0x1e0   : > { %v7734_v61 = vpop.f32.mrf.mxu0 }
 0x1e3   : > { %6174 = vmatmul.msk.bf16.gmra.mxu0 %vm739_vm0, %v7176_v60  ;;  %v1681_v60 = vrot.slane %v7452_v54, 4  ;;  %v1073_v54 = vmax.f32 %v948_v43, 0.0 }
 0x1e5   : > { %v7835_v8 = vor.u32 %v1681_v60, %v1678_v56 }
 0x1e7   : > { %9818 = vst [vmem:[#allocation7_spill] sm:$0xff] %v7835_v8  ;;  %2621 = vmatmul.bf16.vlgmr.msra.gmra.mxu1 %v7835_v8 }
 0x1e8   : > { %v7737_v62 = vpop.f32.mrf.mxu0 }
 0x1f0   : > { %v7740_v1 = vpop.f32.mrf.mxu0 }
 0x1f3   : > { %6175 = vmatmul.msk.bf16.gmra.mxu0 %vm739_vm0, %v7177_v26  ;;  %v1477_v26 = vpack.c.bf16 %v7816_v47, %v7816_v47 }
 0x1f5   : > { %v1685_v9 = vshrl.u32 %v1477_v26, 16  ;;  %v1688_v10 = vshll.u32 %v1477_v26, 16  ;;  %v950_v26 = vadd.f32 %v7611_v37, %v7719_v53 }
 0x1f7   : > { %v1687_v14 = vrot.slane %v1685_v9, 3  ;;  %v1074_v52 = vmax.f32 %v950_v26, 0.0 }
 0x1f8   : > { %v7743_v2 = vpop.f32.mrf.mxu0 }
 0x200   : > { %v7746_v4 = vpop.f32.mrf.mxu0 }
 0x203   : > { %6176 = vmatmul.msk.bf16.gmra.mxu0 %vm739_vm0, %v7178_v3  ;;  %v7202_v3 = vld [vmem:[%s9761_s3 + $0x88] sm:$0xff] }
 0x204   : > { %2787 = vmatpush.bf16.msra.mxu3 %v7202_v3 }
 0x208   : > { %v7752_v7 = vpop.f32.mrf.mxu0  ;;  %2788 = vmatpush.bf16.msra.mxu3 %v7201_v17 }
 0x20b   : > { %2789 = vmatmul.bf16.vlgmr.msra.gmra.mxu3 %v7851_v39 }
 0x210   : > { %v7773_v16 = vpop.f32.mrf.mxu0 }
 0x213   : > { %6177 = vmatmul.msk.bf16.gmra.mxu0 %vm739_vm0, %v7179_v15  ;;  %v1690_v15 = vrot.slane %v1688_v10, 4 }
 0x215   : > { %v7846_v25 = vor.u32 %v1690_v15, %v1687_v14  ;;  %v953_v15 = vadd.f32 %v7611_v37, %v7722_v55  ;;  %v7879_v55 = vadd.f32 %v7611_v37, %v7728_v58 }
 0x217   : > { %9819 = vst [vmem:[#allocation8_spill] sm:$0xff] %v7846_v25  ;;  %2705 = vmatmul.bf16.vlgmr.msra.gmra.mxu2 %v7846_v25 }
 0x218   : > { %v7794_v34 = vpop.f32.mrf.mxu0 }
 0x220   : > { %v7818_v35 = vpop.f32.mrf.mxu0 }
 0x223   : > { %6178 = vmatmul.msk.bf16.gmra.mxu0 %vm739_vm0, %v7180_v45  ;;  %v7182_v45 = vld [vmem:[%s7548_s22 + $0x118] sm:$0xff] }
 0x228   : > { %v7848_v28 = vpop.f32.mrf.mxu0 }
 0x230   : > { %v7855_v41 = vpop.f32.mrf.mxu0 }
 0x233   : > { %6179 = vmatmul.msk.bf16.gmra.mxu0 %vm739_vm0, %v7181_v40 }
 0x238   : > { %v7858_v42 = vpop.f32.mrf.mxu0 }
 0x240   : > { %v992_v48 = vpop.f32.mrf.mxu0 }
 0x241   : > { %v993_v23 = vadd.f32 %v7611_v37, %v992_v48 }
 0x243   : > { %v1091_v56 = vmax.f32 %v993_v23, 0.0  ;;  %6180 = vmatmul.msk.bf16.gmra.mxu0 %vm739_vm0, %v7182_v45 }
 0x245   : > { %v1127_v60 = vmax.f32 %v1073_v54, %v1091_v56  ;;  %v7883_v54 = vadd.f32 %v7611_v37, %v7731_v59 }
 0x247   : > { %v1145_v3 = vmax.f32 %v7617_v44, %v1127_v60  ;;  %v1075_v44 = vmax.f32 %v953_v15, 0.0 }
 0x248   : > { %v994_v9 = vpop.f32.mrf.mxu0 }
 0x249   : > { %v1166_v10 = vrot.slane %v1145_v3, 7  ;;  %v995_v11 = vadd.f32 %v7611_v37, %v994_v9 }
 0x24b   : > { %v1198_v29 = vsel %vm1165_vm1, 0.0, %v1166_v10  ;;  %v1092_v14 = vmax.f32 %v995_v11, 0.0 }
 0x24c   : > { %v1479_v17 = vpack.c.bf16 %v1198_v29, %v9773_v46  ;;  %v1392_v36 = vrot.slane %v1198_v29, 2 }
 0x24d   : > { %v1128_v19 = vmax.f32 %v1074_v52, %v1092_v14  ;;  %v1076_v52 = vmax.f32 %v955_v20, 0.0 }
 0x24e   : > { %v1719_v22 = vshrl.u32 %v1479_v17, 16  ;;  %v1722_v31 = vshll.u32 %v1479_v17, 16 }
 0x24f   : > { %v1146_v53 = vmax.f32 %v7621_v50, %v1128_v19  ;;  %v1306_v50 = vrot.slane %v1198_v29, 1  ;;  %v1393_v19 = vsel %vm1389_vm5, %v7832_v5, %v1392_v36 }
 0x250   : > { %v997_v40 = vpop.f32.mrf.mxu0  ;;  %v1721_v43 = vrot.slane %v1719_v22, 3  ;;  %v1724_v45 = vrot.slane %v1722_v31, 4 }
 0x251   : > { %v1167_v48 = vrot.slane %v1146_v53, 7  ;;  %v998_v23 = vadd.f32 %v7611_v37, %v997_v40  ;;  %v1307_v14 = vsel %vm1258_vm4, %v7816_v47, %v1306_v50 }
 0x252   : > { %v7885_v56 = vor.u32 %v1724_v45, %v1721_v43  ;;  %v7910_v45 = vadd.f32 %v7611_v37, %v7734_v61 }
 0x253   : > { %v1168_v60 = vsel %vm1165_vm1, %v1166_v10, %v1167_v48  ;;  %v1093_v26 = vmax.f32 %v998_v23, 0.0  ;;  %v1173_v48 = vrot.slane %v1146_v53, 3 }
 0x254   : > { %v1199_v3 = vsel %vm1172_vm2, %v1168_v60, 0.0  ;;  %v7892_v9 = vsel %vm1674_vm3, %v7835_v8, %v7885_v56 }
 0x255   : > { %9821 = vst [vmem:[#allocation10_spill] sm:$0xff] %v7892_v9  ;;  %v1129_v58 = vmax.f32 %v1075_v44, %v1093_v26  ;;  %2626 = vmatmul.bf16.gmra.mxu1 %v7892_v9  ;;  %v1308_v59 = vrot.slane %v1199_v3, 1  ;;  %v1394_v11 = vrot.slane %v1199_v3, 2 }
 0x257   : > { %v1147_v15 = vmax.f32 %v7627_v57, %v1129_v58  ;;  %v1309_v17 = vsel %vm1258_vm4, %v1306_v50, %v1308_v59  ;;  %v1395_v22 = vsel %vm1389_vm5, %v1392_v36, %v1394_v11 }
 0x258   : > { %v999_v31 = vpop.f32.mrf.mxu0  ;;  %v7904_v44 = vpack.c.bf16 %v1309_v17, %v1306_v50  ;;  %v1484_v20 = vpack.c.bf16 %v1309_v17, %v1307_v14  ;;  %v7906_v40 = vpack.c.bf16 %v1395_v22, %v1392_v36  ;;  %v1485_v43 = vpack.c.bf16 %v1395_v22, %v1393_v19 }
 0x259   : > { %v1174_v57 = vrot.slane %v1147_v15, 3  ;;  %v1000_v23 = vadd.f32 %v7611_v37, %v999_v31 }
 0x25a   : > { %v1728_v60 = vshrl.u32 %v1484_v20, 16  ;;  %v1731_v26 = vshll.u32 %v1484_v20, 16  ;;  %v1737_v58 = vshrl.u32 %v1485_v43, 16  ;;  %v1740_v46 = vshll.u32 %v1485_v43, 16 }
 0x25b   : > { %v1175_v10 = vsel %vm1172_vm2, %v1173_v48, %v1174_v57  ;;  %v1201_v50 = vsel %vm1172_vm2, %v1174_v57, 0.0  ;;  %v1094_v14 = vmax.f32 %v1000_v23, 0.0  ;;  %v1755_v36 = vshrl.u32 %v7904_v44, 16 }
 0x25c   : > { %v1200_v17 = vsel %vm1165_vm1, 0.0, %v1175_v10  ;;  %v1312_v19 = vrot.slane %v1201_v50, 1  ;;  %v1398_v61 = vrot.slane %v1201_v50, 2  ;;  %v1730_v22 = vrot.slane %v1728_v60, 3 }
 0x25d   : > { %v1310_v53 = vrot.slane %v1200_v17, 1  ;;  %v1396_v15 = vrot.slane %v1200_v17, 2  ;;  %v1130_v29 = vmax.f32 %v1076_v52, %v1094_v14  ;;  %v1733_v31 = vrot.slane %v1731_v26, 4 }
 0x25e   : > { %v1739_v8 = vrot.slane %v1737_v58, 3  ;;  %v1742_v20 = vrot.slane %v1740_v46, 4  ;;  %v1486_v5 = vpack.c.bf16 %v1200_v17, %v1199_v3  ;;  %v7917_v43 = vrot.slane %v1755_v36, 3 }
 0x25f   : > { %v1148_v48 = vmax.f32 %v7631_v63, %v1130_v29  ;;  %v1734_v57 = vor.u32 %v1733_v31, %v1730_v22  ;;  %v1311_v23 = vsel %vm1258_vm4, %v1308_v59, %v1310_v53  ;;  %v1313_v47 = vsel %vm1258_vm4, %v1310_v53, %v1312_v19 }
 0x260   : > { %v1002_v10 = vpop.f32.mrf.mxu0  ;;  %v1743_v9 = vor.u32 %v1742_v20, %v1739_v8  ;;  %v1746_v49 = vshrl.u32 %v1486_v5, 16  ;;  %v1749_v60 = vshll.u32 %v1486_v5, 16  ;;  %v1487_v33 = vpack.c.bf16 %v1313_v47, %v1311_v23 }
 0x261   : > { %v1180_v32 = vrot.slane %v1148_v48, 7  ;;  %v1003_v52 = vadd.f32 %v7611_v37, %v1002_v10  ;;  %v7925_v46 = vsel %vm1674_vm3, %v7846_v25, %v1734_v57  ;;  %v1397_v3 = vsel %vm1389_vm5, %v1394_v11, %v1396_v15 }
 0x262   : > { %2710 = vmatmul.bf16.gmra.mxu2 %v7925_v46  ;;  %v7931_v63 = vsel %vm1674_vm3, %v7851_v39, %v1743_v9  ;;  %v1748_v59 = vrot.slane %v1746_v49, 3  ;;  %v1751_v8 = vrot.slane %v1749_v60, 4  ;;  %v1763_v29 = vshrl.u32 %v1487_v33, 16 }
 0x263   : > { %v1202_v47 = vsel %vm1165_vm1, 0.0, %v1180_v32  ;;  %v1095_v5 = vmax.f32 %v1003_v52, 0.0  ;;  %2794 = vmatmul.bf16.gmra.mxu3 %v7931_v63  ;;  %v1766_v26 = vshll.u32 %v1487_v33, 16  ;;  %v1399_v58 = vsel %vm1389_vm5, %v1396_v15, %v1398_v61 }
 0x264   : > { %v1314_v14 = vrot.slane %v1202_v47, 1  ;;  %v1400_v36 = vrot.slane %v1202_v47, 2  ;;  %v1752_v11 = vor.u32 %v1751_v8, %v1748_v59  ;;  %v1765_v17 = vrot.slane %v1763_v29, 3 }
 0x265   : > { %v9822_v22 = vmax.f32 %v7879_v55, 0.0  ;;  %v1768_v31 = vrot.slane %v1766_v26, 4  ;;  %v1488_v20 = vpack.c.bf16 %v1399_v58, %v1397_v3  ;;  %v1489_v49 = vpack.c.bf16 %v1202_v47, %v1201_v50 }
 0x266   : > { %v7940_v48 = vsel %vm1674_vm3, %v7885_v56, %v1752_v11  ;;  %v1315_v23 = vsel %vm1258_vm4, %v1312_v19, %v1314_v14  ;;  %v1401_v33 = vsel %vm1389_vm5, %v1398_v61, %v1400_v36  ;;  %v1758_v15 = vshll.u32 %v7904_v44, 16 }
 0x267   : > { %v1131_v53 = vmax.f32 %v9822_v22, %v1095_v5  ;;  %2631 = vmatmul.bf16.gmra.mxu1 %v7940_v48  ;;  %v7947_v60 = vor.u32 %v1768_v31, %v1765_v17  ;;  %v1780_v55 = vshrl.u32 %v1488_v20, 16  ;;  %v1783_v52 = vshll.u32 %v1488_v20, 16 }
 0x268   : > { %v1004_v3 = vpop.f32.mrf.mxu0  ;;  %v1793_v50 = vshrl.u32 %v1489_v49, 16  ;;  %v1796_v59 = vshll.u32 %v1489_v49, 16  ;;  %v1760_v8 = vrot.slane %v1758_v15, 4  ;;  %v1772_v56 = vshrl.u32 %v7906_v40, 16 }
 0x269   : > { %v1149_v10 = vmax.f32 %v7637_v6, %v1131_v53  ;;  %v7952_v19 = vadd.f32 %v7611_v37, %v7737_v62  ;;  %v1005_v44 = vadd.f32 %v7611_v37, %v1004_v3  ;;  %v7957_v6 = vsel %vm1674_vm3, %v1734_v57, %v7947_v60 }
 0x26a   : > { %v1782_v29 = vrot.slane %v1780_v55, 3  ;;  %v1785_v47 = vrot.slane %v1783_v52, 4  ;;  %v1795_v5 = vrot.slane %v1793_v50, 3  ;;  %v1798_v26 = vrot.slane %v1796_v59, 4 }
 0x26b   : > { %v1181_v61 = vrot.slane %v1149_v10, 7  ;;  %v1096_v17 = vmax.f32 %v1005_v44, 0.0  ;;  %v1761_v22 = vor.u32 %v1760_v8, %v7917_v43  ;;  %v1774_v53 = vrot.slane %v1772_v56, 3 }
 0x26c   : > { %v1786_v31 = vor.u32 %v1785_v47, %v1782_v29  ;;  %v7962_v20 = vor.u32 %v1798_v26, %v1795_v5  ;;  %v1775_v49 = vshll.u32 %v7906_v40, 16  ;;  %v9823_v55 = vmax.f32 %v7883_v54, 0.0 }
 0x26d   : > { %v1182_v58 = vsel %vm1165_vm1, %v1180_v32, %v1181_v61  ;;  %v7969_v3 = vsel %vm1674_vm3, %v1761_v22, %v7947_v60  ;;  %v1079_v54 = vmax.f32 %v7910_v45, 0.0  ;;  %v1080_v56 = vmax.f32 %v7952_v19, 0.0 }
 0x26e   : > { %v1203_v62 = vsel %vm1172_vm2, %v1182_v58, 0.0  ;;  %v1132_v52 = vmax.f32 %v9823_v55, %v1096_v17  ;;  %9824 = vst [vmem:[#allocation11_spill] sm:$0xff] %v7969_v3  ;;  %v7972_v32 = vsel %vm1674_vm3, %v1743_v9, %v1786_v31  ;;  %v7976_v43 = vsel %vm1674_vm3, %v1752_v11, %v7962_v20 }
 0x26f   : > { %v1316_v15 = vrot.slane %v1203_v62, 1  ;;  %v1402_v57 = vrot.slane %v1203_v62, 2  ;;  %v1777_v50 = vrot.slane %v1775_v49, 4  ;;  %v1186_v9 = vrot.slane %v1149_v10, 3 }
 0x270   : > { %v1150_v59 = vmax.f32 %v7641_v12, %v1132_v52  ;;  %v1007_v61 = vpop.f32.mrf.mxu0 }
 0x271   : > { %v1317_v40 = vsel %vm1258_vm4, %v1314_v14, %v1316_v15  ;;  %v1403_v8 = vsel %vm1389_vm5, %v1400_v36, %v1402_v57  ;;  %v1008_v5 = vadd.f32 %v7611_v37, %v1007_v61  ;;  %v1778_v11 = vor.u32 %v1777_v50, %v1774_v53 }
 0x272   : > { %v1490_v44 = vpack.c.bf16 %v1317_v40, %v1315_v23  ;;  %v1491_v29 = vpack.c.bf16 %v1403_v8, %v1401_v33  ;;  %v1187_v47 = vrot.slane %v1150_v59, 3  ;;  %2715 = vmatmul.bf16.gmra.mxu2 %v7957_v6  ;;  %v7993_v33 = vadd.f32 %v7611_v37, %v7740_v1 }
 0x273   : > { %v1097_v17 = vmax.f32 %v1008_v5, 0.0  ;;  %2799 = vmatmul.bf16.gmra.mxu3 %v7972_v32  ;;  %v7989_v23 = vsel %vm1674_vm3, %v1778_v11, %v1786_v31 }
 0x274   : > { %v1802_v26 = vshrl.u32 %v1490_v44, 16  ;;  %v1805_v12 = vshll.u32 %v1490_v44, 16  ;;  %v1811_v58 = vshrl.u32 %v1491_v29, 16  ;;  %v1814_v14 = vshll.u32 %v1491_v29, 16  ;;  %9825 = vst [vmem:[#allocation12_spill] sm:$0xff] %v7989_v23 }
 0x275   : > { %v1188_v36 = vsel %vm1172_vm2, %v1186_v9, %v1187_v47  ;;  %v1205_v45 = vsel %vm1172_vm2, %v1187_v47, 0.0  ;;  %v1133_v55 = vmax.f32 %v1079_v54, %v1097_v17 }
 0x276   : > { %v1204_v10 = vsel %vm1165_vm1, 0.0, %v1188_v36  ;;  %v1320_v19 = vrot.slane %v1205_v45, 1  ;;  %v1804_v22 = vrot.slane %v1802_v26, 3  ;;  %v1807_v52 = vrot.slane %v1805_v12, 4 }
 0x277   : > { %v1318_v53 = vrot.slane %v1204_v10, 1  ;;  %v1404_v49 = vrot.slane %v1204_v10, 2  ;;  %v1406_v50 = vrot.slane %v1205_v45, 2  ;;  %v1813_v59 = vrot.slane %v1811_v58, 3  ;;  %2636 = vmatmul.bf16.gmra.mxu1 %v7976_v43 }
 0x278   : > { %v1816_v40 = vrot.slane %v1814_v14, 4  ;;  %v1492_v8 = vpack.c.bf16 %v1204_v10, %v1203_v62  ;;  %v1151_v61 = vmax.f32 %v7648_v18, %v1133_v55  ;;  %v1808_v44 = vor.u32 %v1807_v52, %v1804_v22  ;;  %v1009_v9 = vpop.f32.mrf.mxu0 }
 0x279   : > { %v1319_v1 = vsel %vm1258_vm4, %v1316_v15, %v1318_v53  ;;  %v1321_v29 = vsel %vm1258_vm4, %v1318_v53, %v1320_v19  ;;  %v1010_v12 = vadd.f32 %v7611_v37, %v1009_v9  ;;  %v1405_v18 = vsel %vm1389_vm5, %v1402_v57, %v1404_v49 }
 0x27a   : > { %v1817_v47 = vor.u32 %v1816_v40, %v1813_v59  ;;  %v1820_v5 = vshrl.u32 %v1492_v8, 16  ;;  %v1823_v11 = vshll.u32 %v1492_v8, 16  ;;  %v1493_v26 = vpack.c.bf16 %v1321_v29, %v1319_v1 }
 0x27b   : > { %v1193_v54 = vrot.slane %v1151_v61, 7  ;;  %v8003_v62 = vsel %vm1674_vm3, %v7947_v60, %v1808_v44  ;;  %v1098_v10 = vmax.f32 %v1010_v12, 0.0  ;;  %v1407_v53 = vsel %vm1389_vm5, %v1404_v49, %v1406_v50 }
 0x27c   : > { %v8007_v58 = vsel %vm1674_vm3, %v1786_v31, %v1817_v47  ;;  %v1822_v15 = vrot.slane %v1820_v5, 3  ;;  %v1825_v14 = vrot.slane %v1823_v11, 4  ;;  %v1829_v36 = vshrl.u32 %v1493_v26, 16 }
 0x27d   : > { %9826 = vst [vmem:[#allocation13_spill] sm:$0xff] %v8007_v58  ;;  %v1206_v17 = vsel %vm1165_vm1, 0.0, %v1193_v54  ;;  %v1832_v22 = vshll.u32 %v1493_v26, 16  ;;  %v1134_v60 = vmax.f32 %v1080_v56, %v1098_v10  ;;  %v1494_v57 = vpack.c.bf16 %v1407_v53, %v1405_v18 }
 0x27e   : > { %v1322_v55 = vrot.slane %v1206_v17, 1  ;;  %v1408_v52 = vrot.slane %v1206_v17, 2  ;;  %v1495_v59 = vpack.c.bf16 %v1206_v17, %v1205_v45  ;;  %v1826_v40 = vor.u32 %v1825_v14, %v1822_v15 }
 0x27f   : > { %v1831_v8 = vrot.slane %v1829_v36, 3  ;;  %v1834_v61 = vrot.slane %v1832_v22, 4  ;;  %v1152_v5 = vmax.f32 %v7653_v38, %v1134_v60  ;;  %v1838_v49 = vshrl.u32 %v1494_v57, 16 }
 0x280   : > { %v8013_v31 = vsel %vm1674_vm3, %v7962_v20, %v1826_v40  ;;  %v1847_v1 = vshrl.u32 %v1495_v59, 16  ;;  %v1850_v29 = vshll.u32 %v1495_v59, 16  ;;  %v1323_v9 = vsel %vm1258_vm4, %v1320_v19, %v1322_v55  ;;  %v1012_v45 = vpop.f32.mrf.mxu0 }
 0x281   : > { %9827 = vst [vmem:[#allocation14_spill] sm:$0xff] %v8013_v31  ;;  %v8017_v11 = vor.u32 %v1834_v61, %v1831_v8  ;;  %v1841_v26 = vshll.u32 %v1494_v57, 16  ;;  %v1409_v15 = vsel %vm1389_vm5, %v1406_v50, %v1408_v52  ;;  %v1194_v18 = vrot.slane %v1152_v5, 7 }
 0x282   : > { %v1849_v12 = vrot.slane %v1847_v1, 3  ;;  %v1852_v56 = vrot.slane %v1850_v29, 4  ;;  %v1013_v14 = vadd.f32 %v7611_v37, %v1012_v45  ;;  %2720 = vmatmul.bf16.gmra.mxu2 %v8003_v62  ;;  %v1840_v19 = vrot.slane %v1838_v49, 3 }
 0x283   : > { %v8023_v20 = vsel %vm1674_vm3, %v1808_v44, %v8017_v11  ;;  %v1843_v38 = vrot.slane %v1841_v26, 4  ;;  %v1081_v17 = vmax.f32 %v7993_v33, 0.0  ;;  %v1195_v10 = vsel %vm1165_vm1, %v1193_v54, %v1194_v18  ;;  %2804 = vmatmul.bf16.gmra.mxu3 %v8007_v58 }
 0x284   : > { %v8026_v36 = vor.u32 %v1852_v56, %v1849_v12  ;;  %v1099_v22 = vmax.f32 %v1013_v14, 0.0  ;;  %v1207_v50 = vsel %vm1172_vm2, %v1195_v10, 0.0  ;;  %v970_v33 = vadd.f32 %v7611_v37, %v7743_v2 }
 0x285   : > { %v1844_v53 = vor.u32 %v1843_v38, %v1840_v19  ;;  %v1324_v59 = vrot.slane %v1207_v50, 1  ;;  %v1410_v60 = vrot.slane %v1207_v50, 2  ;;  %v1209_v45 = vrot.slane %v1152_v5, 3 }
 0x286   : > { %v8034_v44 = vsel %vm1674_vm3, %v1826_v40, %v8026_v36  ;;  %v1135_v8 = vmax.f32 %v1081_v17, %v1099_v22  ;;  %v973_v40 = vadd.f32 %v7611_v37, %v7746_v4  ;;  %v1082_v14 = vmax.f32 %v970_v33, 0.0 }
 0x287   : > { %9828 = vst [vmem:[#allocation15_spill] sm:$0xff] %v8034_v44  ;;  %v8037_v61 = vsel %vm1674_vm3, %v1817_v47, %v1844_v53  ;;  %2641 = vmatmul.bf16.gmra.mxu1 %v8013_v31  ;;  %v1325_v57 = vsel %vm1258_vm4, %v1322_v55, %v1324_v59  ;;  %v1411_v1 = vsel %vm1389_vm5, %v1408_v52, %v1410_v60 }
 0x288   : > { %9829 = vst [vmem:[#allocation16_spill] sm:$0xff] %v8037_v61  ;;  %v1153_v54 = vmax.f32 %v7660_v21, %v1135_v8  ;;  %v1014_v29 = vpop.f32.mrf.mxu0  ;;  %v1496_v49 = vpack.c.bf16 %v1325_v57, %v1323_v9  ;;  %v1497_v26 = vpack.c.bf16 %v1411_v1, %v1409_v15  ;;  %v1083_v38 = vmax.f32 %v973_v40, 0.0 }
 0x289   : > { %v1015_v12 = vadd.f32 %v7611_v37, %v1014_v29 }
 0x28a   : > { %v1210_v47 = vrot.slane %v1153_v54, 3  ;;  %v1856_v56 = vshrl.u32 %v1496_v49, 16  ;;  %v1859_v2 = vshll.u32 %v1496_v49, 16  ;;  %v1865_v18 = vshrl.u32 %v1497_v26, 16 }
 0x28b   : > { %v1868_v21 = vshll.u32 %v1497_v26, 16  ;;  %v1100_v52 = vmax.f32 %v1015_v12, 0.0 }
 0x28c   : > { %v1211_v19 = vsel %vm1172_vm2, %v1209_v45, %v1210_v47  ;;  %v1241_v55 = vsel %vm1172_vm2, %v1210_v47, 0.0  ;;  %v1858_v9 = vrot.slane %v1856_v56, 3  ;;  %v1861_v22 = vrot.slane %v1859_v2, 4  ;;  %v8057_v2 = vld [vmem:[%s9760_s2] ss:$0 sm:$0xff] }
 0x28d   : > { %v1240_v4 = vsel %vm1165_vm1, 0.0, %v1211_v19  ;;  %v1328_v17 = vrot.slane %v1241_v55, 1  ;;  %v1136_v10 = vmax.f32 %v1082_v14, %v1100_v52  ;;  %v1414_v37 = vrot.slane %v1241_v55, 2 }
 0x28e   : > { %v1326_v15 = vrot.slane %v1240_v4, 1  ;;  %v1412_v5 = vrot.slane %v1240_v4, 2  ;;  %v1867_v8 = vrot.slane %v1865_v18, 3  ;;  %v1870_v54 = vrot.slane %v1868_v21, 4 }
 0x28f   : > { %v1498_v57 = vpack.c.bf16 %v1240_v4, %v1207_v50  ;;  %v1154_v33 = vmax.f32 %v7665_v51, %v1136_v10  ;;  %v1862_v1 = vor.u32 %v1861_v22, %v1858_v9 }
 0x290   : > { %v1327_v29 = vsel %vm1258_vm4, %v1324_v59, %v1326_v15  ;;  %v1329_v49 = vsel %vm1258_vm4, %v1326_v15, %v1328_v17  ;;  %v1017_v40 = vpop.f32.mrf.mxu0  ;;  %v1871_v26 = vor.u32 %v1870_v54, %v1867_v8  ;;  %v1413_v59 = vsel %vm1389_vm5, %v1410_v60, %v1412_v5 }
 0x291   : > { %v1874_v45 = vshrl.u32 %v1498_v57, 16  ;;  %v1877_v47 = vshll.u32 %v1498_v57, 16  ;;  %v1499_v12 = vpack.c.bf16 %v1329_v49, %v1327_v29  ;;  %v1216_v56 = vrot.slane %v1154_v33, 7 }
 0x292   : > { %v1018_v50 = vadd.f32 %v8057_v2, %v1017_v40  ;;  %v8062_v51 = vsel %vm1674_vm3, %v8017_v11, %v1862_v1  ;;  %2725 = vmatmul.bf16.gmra.mxu2 %v8023_v20  ;;  %v8067_v18 = vsel %vm1674_vm3, %v1844_v53, %v1871_v26  ;;  %v1415_v15 = vsel %vm1389_vm5, %v1412_v5, %v1414_v37 }
 0x293   : > { %9830 = vst [vmem:[#allocation17_spill] sm:$0xff] %v8067_v18  ;;  %v1876_v21 = vrot.slane %v1874_v45, 3  ;;  %v1879_v14 = vrot.slane %v1877_v47, 4  ;;  %v1883_v19 = vshrl.u32 %v1499_v12, 16  ;;  %v1242_v52 = vsel %vm1165_vm1, 0.0, %v1216_v56  ;;  %2809 = vmatmul.bf16.gmra.mxu3 %v8037_v61 }
 0x294   : > { %v1101_v4 = vmax.f32 %v1018_v50, 0.0  ;;  %v1886_v9 = vshll.u32 %v1499_v12, 16  ;;  %v1330_v11 = vrot.slane %v1242_v52, 1  ;;  %v1416_v10 = vrot.slane %v1242_v52, 2 }
 0x295   : > { %v1880_v22 = vor.u32 %v1879_v14, %v1876_v21  ;;  %v1885_v60 = vrot.slane %v1883_v19, 3  ;;  %v1500_v57 = vpack.c.bf16 %v1415_v15, %v1413_v59  ;;  %v1501_v53 = vpack.c.bf16 %v1242_v52, %v1241_v55 }
 0x296   : > { %v1137_v8 = vmax.f32 %v1083_v38, %v1101_v4  ;;  %v1888_v54 = vrot.slane %v1886_v9, 4  ;;  %v975_v33 = vadd.f32 %v8057_v2, %v7752_v7  ;;  %v1331_v49 = vsel %vm1258_vm4, %v1328_v17, %v1330_v11 }
 0x297   : > { %v8076_v29 = vsel %vm1674_vm3, %v8026_v36, %v1880_v22  ;;  %v1417_v40 = vsel %vm1389_vm5, %v1414_v37, %v1416_v10  ;;  %2646 = vmatmul.bf16.gmra.mxu1 %v8034_v44  ;;  %v1892_v38 = vshrl.u32 %v1500_v57, 16  ;;  %v1895_v47 = vshll.u32 %v1500_v57, 16 }
 0x298   : > { %9831 = vst [vmem:[#allocation18_spill] sm:$0xff] %v8076_v29  ;;  %v1155_v5 = vmax.f32 %v7672_v24, %v1137_v8  ;;  %v8082_v45 = vor.u32 %v1888_v54, %v1885_v60  ;;  %v1019_v55 = vpop.f32.mrf.mxu0  ;;  %v1901_v12 = vshrl.u32 %v1501_v53, 16  ;;  %v1904_v50 = vshll.u32 %v1501_v53, 16 }
 0x299   : > { %v1020_v59 = vadd.f32 %v8057_v2, %v1019_v55  ;;  %v1894_v17 = vrot.slane %v1892_v38, 3  ;;  %v1897_v37 = vrot.slane %v1895_v47, 4  ;;  %v1084_v14 = vmax.f32 %v975_v33, 0.0 }
 0x29a   : > { %v1217_v7 = vrot.slane %v1155_v5, 7  ;;  %v8087_v36 = vsel %vm1674_vm3, %v1862_v1, %v8082_v45  ;;  %v1903_v21 = vrot.slane %v1901_v12, 3  ;;  %v1906_v24 = vrot.slane %v1904_v50, 4 }
 0x29b   : > { %v1102_v52 = vmax.f32 %v1020_v59, 0.0  ;;  %v1898_v9 = vor.u32 %v1897_v37, %v1894_v17  ;;  %v978_v53 = vadd.f32 %v8057_v2, %v7773_v16  ;;  %v980_v47 = vadd.f32 %v8057_v2, %v7794_v34 }
 0x29c   : > { %v1218_v19 = vsel %vm1165_vm1, %v1216_v56, %v1217_v7  ;;  %v8091_v15 = vor.u32 %v1906_v24, %v1903_v21  ;;  %v1222_v50 = vrot.slane %v1155_v5, 3  ;;  %v8115_v24 = vadd.f32 %v8057_v2, %v7818_v35 }
 0x29d   : > { %v1243_v4 = vsel %vm1172_vm2, %v1218_v19, 0.0  ;;  %v1138_v54 = vmax.f32 %v1084_v14, %v1102_v52  ;;  %v8094_v57 = vsel %vm1674_vm3, %v1871_v26, %v1898_v9  ;;  %v1085_v37 = vmax.f32 %v978_v53, 0.0 }
 0x29e   : > { %v1332_v60 = vrot.slane %v1243_v4, 1  ;;  %v1418_v8 = vrot.slane %v1243_v4, 2  ;;  %v8098_v1 = vsel %vm1674_vm3, %v1880_v22, %v8091_v15  ;;  %v1086_v34 = vmax.f32 %v980_v47, 0.0 }
 0x29f   : > { %v1156_v56 = vmax.f32 %v7677_v0, %v1138_v54 }
 0x2a0   : > { %v1333_v33 = vsel %vm1258_vm4, %v1330_v11, %v1332_v60  ;;  %v1419_v38 = vsel %vm1389_vm5, %v1416_v10, %v1418_v8  ;;  %v1022_v55 = vpop.f32.mrf.mxu0 }
 0x2a1   : > { %v1502_v12 = vpack.c.bf16 %v1333_v33, %v1331_v49  ;;  %v1503_v26 = vpack.c.bf16 %v1419_v38, %v1417_v40  ;;  %v1223_v7 = vrot.slane %v1156_v56, 3  ;;  %v1023_v22 = vadd.f32 %v8057_v2, %v1022_v55 }
 0x2a2   : > { %2730 = vmatmul.bf16.gmra.mxu2 %v8062_v51 }
 0x2a3   : > { %v1910_v59 = vshrl.u32 %v1502_v12, 16  ;;  %v1913_v16 = vshll.u32 %v1502_v12, 16  ;;  %v1919_v17 = vshrl.u32 %v1503_v26, 16  ;;  %v1922_v0 = vshll.u32 %v1503_v26, 16  ;;  %2814 = vmatmul.bf16.gmra.mxu3 %v8067_v18 }
 0x2a4   : > { %v1224_v11 = vsel %vm1172_vm2, %v1222_v50, %v1223_v7  ;;  %v1245_v10 = vsel %vm1172_vm2, %v1223_v7, 0.0  ;;  %v1103_v21 = vmax.f32 %v1023_v22, 0.0 }
 0x2a5   : > { %v1244_v49 = vsel %vm1165_vm1, 0.0, %v1224_v11  ;;  %v1336_v40 = vrot.slane %v1245_v10, 1  ;;  %v1912_v5 = vrot.slane %v1910_v59, 3  ;;  %v1915_v52 = vrot.slane %v1913_v16, 4 }
 0x2a6   : > { %v1334_v14 = vrot.slane %v1244_v49, 1  ;;  %v1139_v19 = vmax.f32 %v1085_v37, %v1103_v21  ;;  %v1420_v54 = vrot.slane %v1244_v49, 2  ;;  %v1921_v53 = vrot.slane %v1919_v17, 3 }
 0x2a7   : > { %v1924_v56 = vrot.slane %v1922_v0, 4  ;;  %v1504_v33 = vpack.c.bf16 %v1244_v49, %v1243_v4  ;;  %v1422_v38 = vrot.slane %v1245_v10, 2  ;;  %2651 = vmatmul.bf16.gmra.mxu1 %v8076_v29  ;;  %v1916_v47 = vor.u32 %v1915_v52, %v1912_v5 }
 0x2a8   : > { %v1157_v55 = vmax.f32 %v7684_v27, %v1139_v19  ;;  %v1335_v12 = vsel %vm1258_vm4, %v1332_v60, %v1334_v14  ;;  %v1024_v26 = vpop.f32.mrf.mxu0  ;;  %v1337_v22 = vsel %vm1258_vm4, %v1334_v14, %v1336_v40  ;;  %v1421_v60 = vsel %vm1389_vm5, %v1418_v8, %v1420_v54 }
 0x2a9   : > { %v1925_v50 = vor.u32 %v1924_v56, %v1921_v53  ;;  %v1928_v7 = vshrl.u32 %v1504_v33, 16  ;;  %v1931_v35 = vshll.u32 %v1504_v33, 16  ;;  %v1025_v16 = vadd.f32 %v8057_v2, %v1024_v26 }
 0x2aa   : > { %v1229_v59 = vrot.slane %v1157_v55, 7  ;;  %v8124_v4 = vsel %vm1674_vm3, %v8082_v45, %v1916_v47  ;;  %v1505_v17 = vpack.c.bf16 %v1337_v22, %v1335_v12  ;;  %v1423_v55 = vsel %vm1389_vm5, %v1420_v54, %v1422_v38 }
 0x2ab   : > { %9832 = vst [vmem:[#allocation19_spill] sm:$0xff] %v8124_v4  ;;  %v8127_v27 = vsel %vm1674_vm3, %v1898_v9, %v1925_v50  ;;  %v1930_v0 = vrot.slane %v1928_v7, 3  ;;  %v1933_v37 = vrot.slane %v1931_v35, 4  ;;  %v1104_v21 = vmax.f32 %v1025_v16, 0.0  ;;  %v8140_v35 = vld [vmem:[%s9762_s4] ss:$0 sm:$0xff] }
 0x2ac   : > { %9833 = vst [vmem:[#allocation20_spill] sm:$0xff] %v8127_v27  ;;  %v1246_v11 = vsel %vm1165_vm1, 0.0, %v1229_v59  ;;  %v1937_v49 = vshrl.u32 %v1505_v17, 16  ;;  %v1940_v5 = vshll.u32 %v1505_v17, 16  ;;  %v1506_v12 = vpack.c.bf16 %v1423_v55, %v1421_v60  ;;  %v2622_v60 = vpop.f32.mrf.mxu1 }
 0x2ad   : > { %v1338_v14 = vrot.slane %v1246_v11, 1  ;;  %v1424_v19 = vrot.slane %v1246_v11, 2  ;;  %v1507_v52 = vpack.c.bf16 %v1246_v11, %v1245_v10  ;;  %v1934_v53 = vor.u32 %v1933_v37, %v1930_v0 }
 0x2ae   : > { %v1140_v56 = vmax.f32 %v1086_v34, %v1104_v21  ;;  %v1939_v45 = vrot.slane %v1937_v49, 3  ;;  %v1942_v33 = vrot.slane %v1940_v5, 4  ;;  %v1946_v16 = vshrl.u32 %v1506_v12, 16 }
 0x2af   : > { %v8134_v9 = vsel %vm1674_vm3, %v8091_v15, %v1934_v53  ;;  %v1955_v8 = vshrl.u32 %v1507_v52, 16  ;;  %v1958_v26 = vshll.u32 %v1507_v52, 16  ;;  %v1339_v34 = vsel %vm1258_vm4, %v1336_v40, %v1338_v14 }
 0x2b0   : > { %9834 = vst [vmem:[#allocation21_spill] sm:$0xff] %v8134_v9  ;;  %v1158_v7 = vmax.f32 %v7689_v13, %v1140_v56  ;;  %v8142_v10 = vor.u32 %v1942_v33, %v1939_v45  ;;  %v1425_v54 = vsel %vm1389_vm5, %v1422_v38, %v1424_v19  ;;  %v1027_v22 = vpop.f32.mrf.mxu0  ;;  %v1949_v15 = vshll.u32 %v1506_v12, 16 }
 0x2b1   : > { %v1957_v17 = vrot.slane %v1955_v8, 3  ;;  %v1028_v37 = vadd.f32 %v8057_v2, %v1027_v22  ;;  %v1948_v11 = vrot.slane %v1946_v16, 3  ;;  %v1960_v49 = vrot.slane %v1958_v26, 4 }
 0x2b2   : > { %v1230_v0 = vrot.slane %v1158_v7, 7  ;;  %v8149_v13 = vsel %vm1674_vm3, %v1916_v47, %v8142_v10  ;;  %2735 = vmatmul.bf16.gmra.mxu2 %v8087_v36  ;;  %v1951_v21 = vrot.slane %v1949_v15, 4  ;;  %v1087_v40 = vmax.f32 %v8115_v24, 0.0  ;;  %v2706_v24 = vpop.f32.mrf.mxu2 }
 0x2b3   : > { %9835 = vst [vmem:[#allocation22_spill] sm:$0xff] %v8149_v13  ;;  %v1105_v5 = vmax.f32 %v1028_v37, 0.0  ;;  %2819 = vmatmul.bf16.gmra.mxu3 %v8094_v57  ;;  %v2623_v52 = vadd.f32 %v8140_v35, %v2622_v60  ;;  %v8159_v47 = vor.u32 %v1960_v49, %v1957_v17  ;;  %v985_v8 = vadd.f32 %v8057_v2, %v7848_v28  ;;  %v2790_v37 = vpop.f32.mrf.mxu3 }
 0x2b4   : > { %v1231_v38 = vsel %vm1165_vm1, %v1229_v59, %v1230_v0  ;;  %v8157_v45 = vor.u32 %v1951_v21, %v1948_v11  ;;  %v988_v22 = vadd.f32 %v8057_v2, %v7855_v41  ;;  %v1235_v28 = vrot.slane %v1158_v7, 3 }
 0x2b5   : > { %v1247_v56 = vsel %vm1172_vm2, %v1231_v38, 0.0  ;;  %v1141_v12 = vmax.f32 %v1087_v40, %v1105_v5  ;;  %v8169_v26 = vsel %vm1674_vm3, %v1934_v53, %v8159_v47  ;;  %v2707_v15 = vadd.f32 %v2706_v24, %v2623_v52 }
 0x2b6   : > { %v1340_v33 = vrot.slane %v1247_v56, 1  ;;  %v1426_v55 = vrot.slane %v1247_v56, 2  ;;  %v8165_v59 = vsel %vm1674_vm3, %v1925_v50, %v8157_v45  ;;  %9837 = vst [vmem:[#allocation24_spill] sm:$0xff] %v8169_v26  ;;  %v1088_v41 = vmax.f32 %v985_v8, 0.0 }
 0x2b7   : > { %9836 = vst [vmem:[#allocation23_spill] sm:$0xff] %v8165_v59  ;;  %v1159_v16 = vmax.f32 %v7696_v30, %v1141_v12  ;;  %2656 = vmatmul.bf16.gmra.mxu1 %v8098_v1  ;;  %v8178_v21 = vadd.f32 %v2790_v37, %v2707_v15  ;;  %v1089_v38 = vmax.f32 %v988_v22, 0.0 }
 0x2b8   : > { %v1341_v17 = vsel %vm1258_vm4, %v1338_v14, %v1340_v33  ;;  %v1029_v0 = vpop.f32.mrf.mxu0  ;;  %v1427_v50 = vsel %vm1389_vm5, %v1424_v19, %v1426_v55 }
 0x2b9   : > { %v1508_v60 = vpack.c.bf16 %v1341_v17, %v1339_v34  ;;  %v1236_v11 = vrot.slane %v1159_v16, 3  ;;  %v1030_v53 = vadd.f32 %v8057_v2, %v1029_v0  ;;  %9838 = vst [vmem:[#allocation25_spill] sm:$0xff] %v8178_v21  ;;  %v1509_v49 = vpack.c.bf16 %v1427_v50, %v1425_v54  ;;  %v9839_v0 = vld [vmem:[#allocation2_spill] sm:$0xff] }
 0x2ba   : > { %v8184_v34 = vadd.f32 %v8057_v2, %v7858_v42  ;;  %v8267_v3 = vpop.f32.mrf.mxu2 }
 0x2bb   : > { %v1964_v40 = vshrl.u32 %v1508_v60, 16  ;;  %v1967_v30 = vshll.u32 %v1508_v60, 16  ;;  %v1237_v5 = vsel %vm1172_vm2, %v1235_v28, %v1236_v11  ;;  %v1249_v14 = vsel %vm1172_vm2, %v1236_v11, 0.0 }
 0x2bc   : > { %v1106_v7 = vmax.f32 %v1030_v53, 0.0  ;;  %v1248_v19 = vsel %vm1165_vm1, 0.0, %v1237_v5  ;;  %v1344_v52 = vrot.slane %v1249_v14, 1  ;;  %v1430_v54 = vrot.slane %v1249_v14, 2 }
 0x2bd   : > { %v1966_v12 = vrot.slane %v1964_v40, 3  ;;  %v1342_v24 = vrot.slane %v1248_v19, 1  ;;  %v1428_v16 = vrot.slane %v1248_v19, 2  ;;  %v1969_v15 = vrot.slane %v1967_v30, 4 }
 0x2be   : > { %v1142_v8 = vmax.f32 %v1088_v41, %v1106_v7  ;;  %v1973_v22 = vshrl.u32 %v1509_v49, 16  ;;  %v1976_v17 = vshll.u32 %v1509_v49, 16  ;;  %v1510_v28 = vpack.c.bf16 %v1248_v19, %v1247_v56 }
 0x2bf   : > { %v1343_v60 = vsel %vm1258_vm4, %v1340_v33, %v1342_v24  ;;  %v1345_v42 = vsel %vm1258_vm4, %v1342_v24, %v1344_v52  ;;  %v1429_v50 = vsel %vm1389_vm5, %v1426_v55, %v1428_v16  ;;  %v1970_v53 = vor.u32 %v1969_v15, %v1966_v12 }
 0x2c0   : > { %v1160_v37 = vmax.f32 %v9839_v0, %v1142_v8  ;;  %v1032_v11 = vpop.f32.mrf.mxu0  ;;  %v1975_v40 = vrot.slane %v1973_v22, 3  ;;  %v1978_v5 = vrot.slane %v1976_v17, 4  ;;  %v1982_v39 = vshrl.u32 %v1510_v28, 16 }
 0x2c1   : > { %v1033_v41 = vadd.f32 %v8057_v2, %v1032_v11  ;;  %v1985_v30 = vshll.u32 %v1510_v28, 16  ;;  %v1511_v7 = vpack.c.bf16 %v1345_v42, %v1343_v60  ;;  %v8195_v56 = vsel %vm1674_vm3, %v8142_v10, %v1970_v53 }
 0x2c2   : > { %v1266_v25 = vrot.slane %v1160_v37, 7  ;;  %2740 = vmatmul.bf16.gmra.mxu2 %v8124_v4  ;;  %9840 = vst [vmem:[#allocation2_spill] sm:$0xff] %v8195_v56  ;;  %v1979_v33 = vor.u32 %v1978_v5, %v1975_v40  ;;  %v1984_v49 = vrot.slane %v1982_v39, 3  ;;  %v1431_v55 = vsel %vm1389_vm5, %v1428_v16, %v1430_v54  ;;  %v9842_v40 = vld [vmem:[#allocation3_spill] sm:$0xff] }
 0x2c3   : > { %v1107_v12 = vmax.f32 %v1033_v41, 0.0  ;;  %2824 = vmatmul.bf16.gmra.mxu3 %v8127_v27  ;;  %v1987_v24 = vrot.slane %v1985_v30, 4  ;;  %v1991_v8 = vshrl.u32 %v1511_v7, 16  ;;  %v1994_v28 = vshll.u32 %v1511_v7, 16  ;;  %v8212_v7 = vpop.f32.mrf.mxu1 }
 0x2c4   : > { %v1282_v19 = vsel %vm1165_vm1, 0.0, %v1266_v25  ;;  %v8202_v17 = vsel %vm1674_vm3, %v8157_v45, %v1979_v33  ;;  %v1512_v39 = vpack.c.bf16 %v1431_v55, %v1429_v50  ;;  %9843 = vst [vmem:[#allocation3_spill] sm:$0xff] %v8212_v7 }
 0x2c5   : > { %v1346_v15 = vrot.slane %v1282_v19, 1  ;;  %v1432_v22 = vrot.slane %v1282_v19, 2  ;;  %9841 = vst [vmem:[#allocation26_spill] sm:$0xff] %v8202_v17  ;;  %v1143_v10 = vmax.f32 %v1089_v38, %v1107_v12  ;;  %v1988_v0 = vor.u32 %v1987_v24, %v1984_v49 }
 0x2c6   : > { %v1993_v37 = vrot.slane %v1991_v8, 3  ;;  %v1996_v60 = vrot.slane %v1994_v28, 4  ;;  %v1513_v16 = vpack.c.bf16 %v1282_v19, %v1249_v14  ;;  %v2000_v45 = vshrl.u32 %v1512_v39, 16 }
 0x2c7   : > { %v1347_v42 = vsel %vm1258_vm4, %v1344_v52, %v1346_v15  ;;  %v1433_v11 = vsel %vm1389_vm5, %v1430_v54, %v1432_v22  ;;  %v1161_v5 = vmax.f32 %v9842_v40, %v1143_v10  ;;  %2661 = vmatmul.bf16.gmra.mxu1 %v8134_v9  ;;  %v8210_v41 = vsel %vm1674_vm3, %v8159_v47, %v1988_v0 }
 0x2c8   : > { %v2003_v30 = vshll.u32 %v1512_v39, 16  ;;  %v1034_v38 = vpop.f32.mrf.mxu0  ;;  %v1997_v50 = vor.u32 %v1996_v60, %v1993_v37  ;;  %v2009_v49 = vshrl.u32 %v1513_v16, 16  ;;  %v2012_v14 = vshll.u32 %v1513_v16, 16 }
 0x2c9   : > { %v1257_v52 = vsel %vm1252_vm6, %v1161_v5, 0.0  ;;  %v1035_v54 = vadd.f32 %v8057_v2, %v1034_v38  ;;  %v2002_v55 = vrot.slane %v2000_v45, 3  ;;  %v1090_v8 = vmax.f32 %v8184_v34, 0.0 }
 0x2ca   : > { %v1259_v19 = vsel %vm1258_vm4, %v1257_v52, 0.0  ;;  %v8218_v12 = vsel %vm1674_vm3, %v1970_v53, %v1997_v50  ;;  %v2005_v47 = vrot.slane %v2003_v30, 4  ;;  %v2011_v24 = vrot.slane %v2009_v49, 3  ;;  %v9844_v53 = vld [vmem:[#allocation4_spill] sm:$0xff] }
 0x2cb   : > { %v1267_v28 = vrot.slane %v1259_v19, 7  ;;  %v1108_v10 = vmax.f32 %v1035_v54, 0.0  ;;  %v2014_v39 = vrot.slane %v2012_v14, 4  ;;  %v1253_v14 = vrot.slane %v1161_v5, 4 }
 0x2cc   : > { %v2006_v37 = vor.u32 %v2005_v47, %v2002_v55 }
 0x2cd   : > { %v1268_v60 = vsel %vm1165_vm1, %v1266_v25, %v1267_v28  ;;  %v1144_v16 = vmax.f32 %v1090_v8, %v1108_v10  ;;  %v8222_v40 = vor.u32 %v2014_v39, %v2011_v24 }
 0x2ce   : > { %v1348_v2 = vrot.slane %v1268_v60, 1  ;;  %v1434_v45 = vrot.slane %v1268_v60, 2  ;;  %v8225_v38 = vsel %vm1674_vm3, %v1979_v33, %v2006_v37  ;;  %v9845_v33 = vmov 0.0  }
 0x2cf   : > { %v1162_v52 = vmax.f32 %v9844_v53, %v1144_v16  ;;  %v8230_v30 = vsel %vm1674_vm3, %v1988_v0, %v8222_v40  ;;  %v8238_v47 = vrot.slane %v9845_v33, 7 }
 0x2d0   : > { %v1349_v34 = vsel %vm1258_vm4, %v1346_v15, %v1348_v2  ;;  %v1435_v49 = vsel %vm1389_vm5, %v1432_v22, %v1434_v45 }
 0x2d1   : > { %v1254_v25 = vrot.slane %v1162_v52, 4  ;;  %v1514_v54 = vpack.c.bf16 %v1349_v34, %v1347_v42  ;;  %v1515_v55 = vpack.c.bf16 %v1435_v49, %v1433_v11  ;;  %v8246_v34 = vrot.slane %v8238_v47, 1 }
 0x2d2   : > { %2745 = vmatmul.bf16.gmra.mxu2 %v8149_v13  ;;  %v8235_v19 = vpop.f32.mrf.mxu1 }
 0x2d3   : > { %v1255_v24 = vsel %vm1252_vm6, %v1253_v14, %v1254_v25  ;;  %v1260_v0 = vsel %vm1252_vm6, %v1254_v25, 0.0  ;;  %2829 = vmatmul.bf16.gmra.mxu3 %v8165_v59  ;;  %v2018_v15 = vshrl.u32 %v1514_v54, 16  ;;  %v2021_v8 = vshll.u32 %v1514_v54, 16 }
 0x2d4   : > { %v1261_v22 = vsel %vm1258_vm4, %v1260_v0, 0.0  ;;  %v1269_v5 = vrot.slane %v1255_v24, 7  ;;  %v2027_v42 = vshrl.u32 %v1515_v55, 16  ;;  %v2030_v39 = vshll.u32 %v1515_v55, 16 }
 0x2d5   : > { %v1271_v11 = vrot.slane %v1261_v22, 7  ;;  %v2020_v10 = vrot.slane %v2018_v15, 3  ;;  %v2023_v16 = vrot.slane %v2021_v8, 4 }
 0x2d6   : > { %v2029_v53 = vrot.slane %v2027_v42, 3  ;;  %v1270_v52 = vsel %vm1165_vm1, %v1267_v28, %v1269_v5  ;;  %v2032_v14 = vrot.slane %v2030_v39, 4 }
 0x2d7   : > { %v1272_v49 = vsel %vm1165_vm1, %v1269_v5, %v1271_v11  ;;  %2666 = vmatmul.bf16.gmra.mxu1 %v8169_v26  ;;  %v1350_v25 = vrot.slane %v1270_v52, 1  ;;  %v1436_v0 = vrot.slane %v1270_v52, 2  ;;  %v2024_v24 = vor.u32 %v2023_v16, %v2020_v10 }
 0x2d8   : > { %v1516_v54 = vpack.c.bf16 %v1270_v52, %v1268_v60  ;;  %v1352_v33 = vrot.slane %v1272_v49, 1  ;;  %v1438_v22 = vrot.slane %v1272_v49, 2  ;;  %v2033_v15 = vor.u32 %v2032_v14, %v2029_v53 }
 0x2d9   : > { %v1351_v55 = vsel %vm1258_vm4, %v1348_v2, %v1350_v25  ;;  %v1437_v8 = vsel %vm1389_vm5, %v1434_v45, %v1436_v0  ;;  %v1274_v28 = vsel %vm1165_vm1, %v1271_v11, %v8238_v47  ;;  %v8257_v5 = vsel %vm1674_vm3, %v1997_v50, %v2024_v24 }
 0x2da   : > { %v8254_v42 = vpop.f32.mrf.mxu1  ;;  %v2036_v39 = vshrl.u32 %v1516_v54, 16  ;;  %v2039_v23 = vshll.u32 %v1516_v54, 16  ;;  %v1353_v10 = vsel %vm1258_vm4, %v1350_v25, %v1352_v33  ;;  %v8261_v60 = vsel %vm1674_vm3, %v2006_v37, %v2033_v15  ;;  %v8269_v25 = vpop.f32.mrf.mxu3 }
 0x2db   : > { %v1517_v16 = vpack.c.bf16 %v1353_v10, %v1351_v55  ;;  %v1439_v2 = vsel %vm1389_vm5, %v1436_v0, %v1438_v22  ;;  %v8265_v45 = vrot.slane %v8238_v47, 2  ;;  %v1354_v14 = vrot.slane %v1274_v28, 1 }
 0x2dc   : > { %v2038_v53 = vrot.slane %v2036_v39, 3  ;;  %v2041_v11 = vrot.slane %v2039_v23, 4  ;;  %v1518_v52 = vpack.c.bf16 %v1439_v2, %v1437_v8  ;;  %v1440_v54 = vrot.slane %v1274_v28, 2 }
 0x2dd   : > { %v2045_v50 = vshrl.u32 %v1517_v16, 16  ;;  %v2048_v7 = vshll.u32 %v1517_v16, 16  ;;  %v1519_v26 = vpack.c.bf16 %v1274_v28, %v1272_v49  ;;  %v1355_v0 = vsel %vm1258_vm4, %v1352_v33, %v1354_v14 }
 0x2de   : > { %v2042_v37 = vor.u32 %v2041_v11, %v2038_v53  ;;  %v2054_v21 = vshrl.u32 %v1518_v52, 16  ;;  %v2057_v55 = vshll.u32 %v1518_v52, 16  ;;  %v1357_v49 = vsel %vm1258_vm4, %v1354_v14, %v8246_v34 }
 0x2df   : > { %v2047_v10 = vrot.slane %v2045_v50, 3  ;;  %v2050_v59 = vrot.slane %v2048_v7, 4  ;;  %v2063_v13 = vshrl.u32 %v1519_v26, 16  ;;  %v2066_v39 = vshll.u32 %v1519_v26, 16 }
 0x2e0   : > { %v8274_v23 = vsel %vm1674_vm3, %v8222_v40, %v2042_v37  ;;  %v2056_v8 = vrot.slane %v2054_v21, 3  ;;  %v2059_v2 = vrot.slane %v2057_v55, 4  ;;  %v1520_v11 = vpack.c.bf16 %v1357_v49, %v1355_v0 }
 0x2e1   : > { %v2051_v28 = vor.u32 %v2050_v59, %v2047_v10  ;;  %v2065_v16 = vrot.slane %v2063_v13, 3  ;;  %v2068_v53 = vrot.slane %v2066_v39, 4  ;;  %v1441_v7 = vsel %vm1389_vm5, %v1438_v22, %v1440_v54 }
 0x2e2   : > { %2750 = vmatmul.bf16.gmra.mxu2 %v8195_v56  ;;  %v2060_v33 = vor.u32 %v2059_v2, %v2056_v8  ;;  %v1443_v26 = vsel %vm1389_vm5, %v1440_v54, %v8265_v45  ;;  %v2072_v52 = vshrl.u32 %v1520_v11, 16  ;;  %v2075_v59 = vshll.u32 %v1520_v11, 16 }
 0x2e3   : > { %2834 = vmatmul.bf16.gmra.mxu3 %v8202_v17  ;;  %v8284_v21 = vsel %vm1674_vm3, %v2024_v24, %v2051_v28  ;;  %v8286_v40 = vor.u32 %v2068_v53, %v2065_v16  ;;  %v2628_v13 = vadd.f32 %v8140_v35, %v8235_v19  ;;  %v1521_v22 = vpack.c.bf16 %v1443_v26, %v1441_v7 }
 0x2e4   : > { %v2632_v14 = vpop.f32.mrf.mxu1  ;;  %v8291_v50 = vsel %vm1674_vm3, %v2033_v15, %v2060_v33  ;;  %v2074_v0 = vrot.slane %v2072_v52, 3  ;;  %v2077_v24 = vrot.slane %v2075_v59, 4  ;;  %v2630_v11 = vadd.f32 %v8140_v35, %v8254_v42 }
 0x2e5   : > { %v2711_v55 = vpop.f32.mrf.mxu2  ;;  %v8295_v54 = vsel %vm1674_vm3, %v2042_v37, %v8286_v40  ;;  %v2081_v8 = vshrl.u32 %v1521_v22, 16  ;;  %v2084_v2 = vshll.u32 %v1521_v22, 16 }
 0x2e6   : > { %9846 = vst [vmem:[#allocation4_spill] sm:$0xff] %v8295_v54  ;;  %v2712_v10 = vadd.f32 %v2711_v55, %v2628_v13  ;;  %v2795_v39 = vpop.f32.mrf.mxu3  ;;  %v8298_v49 = vor.u32 %v2077_v24, %v2074_v0 }
 0x2e7   : > { %2671 = vmatmul.bf16.gmra.mxu1 %v8210_v41  ;;  %v2083_v15 = vrot.slane %v2081_v8, 3  ;;  %v2086_v16 = vrot.slane %v2084_v2, 4 }
 0x2e8   : > { %v8300_v19 = vadd.f32 %v2795_v39, %v2712_v10  ;;  %v8304_v53 = vsel %vm1674_vm3, %v2051_v28, %v8298_v49  ;;  %v2633_v28 = vadd.f32 %v8140_v35, %v2632_v14 }
 0x2e9   : > { %9847 = vst [vmem:[#allocation27_spill] sm:$0xff] %v8304_v53  ;;  %v8306_v37 = vor.u32 %v2086_v16, %v2083_v15 }
 0x2eb   : > { %v8312_v26 = vsel %vm1674_vm3, %v2060_v33, %v8306_v37 }
 0x2ec   : > { %v2634_v7 = vpop.f32.mrf.mxu1  ;;  %9848 = vst [vmem:[#allocation28_spill] sm:$0xff] %v8312_v26 }
 0x2ed   : > { %v2713_v52 = vpop.f32.mrf.mxu2  ;;  %v2635_v33 = vadd.f32 %v8140_v35, %v2634_v7  ;;  %v7216_v7 = vld [vmem:[%s9761_s3 + $0xf8] sm:$0xff] }
 0x2ee   : > { %v2714_v59 = vadd.f32 %v2713_v52, %v2630_v11  ;;  %v2797_v13 = vpop.f32.mrf.mxu3  ;;  %2865 = vmatpush.bf16.msrb.mxu1 %v7216_v7  ;;  %v7213_v7 = vld [vmem:[%s9761_s3 + $0xe0] sm:$0xff] }
 0x2f0   : > { %v8314_v22 = vadd.f32 %v2797_v13, %v2714_v59 }
 0x2f2   : > { %2755 = vmatmul.bf16.gmra.mxu2 %v8218_v12 }
 0x2f3   : > { %2839 = vmatmul.bf16.gmra.mxu3 %v8225_v38 }
 0x2f4   : > { %v2637_v55 = vpop.f32.mrf.mxu1 }
 0x2f5   : > { %v2716_v0 = vpop.f32.mrf.mxu2  ;;  %v2638_v14 = vadd.f32 %v8140_v35, %v2637_v55  ;;  %v7215_v55 = vld [vmem:[%s9761_s3 + $0xf0] sm:$0xff] }
 0x2f6   : > { %v2717_v24 = vadd.f32 %v2716_v0, %v2633_v28  ;;  %v2800_v42 = vpop.f32.mrf.mxu3  ;;  %2866 = vmatpush.bf16.msrb.mxu1 %v7215_v55  ;;  %v1522_v55 = vpack.c.bf16 %v8238_v47, %v8238_v47  ;;  %v7222_v47 = vld [vmem:[%s9761_s3 + $0x128] sm:$0xff] }
 0x2f7   : > { %2676 = vmatmul.bf16.gmra.mxu1 %v8230_v30 }
 0x2f8   : > { %v8320_v10 = vadd.f32 %v2800_v42, %v2717_v24 }
 0x2fc   : > { %v2639_v39 = vpop.f32.mrf.mxu1 }
 0x2fd   : > { %v2718_v8 = vpop.f32.mrf.mxu2  ;;  %v2640_v0 = vadd.f32 %v8140_v35, %v2639_v39  ;;  %v7224_v39 = vld [vmem:[%s9761_s3 + $0x138] sm:$0xff] }
 0x2fe   : > { %v2719_v2 = vadd.f32 %v2718_v8, %v2635_v33  ;;  %v2802_v15 = vpop.f32.mrf.mxu3  ;;  %2949 = vmatpush.bf16.msrb.mxu2 %v7224_v39  ;;  %v2090_v39 = vshrl.u32 %v1522_v55, 16 }
 0x300   : > { %v8323_v16 = vadd.f32 %v2802_v15, %v2719_v2  ;;  %v7214_v15 = vld [vmem:[%s9761_s3 + $0xe8] sm:$0xff] }
 0x301   : > { %2867 = vmatpush.bf16.msrb.mxu1 %v7214_v15  ;;  %v7212_v15 = vld [vmem:[%s9761_s3 + $0xd8] sm:$0xff] }
 0x302   : > { %2760 = vmatmul.bf16.gmra.mxu2 %v8257_v5 }
 0x303   : > { %2844 = vmatmul.bf16.gmra.mxu3 %v8261_v60 }
 0x304   : > { %v2642_v11 = vpop.f32.mrf.mxu1 }
 0x305   : > { %v2721_v52 = vpop.f32.mrf.mxu2  ;;  %2868 = vmatpush.bf16.msrb.mxu1 %v7213_v7 }
 0x306   : > { %v2722_v59 = vadd.f32 %v2721_v52, %v2638_v14  ;;  %v2805_v13 = vpop.f32.mrf.mxu3  ;;  %v7232_v14 = vld [vmem:[%s9761_s3 + $0x178] sm:$0xff]  ;;  %v2643_v52 = vadd.f32 %v8140_v35, %v2642_v11  ;;  %v7223_v11 = vld [vmem:[%s9761_s3 + $0x130] sm:$0xff] }
 0x307   : > { %2681 = vmatmul.bf16.gmra.mxu1 %v8274_v23  ;;  %3033 = vmatpush.bf16.msrb.mxu3 %v7232_v14  ;;  %v2093_v14 = vshll.u32 %v1522_v55, 16 }
 0x308   : > { %v8329_v28 = vadd.f32 %v2805_v13, %v2722_v59  ;;  %2950 = vmatpush.bf16.msrb.mxu2 %v7223_v11 }
 0x309   : > { %2869 = vmatpush.bf16.msrb.mxu1 %v7212_v15  ;;  %v7229_v15 = vld [vmem:[%s9761_s3 + $0x160] sm:$0xff] }
 0x30c   : > { %v2644_v24 = vpop.f32.mrf.mxu1  ;;  %2951 = vmatpush.bf16.msrb.mxu2 %v7222_v47 }
 0x30d   : > { %v2723_v42 = vpop.f32.mrf.mxu2 }
 0x30e   : > { %v2724_v33 = vadd.f32 %v2723_v42, %v2640_v0  ;;  %v2807_v8 = vpop.f32.mrf.mxu3 }
 0x310   : > { %v8338_v2 = vadd.f32 %v2807_v8, %v2724_v33  ;;  %v7231_v8 = vld [vmem:[%s9761_s3 + $0x170] sm:$0xff] }
 0x311   : > { %3034 = vmatpush.bf16.msrb.mxu3 %v7231_v8  ;;  %v2092_v8 = vrot.slane %v2090_v39, 3  ;;  %v1523_v39 = vpack.c.bf16 %v8246_v34, %v8246_v34 }
 0x312   : > { %2765 = vmatmul.bf16.gmra.mxu2 %v8284_v21 }
 0x313   : > { %2849 = vmatmul.bf16.gmra.mxu3 %v8291_v50 }
 0x314   : > { %v2647_v59 = vpop.f32.mrf.mxu1 }
 0x315   : > { %v2726_v13 = vpop.f32.mrf.mxu2  ;;  %v2648_v34 = vadd.f32 %v8140_v35, %v2647_v59 }
 0x316   : > { %v2727_v0 = vadd.f32 %v2726_v13, %v2643_v52  ;;  %v2810_v42 = vpop.f32.mrf.mxu3  ;;  %v7230_v52 = vld [vmem:[%s9761_s3 + $0x168] sm:$0xff]  ;;  %v2645_v13 = vadd.f32 %v8140_v35, %v2644_v24  ;;  %v7221_v24 = vld [vmem:[%s9761_s3 + $0x120] sm:$0xff] }
 0x317   : > { %2686 = vmatmul.bf16.gmra.mxu1 %v8295_v54  ;;  %v2095_v54 = vrot.slane %v2093_v14, 4  ;;  %3035 = vmatpush.bf16.msrb.mxu3 %v7230_v52  ;;  %v1524_v14 = vpack.c.bf16 %v8265_v45, %v8265_v45  ;;  %v7220_v52 = vld [vmem:[%s9761_s3 + $0x118] sm:$0xff]  ;;  %v2102_v45 = vshll.u32 %v1523_v39, 16 }
 0x318   : > { %v8358_v33 = vadd.f32 %v2810_v42, %v2727_v0  ;;  %v7211_v42 = vld [vmem:[%s9761_s3 + $0xd0] sm:$0xff]  ;;  %2952 = vmatpush.bf16.msrb.mxu2 %v7221_v24 }
 0x319   : > { %2870 = vmatpush.bf16.msrb.mxu1 %v7211_v42  ;;  %v8395_v47 = vor.u32 %v2095_v54, %v2092_v8  ;;  %v2108_v8 = vshrl.u32 %v1524_v14, 16  ;;  %v2111_v24 = vshll.u32 %v1524_v14, 16 }
 0x31a   : > { %9849 = vst [vmem:[#allocation29_spill] sm:$0xff] %v8358_v33 }
 0x31b   : > { %9850 = vst [vmem:[#allocation30_spill] sm:$0xff] %v8395_v47  ;;  %3036 = vmatpush.bf16.msrb.mxu3 %v7229_v15 }
 0x31c   : > { %v2649_v7 = vpop.f32.mrf.mxu1  ;;  %2953 = vmatpush.bf16.msrb.mxu2 %v7220_v52  ;;  %v7226_v52 = vld [vmem:[%s9761_s3 + $0x148] sm:$0xff] }
 0x31d   : > { %v2728_v0 = vpop.f32.mrf.mxu2 }
 0x31e   : > { %v2729_v55 = vadd.f32 %v2728_v0, %v2645_v13  ;;  %v2812_v11 = vpop.f32.mrf.mxu3  ;;  %v7210_v13 = vld [vmem:[%s9761_s3 + $0xc8] sm:$0xff]  ;;  %v7228_v0 = vld [vmem:[%s9761_s3 + $0x158] sm:$0xff] }
 0x31f   : > { %2871 = vmatpush.bf16.msrb.mxu1 %v7210_v13  ;;  %3037 = vmatpush.bf16.msrb.mxu3 %v7228_v0  ;;  %v7219_v13 = vld [vmem:[%s9761_s3 + $0x110] sm:$0xff]  ;;  %v2650_v0 = vadd.f32 %v8140_v35, %v2649_v7  ;;  %v7225_v7 = vld [vmem:[%s9761_s3 + $0x140] sm:$0xff] }
 0x320   : > { %v8379_v33 = vadd.f32 %v2812_v11, %v2729_v55  ;;  %v2099_v55 = vshrl.u32 %v1523_v39, 16  ;;  %v7209_v11 = vld [vmem:[%s9761_s3 + $0xc0] sm:$0xff]  ;;  %v7227_v39 = vld [vmem:[%s9761_s3 + $0x150] sm:$0xff]  ;;  %2954 = vmatpush.bf16.msrb.mxu2 %v7219_v13 }
 0x321   : > { %v7217_v13 = vld [vmem:[%s9761_s3 + $0x100] sm:$0xff] }
 0x322   : > { %2770 = vmatmul.bf16.gmra.mxu2 %v8304_v53  ;;  %v8411_v53 = vsel %vm1674_vm3, %v8286_v40, %v8395_v47  ;;  %v2101_v14 = vrot.slane %v2099_v55, 3  ;;  %v2113_v40 = vrot.slane %v2111_v24, 4 }
 0x323   : > { %2854 = vmatmul.bf16.gmra.mxu3 %v8312_v26  ;;  %9851 = vst [vmem:[#allocation31_spill] sm:$0xff] %v8411_v53  ;;  %2872 = vmatpush.bf16.msrb.mxu1 %v7209_v11 }
 0x324   : > { %v2652_v42 = vpop.f32.mrf.mxu1  ;;  %3038 = vmatpush.bf16.msrb.mxu3 %v7227_v39 }
 0x325   : > { %v2731_v54 = vpop.f32.mrf.mxu2 }
 0x326   : > { %v2732_v15 = vadd.f32 %v2731_v54, %v2648_v34  ;;  %v2815_v26 = vpop.f32.mrf.mxu3  ;;  %v2104_v34 = vrot.slane %v2102_v45, 4  ;;  %v2110_v54 = vrot.slane %v2108_v8, 3 }
 0x327   : > { %2690 = vmatmul.bf16.gmra.mxu1 %v8411_v53 }
 0x328   : > { %v8414_v59 = vadd.f32 %v2815_v26, %v2732_v15  ;;  %v7218_v26 = vld [vmem:[%s9761_s3 + $0x108] sm:$0xff]  ;;  %v8429_v15 = vor.u32 %v2104_v34, %v2101_v14  ;;  %v8431_v55 = vor.u32 %v2113_v40, %v2110_v54  ;;  %3039 = vmatpush.bf16.msrb.mxu3 %v7226_v52  ;;  %v2653_v14 = vadd.f32 %v8140_v35, %v2652_v42 }
 0x329   : > { %2955 = vmatpush.bf16.msrb.mxu2 %v7218_v26 }
 0x32a   : > { %9852 = vst [vmem:[#allocation32_spill] sm:$0xff] %v8431_v55  ;;  %v8444_v39 = vsel %vm1674_vm3, %v8298_v49, %v8429_v15 }
 0x32c   : > { %v2654_v11 = vpop.f32.mrf.mxu1  ;;  %3040 = vmatpush.bf16.msrb.mxu3 %v7225_v7 }
 0x32d   : > { %v2733_v53 = vpop.f32.mrf.mxu2  ;;  %2956 = vmatpush.bf16.msrb.mxu2 %v7217_v13  ;;  %v2655_v26 = vadd.f32 %v8140_v35, %v2654_v11 }
 0x32e   : > { %v2734_v45 = vadd.f32 %v2733_v53, %v2650_v0  ;;  %v2817_v8 = vpop.f32.mrf.mxu3  ;;  %v8450_v53 = vsel %vm1674_vm3, %v8306_v37, %v8431_v55 }
 0x330   : > { %v8433_v24 = vadd.f32 %v2817_v8, %v2734_v45 }
 0x332   : > { %2774 = vmatmul.bf16.gmra.mxu2 %v8444_v39 }
 0x333   : > { %2858 = vmatmul.bf16.gmra.mxu3 %v8450_v53 }
 0x334   : > { %v2657_v34 = vpop.f32.mrf.mxu1 }
 0x335   : > { %v2736_v54 = vpop.f32.mrf.mxu2  ;;  %v2658_v42 = vadd.f32 %v8140_v35, %v2657_v34 }
 0x336   : > { %v2737_v40 = vadd.f32 %v2736_v54, %v2653_v14  ;;  %v2820_v52 = vpop.f32.mrf.mxu3 }
 0x337   : > { %2693 = vmatmul.bf16.gmra.mxu1 %v8395_v47 }
 0x338   : > { %v8455_v49 = vadd.f32 %v2820_v52, %v2737_v40  ;;  %v9854_v40 = vld [vmem:[#allocation10_spill] sm:$0xff] }
 0x33c   : > { %v2659_v0 = vpop.f32.mrf.mxu1 }
 0x33d   : > { %v2738_v45 = vpop.f32.mrf.mxu2  ;;  %v2660_v11 = vadd.f32 %v8140_v35, %v2659_v0 }
 0x33e   : > { %v2739_v37 = vadd.f32 %v2738_v45, %v2655_v26  ;;  %v2822_v8 = vpop.f32.mrf.mxu3 }
 0x340   : > { %v8458_v7 = vadd.f32 %v2822_v8, %v2739_v37 }
 0x342   : > { %9853 = vst [vmem:[#allocation33_spill] sm:$0xff] %v8458_v7  ;;  %2777 = vmatmul.bf16.gmra.mxu2 %v8429_v15 }
 0x343   : > { %2861 = vmatmul.bf16.gmra.mxu3 %v8431_v55 }
 0x344   : > { %v2662_v13 = vpop.f32.mrf.mxu1 }
 0x345   : > { %v2741_v14 = vpop.f32.mrf.mxu2  ;;  %v2663_v34 = vadd.f32 %v8140_v35, %v2662_v13 }
 0x346   : > { %v2742_v54 = vadd.f32 %v2741_v14, %v2658_v42  ;;  %v2825_v47 = vpop.f32.mrf.mxu3 }
 0x347   : > { %2873 = vmatmul.bf16.vlgmr.msrb.gmra.mxu1 %v9854_v40 }
 0x348   : > { %v8464_v52 = vadd.f32 %v2825_v47, %v2742_v54 }
 0x34c   : > { %v2664_v26 = vpop.f32.mrf.mxu1 }
 0x34d   : > { %v2743_v45 = vpop.f32.mrf.mxu2  ;;  %v2665_v0 = vadd.f32 %v8140_v35, %v2664_v26 }
 0x34e   : > { %v2744_v37 = vadd.f32 %v2743_v45, %v2660_v11  ;;  %v2827_v8 = vpop.f32.mrf.mxu3 }
 0x350   : > { %v8467_v7 = vadd.f32 %v2827_v8, %v2744_v37 }
 0x352   : > { %2957 = vmatmul.bf16.vlgmr.msrb.gmra.mxu2 %v7925_v46 }
 0x353   : > { %3041 = vmatmul.bf16.vlgmr.msrb.gmra.mxu3 %v7931_v63 }
 0x354   : > { %v2667_v42 = vpop.f32.mrf.mxu1 }
 0x355   : > { %v2746_v14 = vpop.f32.mrf.mxu2  ;;  %v2668_v46 = vadd.f32 %v8140_v35, %v2667_v42 }
 0x356   : > { %v2747_v55 = vadd.f32 %v2746_v14, %v2663_v34  ;;  %v2830_v40 = vpop.f32.mrf.mxu3 }
 0x357   : > { %2878 = vmatmul.bf16.gmra.mxu1 %v7940_v48 }
 0x358   : > { %v8473_v47 = vadd.f32 %v2830_v40, %v2747_v55 }
 0x35c   : > { %v2669_v54 = vpop.f32.mrf.mxu1 }
 0x35d   : > { %v2748_v11 = vpop.f32.mrf.mxu2  ;;  %v2670_v26 = vadd.f32 %v8140_v35, %v2669_v54 }
 0x35e   : > { %v2749_v45 = vadd.f32 %v2748_v11, %v2665_v0  ;;  %v2832_v37 = vpop.f32.mrf.mxu3 }
 0x360   : > { %v8476_v8 = vadd.f32 %v2832_v37, %v2749_v45 }
 0x362   : > { %2962 = vmatmul.bf16.gmra.mxu2 %v7957_v6 }
 0x363   : > { %3046 = vmatmul.bf16.gmra.mxu3 %v7972_v32 }
 0x364   : > { %v2672_v63 = vpop.f32.mrf.mxu1 }
 0x365   : > { %v2751_v13 = vpop.f32.mrf.mxu2  ;;  %v2673_v6 = vadd.f32 %v8140_v35, %v2672_v63 }
 0x366   : > { %v2752_v34 = vadd.f32 %v2751_v13, %v2668_v46  ;;  %v2835_v14 = vpop.f32.mrf.mxu3 }
 0x367   : > { %2883 = vmatmul.bf16.gmra.mxu1 %v7976_v43 }
 0x368   : > { %v8482_v55 = vadd.f32 %v2835_v14, %v2752_v34 }
 0x36c   : > { %v2674_v40 = vpop.f32.mrf.mxu1 }
 0x36d   : > { %v2753_v0 = vpop.f32.mrf.mxu2  ;;  %v2675_v54 = vadd.f32 %v8140_v35, %v2674_v40 }
 0x36e   : > { %v2754_v11 = vadd.f32 %v2753_v0, %v2670_v26  ;;  %v2837_v45 = vpop.f32.mrf.mxu3 }
 0x370   : > { %v8485_v37 = vadd.f32 %v2837_v45, %v2754_v11 }
 0x372   : > { %2967 = vmatmul.bf16.gmra.mxu2 %v8003_v62 }
 0x373   : > { %3051 = vmatmul.bf16.gmra.mxu3 %v8007_v58 }
 0x374   : > { %v2677_v32 = vpop.f32.mrf.mxu1 }
 0x375   : > { %v2756_v42 = vpop.f32.mrf.mxu2  ;;  %v2678_v63 = vadd.f32 %v8140_v35, %v2677_v32 }
 0x376   : > { %v2757_v46 = vadd.f32 %v2756_v42, %v2673_v6  ;;  %v2840_v13 = vpop.f32.mrf.mxu3 }
 0x377   : > { %2888 = vmatmul.bf16.gmra.mxu1 %v8013_v31 }
 0x378   : > { %v8491_v34 = vadd.f32 %v2840_v13, %v2757_v46 }
 0x37c   : > { %v2679_v14 = vpop.f32.mrf.mxu1 }
 0x37d   : > { %v2758_v26 = vpop.f32.mrf.mxu2  ;;  %v2680_v40 = vadd.f32 %v8140_v35, %v2679_v14 }
 0x37e   : > { %v2759_v0 = vadd.f32 %v2758_v26, %v2675_v54  ;;  %v2842_v11 = vpop.f32.mrf.mxu3 }
 0x380   : > { %v8494_v45 = vadd.f32 %v2842_v11, %v2759_v0 }
 0x382   : > { %2972 = vmatmul.bf16.gmra.mxu2 %v8023_v20 }
 0x383   : > { %3056 = vmatmul.bf16.gmra.mxu3 %v8037_v61 }
 0x384   : > { %v2682_v6 = vpop.f32.mrf.mxu1 }
 0x385   : > { %v2761_v42 = vpop.f32.mrf.mxu2  ;;  %v2683_v32 = vadd.f32 %v8140_v35, %v2682_v6 }
 0x386   : > { %v2762_v58 = vadd.f32 %v2761_v42, %v2678_v63  ;;  %v2845_v31 = vpop.f32.mrf.mxu3 }
 0x387   : > { %2893 = vmatmul.bf16.gmra.mxu1 %v8034_v44 }
 0x388   : > { %v8500_v46 = vadd.f32 %v2845_v31, %v2762_v58 }
 0x38c   : > { %v2684_v13 = vpop.f32.mrf.mxu1 }
 0x38d   : > { %v2763_v54 = vpop.f32.mrf.mxu2  ;;  %v2685_v31 = vadd.f32 %v8140_v35, %v2684_v13 }
 0x38e   : > { %v2764_v26 = vadd.f32 %v2763_v54, %v2680_v40  ;;  %v2847_v0 = vpop.f32.mrf.mxu3 }
 0x390   : > { %v8503_v11 = vadd.f32 %v2847_v0, %v2764_v26 }
 0x392   : > { %2977 = vmatmul.bf16.gmra.mxu2 %v8062_v51 }
 0x393   : > { %3061 = vmatmul.bf16.gmra.mxu3 %v8067_v18 }
 0x394   : > { %v2687_v63 = vpop.f32.mrf.mxu1 }
 0x395   : > { %v2766_v42 = vpop.f32.mrf.mxu2  ;;  %v2688_v6 = vadd.f32 %v8140_v35, %v2687_v63 }
 0x396   : > { %v2767_v61 = vadd.f32 %v2766_v42, %v2683_v32  ;;  %v2850_v44 = vpop.f32.mrf.mxu3 }
 0x397   : > { %2898 = vmatmul.bf16.gmra.mxu1 %v8076_v29 }
 0x398   : > { %v8509_v58 = vadd.f32 %v2850_v44, %v2767_v61 }
 0x39c   : > { %v2689_v14 = vpop.f32.mrf.mxu1 }
 0x39d   : > { %v2768_v40 = vpop.f32.mrf.mxu2 }
 0x39e   : > { %v2769_v54 = vadd.f32 %v2768_v40, %v2685_v31  ;;  %v2852_v26 = vpop.f32.mrf.mxu3 }
 0x3a0   : > { %v8512_v0 = vadd.f32 %v2852_v26, %v2769_v54 }
 0x3a2   : > { %2982 = vmatmul.bf16.gmra.mxu2 %v8087_v36 }
 0x3a3   : > { %3066 = vmatmul.bf16.gmra.mxu3 %v8094_v57 }
 0x3a4   : > { %v2691_v32 = vpop.f32.mrf.mxu1 }
 0x3a5   : > { %v2771_v42 = vpop.f32.mrf.mxu2  ;;  %v9855_v32 = vld [vmem:[#allocation22_spill] sm:$0xff] }
 0x3a6   : > { %v2772_v18 = vadd.f32 %v2771_v42, %v2688_v6  ;;  %v2855_v29 = vpop.f32.mrf.mxu3  ;;  %v9856_v42 = vld [vmem:[#allocation23_spill] sm:$0xff] }
 0x3a7   : > { %2903 = vmatmul.bf16.gmra.mxu1 %v8098_v1 }
 0x3a8   : > { %v8518_v44 = vadd.f32 %v2855_v29, %v2772_v18  ;;  %v9857_v29 = vld [vmem:[#allocation25_spill] sm:$0xff] }
 0x3ac   : > { %v2692_v61 = vpop.f32.mrf.mxu1 }
 0x3ad   : > { %v2773_v13 = vpop.f32.mrf.mxu2 }
 0x3ae   : > { %v2857_v31 = vpop.f32.mrf.mxu3 }
 0x3b2   : > { %2987 = vmatmul.bf16.gmra.mxu2 %v8124_v4  ;;  %v9858_v4 = vld [vmem:[#allocation24_spill] sm:$0xff] }
 0x3b3   : > { %3071 = vmatmul.bf16.gmra.mxu3 %v8127_v27 }
 0x3b4   : > { %v2694_v14 = vpop.f32.mrf.mxu1 }
 0x3b5   : > { %v2775_v40 = vpop.f32.mrf.mxu2 }
 0x3b6   : > { %v2859_v54 = vpop.f32.mrf.mxu3 }
 0x3b7   : > { %2908 = vmatmul.bf16.gmra.mxu1 %v8134_v9  ;;  %v9859_v54 = vld [vmem:[#allocation3_spill] sm:$0xff] }
 0x3b8   : > { %v2625_v9 = vadd.f32 %v8140_v35, %v9859_v54 }
 0x3bc   : > { %v2695_v63 = vpop.f32.mrf.mxu1 }
 0x3bd   : > { %v2776_v26 = vpop.f32.mrf.mxu2 }
 0x3be   : > { %v2860_v6 = vpop.f32.mrf.mxu3 }
 0x3c2   : > { %2992 = vmatmul.bf16.gmra.mxu2 %v9855_v32 }
 0x3c3   : > { %3076 = vmatmul.bf16.gmra.mxu3 %v9856_v42 }
 0x3c4   : > { %v2874_v18 = vpop.f32.mrf.mxu1 }
 0x3c5   : > { %v2875_v61 = vadd.f32 %v2874_v18, %v9857_v29  ;;  %v2778_v13 = vpop.f32.mrf.mxu2  ;;  %v2709_v18 = vadd.f32 %v8267_v3, %v2625_v9 }
 0x3c6   : > { %v2862_v31 = vpop.f32.mrf.mxu3 }
 0x3c7   : > { %2913 = vmatmul.bf16.gmra.mxu1 %v9858_v4 }
 0x3cc   : > { %v2876_v27 = vpop.f32.mrf.mxu1 }
 0x3cd   : > { %v2779_v14 = vpop.f32.mrf.mxu2 }
 0x3ce   : > { %v2863_v40 = vpop.f32.mrf.mxu3  ;;  %v2793_v14 = vadd.f32 %v8269_v25, %v2709_v18 }
 0x3d0   : > { %v2877_v40 = vadd.f32 %v2876_v27, %v2793_v14 }
 0x3d2   : > { %2997 = vmatmul.bf16.gmra.mxu2 %v8195_v56 }
 0x3d3   : > { %3081 = vmatmul.bf16.gmra.mxu3 %v8202_v17 }
 0x3d4   : > { %v2879_v63 = vpop.f32.mrf.mxu1 }
 0x3d5   : > { %v2880_v26 = vadd.f32 %v2879_v63, %v8300_v19  ;;  %v2958_v6 = vpop.f32.mrf.mxu2 }
 0x3d6   : > { %v2959_v29 = vadd.f32 %v2958_v6, %v2875_v61  ;;  %v3042_v13 = vpop.f32.mrf.mxu3 }
 0x3d7   : > { %2918 = vmatmul.bf16.gmra.mxu1 %v8210_v41 }
 0x3d8   : > { %v8534_v31 = vadd.f32 %v3042_v13, %v2959_v29 }
 0x3dc   : > { %v2881_v35 = vpop.f32.mrf.mxu1 }
 0x3dd   : > { %v2882_v54 = vadd.f32 %v2881_v35, %v8314_v22  ;;  %v2960_v56 = vpop.f32.mrf.mxu2 }
 0x3de   : > { %v2961_v17 = vadd.f32 %v2960_v56, %v2877_v40  ;;  %v3044_v4 = vpop.f32.mrf.mxu3 }
 0x3e0   : > { %v8538_v42 = vadd.f32 %v3044_v4, %v2961_v17 }
 0x3e2   : > { %3002 = vmatmul.bf16.gmra.mxu2 %v8218_v12 }
 0x3e3   : > { %3086 = vmatmul.bf16.gmra.mxu3 %v8225_v38 }
 0x3e4   : > { %v2884_v3 = vpop.f32.mrf.mxu1 }
 0x3e5   : > { %v2885_v9 = vadd.f32 %v2884_v3, %v8320_v10  ;;  %v2963_v19 = vpop.f32.mrf.mxu2 }
 0x3e6   : > { %v2964_v61 = vadd.f32 %v2963_v19, %v2880_v26  ;;  %v3047_v63 = vpop.f32.mrf.mxu3 }
 0x3e7   : > { %2923 = vmatmul.bf16.gmra.mxu1 %v8230_v30 }
 0x3e8   : > { %v8544_v27 = vadd.f32 %v3047_v63, %v2964_v61  ;;  %v9860_v61 = vld [vmem:[#allocation29_spill] sm:$0xff] }
 0x3ec   : > { %v2886_v25 = vpop.f32.mrf.mxu1 }
 0x3ed   : > { %v2887_v56 = vadd.f32 %v2886_v25, %v8323_v16  ;;  %v2965_v22 = vpop.f32.mrf.mxu2 }
 0x3ee   : > { %v2966_v4 = vadd.f32 %v2965_v22, %v2882_v54  ;;  %v3049_v17 = vpop.f32.mrf.mxu3 }
 0x3f0   : > { %v8547_v6 = vadd.f32 %v3049_v17, %v2966_v4  ;;  %v9861_v4 = vld [vmem:[#allocation4_spill] sm:$0xff] }
 0x3f2   : > { %3007 = vmatmul.bf16.gmra.mxu2 %v8257_v5 }
 0x3f3   : > { %3091 = vmatmul.bf16.gmra.mxu3 %v8261_v60 }
 0x3f4   : > { %v2889_v10 = vpop.f32.mrf.mxu1 }
 0x3f5   : > { %v2890_v26 = vadd.f32 %v2889_v10, %v8329_v28  ;;  %v2968_v18 = vpop.f32.mrf.mxu2 }
 0x3f6   : > { %v2969_v29 = vadd.f32 %v2968_v18, %v2885_v9  ;;  %v3052_v13 = vpop.f32.mrf.mxu3 }
 0x3f7   : > { %2928 = vmatmul.bf16.gmra.mxu1 %v8274_v23 }
 0x3f8   : > { %v8553_v14 = vadd.f32 %v3052_v13, %v2969_v29  ;;  %v7239_v29 = vld [vmem:[%s9761_s3 + $0x1b0] sm:$0xff] }
 0x3fc   : > { %v2891_v16 = vpop.f32.mrf.mxu1 }
 0x3fd   : > { %v2892_v40 = vadd.f32 %v2891_v16, %v8338_v2  ;;  %v2970_v35 = vpop.f32.mrf.mxu2  ;;  %v7240_v2 = vld [vmem:[%s9761_s3 + $0x1b8] sm:$0xff] }
 0x3fe   : > { %v2971_v54 = vadd.f32 %v2970_v35, %v2887_v56  ;;  %v3054_v3 = vpop.f32.mrf.mxu3  ;;  %3117 = vmatpush.bf16.msra.mxu1 %v7240_v2  ;;  %v7238_v35 = vld [vmem:[%s9761_s3 + $0x1a8] sm:$0xff] }
 0x400   : > { %v8556_v19 = vadd.f32 %v3054_v3, %v2971_v54  ;;  %v9862_v54 = vld [vmem:[#allocation27_spill] sm:$0xff]  ;;  %v9863_v3 = vld [vmem:[#allocation28_spill] sm:$0xff] }
 0x402   : > { %3012 = vmatmul.bf16.gmra.mxu2 %v8284_v21  ;;  %3118 = vmatpush.bf16.msra.mxu1 %v7239_v29  ;;  %v7247_v29 = vld [vmem:[%s9761_s3 + $0x1f0] sm:$0xff] }
 0x403   : > { %3096 = vmatmul.bf16.gmra.mxu3 %v8291_v50 }
 0x404   : > { %v2894_v28 = vpop.f32.mrf.mxu1 }
 0x405   : > { %v2895_v9 = vadd.f32 %v2894_v28, %v9860_v61  ;;  %v2973_v63 = vpop.f32.mrf.mxu2 }
 0x406   : > { %v2974_v25 = vadd.f32 %v2973_v63, %v2890_v26  ;;  %v3057_v22 = vpop.f32.mrf.mxu3  ;;  %3119 = vmatpush.bf16.msra.mxu1 %v7238_v35 }
 0x407   : > { %2933 = vmatmul.bf16.gmra.mxu1 %v9861_v4 }
 0x408   : > { %v8562_v17 = vadd.f32 %v3057_v22, %v2974_v25  ;;  %v7237_v25 = vld [vmem:[%s9761_s3 + $0x1a0] sm:$0xff] }
 0x40a   : > { %3120 = vmatpush.bf16.msra.mxu1 %v7237_v25 }
 0x40c   : > { %v2896_v56 = vpop.f32.mrf.mxu1 }
 0x40d   : > { %v2897_v10 = vadd.f32 %v2896_v56, %v8379_v33  ;;  %v2975_v18 = vpop.f32.mrf.mxu2  ;;  %v7248_v33 = vld [vmem:[%s9761_s3 + $0x1f8] sm:$0xff]  ;;  %v9864_v56 = vld [vmem:[#allocation31_spill] sm:$0xff] }
 0x40e   : > { %v2976_v13 = vadd.f32 %v2975_v18, %v2892_v40  ;;  %v3059_v26 = vpop.f32.mrf.mxu3  ;;  %v7256_v40 = vld [vmem:[%s9761_s3 + $0x238] sm:$0xff]  ;;  %3201 = vmatpush.bf16.msra.mxu2 %v7248_v33 }
 0x40f   : > { %3285 = vmatpush.bf16.msra.mxu3 %v7256_v40 }
 0x410   : > { %v8571_v16 = vadd.f32 %v3059_v26, %v2976_v13  ;;  %v7236_v13 = vld [vmem:[%s9761_s3 + $0x198] sm:$0xff]  ;;  %v7254_v26 = vld [vmem:[%s9761_s3 + $0x228] sm:$0xff] }
 0x411   : > { %3121 = vmatpush.bf16.msra.mxu1 %v7236_v13 }
 0x412   : > { %3017 = vmatmul.bf16.gmra.mxu2 %v9862_v54 }
 0x413   : > { %3101 = vmatmul.bf16.gmra.mxu3 %v9863_v3  ;;  %3202 = vmatpush.bf16.msra.mxu2 %v7247_v29  ;;  %v7234_v29 = vld [vmem:[%s9761_s3 + $0x188] sm:$0xff] }
 0x414   : > { %v2899_v28 = vpop.f32.mrf.mxu1 }
 0x415   : > { %v2900_v61 = vadd.f32 %v2899_v28, %v8414_v59  ;;  %v2978_v63 = vpop.f32.mrf.mxu2  ;;  %v7255_v59 = vld [vmem:[%s9761_s3 + $0x230] sm:$0xff] }
 0x416   : > { %v2979_v22 = vadd.f32 %v2978_v63, %v2895_v9  ;;  %v3062_v2 = vpop.f32.mrf.mxu3  ;;  %3286 = vmatpush.bf16.msra.mxu3 %v7255_v59  ;;  %v7246_v9 = vld [vmem:[%s9761_s3 + $0x1e8] sm:$0xff]  ;;  %v7235_v28 = vld [vmem:[%s9761_s3 + $0x190] sm:$0xff]  ;;  %v7252_v59 = vld [vmem:[%s9761_s3 + $0x218] sm:$0xff] }
 0x417   : > { %2938 = vmatmul.bf16.gmra.mxu1 %v9864_v56  ;;  %3203 = vmatpush.bf16.msra.mxu2 %v7246_v9 }
 0x418   : > { %v8589_v18 = vadd.f32 %v3062_v2, %v2979_v22  ;;  %3122 = vmatpush.bf16.msra.mxu1 %v7235_v28  ;;  %v7245_v2 = vld [vmem:[%s9761_s3 + $0x1e0] sm:$0xff] }
 0x41a   : > { %3287 = vmatpush.bf16.msra.mxu3 %v7254_v26 }
 0x41b   : > { %3204 = vmatpush.bf16.msra.mxu2 %v7245_v2  ;;  %v7243_v2 = vld [vmem:[%s9761_s3 + $0x1d0] sm:$0xff] }
 0x41c   : > { %v2901_v35 = vpop.f32.mrf.mxu1  ;;  %3123 = vmatpush.bf16.msra.mxu1 %v7234_v29 }
 0x41d   : > { %v2902_v33 = vadd.f32 %v2901_v35, %v8433_v24  ;;  %v2980_v40 = vpop.f32.mrf.mxu2  ;;  %v7253_v24 = vld [vmem:[%s9761_s3 + $0x220] sm:$0xff] }
 0x41e   : > { %v2981_v63 = vadd.f32 %v2980_v40, %v2897_v10  ;;  %v3064_v25 = vpop.f32.mrf.mxu3  ;;  %3288 = vmatpush.bf16.msra.mxu3 %v7253_v24  ;;  %v7244_v10 = vld [vmem:[%s9761_s3 + $0x1d8] sm:$0xff]  ;;  %v7233_v35 = vld [vmem:[%s9761_s3 + $0x180] sm:$0xff]  ;;  %v7242_v24 = vld [vmem:[%s9761_s3 + $0x1c8] sm:$0xff] }
 0x41f   : > { %3205 = vmatpush.bf16.msra.mxu2 %v7244_v10  ;;  %v9868_v10 = vld [vmem:[#allocation33_spill] sm:$0xff] }
 0x420   : > { %v8610_v22 = vadd.f32 %v3064_v25, %v2981_v63  ;;  %v9866_v63 = vld [vmem:[#allocation30_spill] sm:$0xff]  ;;  %3124 = vmatpush.bf16.msra.mxu1 %v7233_v35 }
 0x422   : > { %9865 = vst [vmem:[#allocation10_spill] sm:$0xff] %v8610_v22  ;;  %3022 = vmatmul.bf16.gmra.mxu2 %v8444_v39  ;;  %3289 = vmatpush.bf16.msra.mxu3 %v7252_v59 }
 0x423   : > { %3106 = vmatmul.bf16.gmra.mxu3 %v8450_v53  ;;  %3206 = vmatpush.bf16.msra.mxu2 %v7243_v2  ;;  %v7249_v2 = vld [vmem:[%s9761_s3 + $0x200] sm:$0xff] }
 0x424   : > { %v2904_v13 = vpop.f32.mrf.mxu1 }
 0x425   : > { %v2905_v9 = vadd.f32 %v2904_v13, %v8455_v49  ;;  %v2983_v26 = vpop.f32.mrf.mxu2  ;;  %v7251_v49 = vld [vmem:[%s9761_s3 + $0x210] sm:$0xff] }
 0x426   : > { %v2984_v40 = vadd.f32 %v2983_v26, %v2900_v61  ;;  %v3067_v28 = vpop.f32.mrf.mxu3  ;;  %3290 = vmatpush.bf16.msra.mxu3 %v7251_v49  ;;  %v7250_v61 = vld [vmem:[%s9761_s3 + $0x208] sm:$0xff]  ;;  %v9870_v49 = vld [vmem:[#allocation32_spill] sm:$0xff] }
 0x427   : > { %2942 = vmatmul.bf16.gmra.mxu1 %v9866_v63  ;;  %3207 = vmatpush.bf16.msra.mxu2 %v7242_v24 }
 0x428   : > { %v8634_v25 = vadd.f32 %v3067_v28, %v2984_v40  ;;  %v7241_v28 = vld [vmem:[%s9761_s3 + $0x1c0] sm:$0xff] }
 0x42a   : > { %9867 = vst [vmem:[#allocation22_spill] sm:$0xff] %v8634_v25  ;;  %3291 = vmatpush.bf16.msra.mxu3 %v7250_v61 }
 0x42b   : > { %3208 = vmatpush.bf16.msra.mxu2 %v7241_v28 }
 0x42c   : > { %v2906_v29 = vpop.f32.mrf.mxu1 }
 0x42d   : > { %v2907_v59 = vadd.f32 %v2906_v29, %v9868_v10  ;;  %v2985_v13 = vpop.f32.mrf.mxu2 }
 0x42e   : > { %v2986_v26 = vadd.f32 %v2985_v13, %v2902_v33  ;;  %v3069_v35 = vpop.f32.mrf.mxu3  ;;  %3292 = vmatpush.bf16.msra.mxu3 %v7249_v2 }
 0x430   : > { %v8649_v40 = vadd.f32 %v3069_v35, %v2986_v26 }
 0x432   : > { %9869 = vst [vmem:[#allocation25_spill] sm:$0xff] %v8649_v40  ;;  %3026 = vmatmul.bf16.gmra.mxu2 %v8429_v15 }
 0x433   : > { %3110 = vmatmul.bf16.gmra.mxu3 %v9870_v49 }
 0x434   : > { %v2909_v33 = vpop.f32.mrf.mxu1 }
 0x435   : > { %v2910_v61 = vadd.f32 %v2909_v33, %v8464_v52  ;;  %v2988_v24 = vpop.f32.mrf.mxu2 }
 0x436   : > { %v2989_v29 = vadd.f32 %v2988_v24, %v2905_v9  ;;  %v3072_v10 = vpop.f32.mrf.mxu3 }
 0x437   : > { %2945 = vmatmul.bf16.gmra.mxu1 %v9866_v63 }
 0x438   : > { %v8661_v13 = vadd.f32 %v3072_v10, %v2989_v29 }
 0x43c   : > { %v2911_v26 = vpop.f32.mrf.mxu1 }
 0x43d   : > { %v2912_v35 = vadd.f32 %v2911_v26, %v8467_v7  ;;  %v2990_v40 = vpop.f32.mrf.mxu2  ;;  %v9872_v26 = vld [vmem:[#allocation11_spill] sm:$0xff] }
 0x43e   : > { %v2991_v22 = vadd.f32 %v2990_v40, %v2907_v59  ;;  %v3074_v25 = vpop.f32.mrf.mxu3 }
 0x440   : > { %v8664_v2 = vadd.f32 %v3074_v25, %v2991_v22 }
 0x442   : > { %9871 = vst [vmem:[#allocation3_spill] sm:$0xff] %v8664_v2  ;;  %3029 = vmatmul.bf16.gmra.mxu2 %v8429_v15  ;;  %v9873_v2 = vld [vmem:[#allocation12_spill] sm:$0xff] }
 0x443   : > { %3113 = vmatmul.bf16.gmra.mxu3 %v9870_v49 }
 0x444   : > { %v2914_v52 = vpop.f32.mrf.mxu1 }
 0x445   : > { %v2915_v9 = vadd.f32 %v2914_v52, %v8473_v47  ;;  %v2993_v28 = vpop.f32.mrf.mxu2 }
 0x446   : > { %v2994_v33 = vadd.f32 %v2993_v28, %v2910_v61  ;;  %v3077_v24 = vpop.f32.mrf.mxu3 }
 0x447   : > { %3125 = vmatmul.bf16.vlgmr.msra.gmra.mxu1 %v7940_v48 }
 0x448   : > { %v8670_v29 = vadd.f32 %v3077_v24, %v2994_v33 }
 0x44c   : > { %v2916_v7 = vpop.f32.mrf.mxu1 }
 0x44d   : > { %v2917_v59 = vadd.f32 %v2916_v7, %v8476_v8  ;;  %v2995_v40 = vpop.f32.mrf.mxu2 }
 0x44e   : > { %v2996_v22 = vadd.f32 %v2995_v40, %v2912_v35  ;;  %v3079_v25 = vpop.f32.mrf.mxu3 }
 0x450   : > { %v8673_v10 = vadd.f32 %v3079_v25, %v2996_v22 }
 0x452   : > { %3209 = vmatmul.bf16.vlgmr.msra.gmra.mxu2 %v9872_v26 }
 0x453   : > { %3293 = vmatmul.bf16.vlgmr.msra.gmra.mxu3 %v9873_v2  ;;  %v9874_v2 = vld [vmem:[#allocation13_spill] sm:$0xff] }
 0x454   : > { %v2919_v47 = vpop.f32.mrf.mxu1 }
 0x455   : > { %v2920_v61 = vadd.f32 %v2919_v47, %v8482_v55  ;;  %v2998_v52 = vpop.f32.mrf.mxu2  ;;  %v9875_v47 = vld [vmem:[#allocation14_spill] sm:$0xff] }
 0x456   : > { %v2999_v28 = vadd.f32 %v2998_v52, %v2915_v9  ;;  %v3082_v48 = vpop.f32.mrf.mxu3 }
 0x457   : > { %3130 = vmatmul.bf16.gmra.mxu1 %v7976_v43 }
 0x458   : > { %v8679_v33 = vadd.f32 %v3082_v48, %v2999_v28 }
 0x45c   : > { %v2921_v8 = vpop.f32.mrf.mxu1 }
 0x45d   : > { %v2922_v35 = vadd.f32 %v2921_v8, %v8485_v37  ;;  %v3000_v24 = vpop.f32.mrf.mxu2 }
 0x45e   : > { %v3001_v7 = vadd.f32 %v3000_v24, %v2917_v59  ;;  %v3084_v40 = vpop.f32.mrf.mxu3 }
 0x460   : > { %v8682_v22 = vadd.f32 %v3084_v40, %v3001_v7 }
 0x462   : > { %3214 = vmatmul.bf16.gmra.mxu2 %v8003_v62  ;;  %v9876_v62 = vld [vmem:[#allocation16_spill] sm:$0xff] }
 0x463   : > { %3298 = vmatmul.bf16.gmra.mxu3 %v9874_v2 }
 0x464   : > { %v2924_v55 = vpop.f32.mrf.mxu1 }
 0x465   : > { %v2925_v9 = vadd.f32 %v2924_v55, %v8491_v34  ;;  %v3003_v25 = vpop.f32.mrf.mxu2  ;;  %v9877_v55 = vld [vmem:[#allocation15_spill] sm:$0xff] }
 0x466   : > { %v3004_v26 = vadd.f32 %v3003_v25, %v2920_v61  ;;  %v3087_v43 = vpop.f32.mrf.mxu3 }
 0x467   : > { %3135 = vmatmul.bf16.gmra.mxu1 %v9875_v47 }
 0x468   : > { %v8688_v52 = vadd.f32 %v3087_v43, %v3004_v26 }
 0x46c   : > { %v2926_v37 = vpop.f32.mrf.mxu1 }
 0x46d   : > { %v2927_v59 = vadd.f32 %v2926_v37, %v8494_v45  ;;  %v3005_v28 = vpop.f32.mrf.mxu2 }
 0x46e   : > { %v3006_v48 = vadd.f32 %v3005_v28, %v2922_v35  ;;  %v3089_v8 = vpop.f32.mrf.mxu3 }
 0x470   : > { %v8691_v24 = vadd.f32 %v3089_v8, %v3006_v48 }
 0x472   : > { %3219 = vmatmul.bf16.gmra.mxu2 %v8023_v20  ;;  %v9878_v20 = vld [vmem:[#allocation17_spill] sm:$0xff] }
 0x473   : > { %3303 = vmatmul.bf16.gmra.mxu3 %v9876_v62  ;;  %v9879_v62 = vld [vmem:[#allocation18_spill] sm:$0xff] }
 0x474   : > { %v2929_v34 = vpop.f32.mrf.mxu1 }
 0x475   : > { %v2930_v61 = vadd.f32 %v2929_v34, %v8500_v46  ;;  %v3008_v7 = vpop.f32.mrf.mxu2 }
 0x476   : > { %v3009_v40 = vadd.f32 %v3008_v7, %v2925_v9  ;;  %v3092_v2 = vpop.f32.mrf.mxu3 }
 0x477   : > { %3140 = vmatmul.bf16.gmra.mxu1 %v9877_v55 }
 0x478   : > { %v8697_v25 = vadd.f32 %v3092_v2, %v3009_v40 }
 0x47c   : > { %v2931_v45 = vpop.f32.mrf.mxu1 }
 0x47d   : > { %v2932_v35 = vadd.f32 %v2931_v45, %v8503_v11  ;;  %v3010_v26 = vpop.f32.mrf.mxu2 }
 0x47e   : > { %v3011_v43 = vadd.f32 %v3010_v26, %v2927_v59  ;;  %v3094_v47 = vpop.f32.mrf.mxu3 }
 0x480   : > { %v8700_v37 = vadd.f32 %v3094_v47, %v3011_v43 }
 0x482   : > { %3224 = vmatmul.bf16.gmra.mxu2 %v8062_v51 }
 0x483   : > { %3308 = vmatmul.bf16.gmra.mxu3 %v9878_v20 }
 0x484   : > { %v2934_v46 = vpop.f32.mrf.mxu1 }
 0x485   : > { %v2935_v9 = vadd.f32 %v2934_v46, %v8509_v58  ;;  %v3013_v28 = vpop.f32.mrf.mxu2 }
 0x486   : > { %v3014_v48 = vadd.f32 %v3013_v28, %v2930_v61  ;;  %v3097_v8 = vpop.f32.mrf.mxu3  ;;  %v9880_v28 = vld [vmem:[#allocation19_spill] sm:$0xff] }
 0x487   : > { %3145 = vmatmul.bf16.gmra.mxu1 %v9879_v62 }
 0x488   : > { %v8706_v34 = vadd.f32 %v3097_v8, %v3014_v48 }
 0x48c   : > { %v2936_v11 = vpop.f32.mrf.mxu1 }
 0x48d   : > { %v2937_v59 = vadd.f32 %v2936_v11, %v8512_v0  ;;  %v3015_v7 = vpop.f32.mrf.mxu2 }
 0x48e   : > { %v3016_v40 = vadd.f32 %v3015_v7, %v2932_v35  ;;  %v3099_v2 = vpop.f32.mrf.mxu3 }
 0x490   : > { %v8709_v55 = vadd.f32 %v3099_v2, %v3016_v40 }
 0x492   : > { %3229 = vmatmul.bf16.gmra.mxu2 %v8087_v36  ;;  %v9881_v36 = vld [vmem:[#allocation20_spill] sm:$0xff] }
 0x493   : > { %3313 = vmatmul.bf16.gmra.mxu3 %v8094_v57 }
 0x494   : > { %v2939_v51 = vpop.f32.mrf.mxu1 }
 0x495   : > { %v2940_v58 = vadd.f32 %v2939_v51, %v8518_v44  ;;  %v3018_v61 = vpop.f32.mrf.mxu2 }
 0x496   : > { %v3019_v45 = vadd.f32 %v3018_v61, %v2935_v9  ;;  %v3102_v26 = vpop.f32.mrf.mxu3  ;;  %v9882_v9 = vld [vmem:[#allocation21_spill] sm:$0xff]  ;;  %v9884_v61 = vld [vmem:[#allocation24_spill] sm:$0xff] }
 0x497   : > { %3150 = vmatmul.bf16.gmra.mxu1 %v8098_v1 }
 0x498   : > { %v8715_v43 = vadd.f32 %v3102_v26, %v3019_v45 }
 0x49c   : > { %v2941_v0 = vpop.f32.mrf.mxu1 }
 0x49d   : > { %v3020_v47 = vpop.f32.mrf.mxu2  ;;  %v9885_v0 = vld [vmem:[#allocation2_spill] sm:$0xff] }
 0x49e   : > { %v3021_v35 = vadd.f32 %v3020_v47, %v2937_v59  ;;  %v3104_v20 = vpop.f32.mrf.mxu3  ;;  %v9883_v59 = vld [vmem:[#allocation23_spill] sm:$0xff]  ;;  %v9886_v47 = vld [vmem:[#allocation26_spill] sm:$0xff] }
 0x4a0   : > { %v8717_v46 = vadd.f32 %v3104_v20, %v3021_v35 }
 0x4a2   : > { %3234 = vmatmul.bf16.gmra.mxu2 %v9880_v28 }
 0x4a3   : > { %3318 = vmatmul.bf16.gmra.mxu3 %v9881_v36 }
 0x4a4   : > { %v2943_v57 = vpop.f32.mrf.mxu1 }
 0x4a5   : > { %v3023_v48 = vpop.f32.mrf.mxu2 }
 0x4a6   : > { %v3024_v44 = vadd.f32 %v3023_v48, %v2940_v58  ;;  %v3107_v8 = vpop.f32.mrf.mxu3 }
 0x4a7   : > { %3155 = vmatmul.bf16.gmra.mxu1 %v9882_v9 }
 0x4a8   : > { %v8722_v62 = vadd.f32 %v3107_v8, %v3024_v44 }
 0x4ac   : > { %v2944_v1 = vpop.f32.mrf.mxu1 }
 0x4ad   : > { %v3025_v11 = vpop.f32.mrf.mxu2 }
 0x4ae   : > { %v3109_v7 = vpop.f32.mrf.mxu3 }
 0x4b2   : > { %3239 = vmatmul.bf16.gmra.mxu2 %v9855_v32 }
 0x4b3   : > { %3323 = vmatmul.bf16.gmra.mxu3 %v9883_v59 }
 0x4b4   : > { %v2946_v40 = vpop.f32.mrf.mxu1 }
 0x4b5   : > { %v3027_v2 = vpop.f32.mrf.mxu2 }
 0x4b6   : > { %v3111_v51 = vpop.f32.mrf.mxu3 }
 0x4b7   : > { %3160 = vmatmul.bf16.gmra.mxu1 %v9884_v61 }
 0x4bc   : > { %v2947_v45 = vpop.f32.mrf.mxu1 }
 0x4bd   : > { %v3028_v26 = vpop.f32.mrf.mxu2 }
 0x4be   : > { %v3112_v58 = vpop.f32.mrf.mxu3 }
 0x4c2   : > { %3244 = vmatmul.bf16.gmra.mxu2 %v9885_v0 }
 0x4c3   : > { %3328 = vmatmul.bf16.gmra.mxu3 %v9886_v47 }
 0x4c4   : > { %v3126_v35 = vpop.f32.mrf.mxu1 }
 0x4c5   : > { %v3127_v20 = vadd.f32 %v3126_v35, %v8534_v31  ;;  %v3030_v28 = vpop.f32.mrf.mxu2 }
 0x4c6   : > { %v3114_v36 = vpop.f32.mrf.mxu3 }
 0x4c7   : > { %3165 = vmatmul.bf16.gmra.mxu1 %v8210_v41 }
 0x4cc   : > { %v3128_v32 = vpop.f32.mrf.mxu1 }
 0x4cd   : > { %v3129_v57 = vadd.f32 %v3128_v32, %v8538_v42  ;;  %v3031_v48 = vpop.f32.mrf.mxu2 }
 0x4ce   : > { %v3115_v44 = vpop.f32.mrf.mxu3 }
 0x4d2   : > { %3249 = vmatmul.bf16.gmra.mxu2 %v8218_v12 }
 0x4d3   : > { %3333 = vmatmul.bf16.gmra.mxu3 %v8225_v38 }
 0x4d4   : > { %v3131_v8 = vpop.f32.mrf.mxu1 }
 0x4d5   : > { %v3132_v9 = vadd.f32 %v3131_v8, %v8544_v27  ;;  %v3210_v1 = vpop.f32.mrf.mxu2 }
 0x4d6   : > { %v3211_v11 = vadd.f32 %v3210_v1, %v3127_v20  ;;  %v3294_v7 = vpop.f32.mrf.mxu3 }
 0x4d7   : > { %3170 = vmatmul.bf16.gmra.mxu1 %v8230_v30 }
 0x4d8   : > { %v3295_v31 = vadd.f32 %v3294_v7, %v3211_v11 }
 0x4da   : > { %v3369_v51 = vmax.f32 %v3295_v31, 0.0 }
 0x4dc   : > { %v3133_v59 = vpop.f32.mrf.mxu1  ;;  %v3421_v38 = vrot.slane %v3369_v51, 1 }
 0x4dd   : > { %v3134_v41 = vadd.f32 %v3133_v59, %v8547_v6  ;;  %v3212_v40 = vpop.f32.mrf.mxu2 }
 0x4de   : > { %v3213_v42 = vadd.f32 %v3212_v40, %v3129_v57  ;;  %v3296_v2 = vpop.f32.mrf.mxu3 }
 0x4e0   : > { %v3297_v61 = vadd.f32 %v3296_v2, %v3213_v42 }
 0x4e2   : > { %v3370_v12 = vmax.f32 %v3297_v61, 0.0  ;;  %3254 = vmatmul.bf16.gmra.mxu2 %v8257_v5 }
 0x4e3   : > { %3338 = vmatmul.bf16.gmra.mxu3 %v8261_v60 }
 0x4e4   : > { %v3422_v27 = vrot.slane %v3370_v12, 1  ;;  %v3136_v45 = vpop.f32.mrf.mxu1 }
 0x4e5   : > { %v3137_v26 = vadd.f32 %v3136_v45, %v8553_v14  ;;  %v3215_v30 = vpop.f32.mrf.mxu2 }
 0x4e6   : > { %v3216_v58 = vadd.f32 %v3215_v30, %v3132_v9  ;;  %v3299_v0 = vpop.f32.mrf.mxu3  ;;  %v3423_v6 = vsel %vm1258_vm4, %v3421_v38, %v3422_v27 }
 0x4e7   : > { %3175 = vmatmul.bf16.gmra.mxu1 %v8274_v23  ;;  %v3494_v47 = vmax.f32 %v3369_v51, %v3423_v6 }
 0x4e8   : > { %v3300_v35 = vadd.f32 %v3299_v0, %v3216_v58 }
 0x4ea   : > { %v3371_v20 = vmax.f32 %v3300_v35, 0.0 }
 0x4ec   : > { %v3424_v28 = vrot.slane %v3371_v20, 1  ;;  %v3138_v36 = vpop.f32.mrf.mxu1 }
 0x4ed   : > { %v3139_v5 = vadd.f32 %v3138_v36, %v8556_v19  ;;  %v3217_v60 = vpop.f32.mrf.mxu2 }
 0x4ee   : > { %v3218_v32 = vadd.f32 %v3217_v60, %v3134_v41  ;;  %v3301_v57 = vpop.f32.mrf.mxu3  ;;  %v3425_v48 = vsel %vm1258_vm4, %v3422_v27, %v3424_v28 }
 0x4ef   : > { %v3495_v14 = vmax.f32 %v3370_v12, %v3425_v48 }
 0x4f0   : > { %v3302_v44 = vadd.f32 %v3301_v57, %v3218_v32 }
 0x4f2   : > { %v3372_v8 = vmax.f32 %v3302_v44, 0.0  ;;  %3259 = vmatmul.bf16.gmra.mxu2 %v8284_v21 }
 0x4f3   : > { %3343 = vmatmul.bf16.gmra.mxu3 %v8291_v50 }
 0x4f4   : > { %v3426_v23 = vrot.slane %v3372_v8, 1  ;;  %v3141_v9 = vpop.f32.mrf.mxu1 }
 0x4f5   : > { %v3142_v1 = vadd.f32 %v3141_v9, %v8562_v17  ;;  %v3220_v11 = vpop.f32.mrf.mxu2 }
 0x4f6   : > { %v3221_v7 = vadd.f32 %v3220_v11, %v3137_v26  ;;  %v3304_v31 = vpop.f32.mrf.mxu3  ;;  %v3427_v19 = vsel %vm1258_vm4, %v3424_v28, %v3426_v23 }
 0x4f7   : > { %3180 = vmatmul.bf16.gmra.mxu1 %v9861_v4  ;;  %v3496_v59 = vmax.f32 %v3371_v20, %v3427_v19 }
 0x4f8   : > { %v3305_v41 = vadd.f32 %v3304_v31, %v3221_v7 }
 0x4f9   : > { %v3528_v40 = vmax.f32 %v3494_v47, %v3496_v59 }
 0x4fa   : > { %v3373_v42 = vmax.f32 %v3305_v41, 0.0 }
 0x4fc   : > { %v3428_v2 = vrot.slane %v3373_v42, 1  ;;  %v3143_v51 = vpop.f32.mrf.mxu1 }
 0x4fd   : > { %v3144_v21 = vadd.f32 %v3143_v51, %v8571_v16  ;;  %v3222_v50 = vpop.f32.mrf.mxu2 }
 0x4fe   : > { %v3223_v61 = vadd.f32 %v3222_v50, %v3139_v5  ;;  %v3306_v12 = vpop.f32.mrf.mxu3  ;;  %v3429_v17 = vsel %vm1258_vm4, %v3426_v23, %v3428_v2 }
 0x4ff   : > { %v3497_v38 = vmax.f32 %v3372_v8, %v3429_v17 }
 0x500   : > { %v3307_v27 = vadd.f32 %v3306_v12, %v3223_v61 }
 0x501   : > { %v3529_v45 = vmax.f32 %v3495_v14, %v3497_v38 }
 0x502   : > { %v3374_v26 = vmax.f32 %v3307_v27, 0.0  ;;  %3264 = vmatmul.bf16.gmra.mxu2 %v9862_v54 }
 0x503   : > { %3348 = vmatmul.bf16.gmra.mxu3 %v9863_v3  ;;  %v8753_v4 = vpack.c.bf16 %v3529_v45, %v3528_v40 }
 0x504   : > { %v3430_v30 = vrot.slane %v3374_v26, 1  ;;  %v3146_v58 = vpop.f32.mrf.mxu1 }
 0x505   : > { %v3147_v0 = vadd.f32 %v3146_v58, %v8589_v18  ;;  %v3225_v16 = vpop.f32.mrf.mxu2 }
 0x506   : > { %v3226_v6 = vadd.f32 %v3225_v16, %v3142_v1  ;;  %v3309_v47 = vpop.f32.mrf.mxu3  ;;  %v3431_v35 = vsel %vm1258_vm4, %v3428_v2, %v3430_v30  ;;  %v9887_v1 = vld [vmem:[#allocation22_spill] sm:$0xff] }
 0x507   : > { %3185 = vmatmul.bf16.gmra.mxu1 %v9864_v56  ;;  %v3498_v20 = vmax.f32 %v3373_v42, %v3431_v35 }
 0x508   : > { %v3310_v28 = vadd.f32 %v3309_v47, %v3226_v6 }
 0x509   : > { %v3530_v36 = vmax.f32 %v3496_v59, %v3498_v20 }
 0x50a   : > { %v3375_v5 = vmax.f32 %v3310_v28, 0.0 }
 0x50c   : > { %v3432_v54 = vrot.slane %v3375_v5, 1  ;;  %v3148_v60 = vpop.f32.mrf.mxu1 }
 0x50d   : > { %v3227_v3 = vpop.f32.mrf.mxu2 }
 0x50e   : > { %v3228_v32 = vadd.f32 %v3227_v3, %v3144_v21  ;;  %v3311_v57 = vpop.f32.mrf.mxu3  ;;  %v3433_v48 = vsel %vm1258_vm4, %v3430_v30, %v3432_v54 }
 0x50f   : > { %v3499_v14 = vmax.f32 %v3374_v26, %v3433_v48 }
 0x510   : > { %v3312_v18 = vadd.f32 %v3311_v57, %v3228_v32 }
 0x511   : > { %v3531_v44 = vmax.f32 %v3497_v38, %v3499_v14 }
 0x512   : > { %v3376_v8 = vmax.f32 %v3312_v18, 0.0  ;;  %3269 = vmatmul.bf16.gmra.mxu2 %v8444_v39  ;;  %v9888_v39 = vld [vmem:[#allocation10_spill] sm:$0xff] }
 0x513   : > { %3353 = vmatmul.bf16.gmra.mxu3 %v8450_v53  ;;  %v8761_v56 = vpack.c.bf16 %v3531_v44, %v3530_v36  ;;  %v3149_v51 = vadd.f32 %v3148_v60, %v9888_v39  ;;  %v9889_v60 = vld [vmem:[#allocation25_spill] sm:$0xff] }
 0x514   : > { %v3434_v23 = vrot.slane %v3376_v8, 1  ;;  %v3151_v9 = vpop.f32.mrf.mxu1 }
 0x515   : > { %v3152_v11 = vadd.f32 %v3151_v9, %v9887_v1  ;;  %v3230_v7 = vpop.f32.mrf.mxu2 }
 0x516   : > { %v3231_v31 = vadd.f32 %v3230_v7, %v3147_v0  ;;  %v3314_v19 = vpop.f32.mrf.mxu3  ;;  %v3435_v59 = vsel %vm1258_vm4, %v3432_v54, %v3434_v23 }
 0x517   : > { %3190 = vmatmul.bf16.gmra.mxu1 %v9866_v63  ;;  %v3500_v41 = vmax.f32 %v3375_v5, %v3435_v59 }
 0x518   : > { %v3315_v40 = vadd.f32 %v3314_v19, %v3231_v31 }
 0x519   : > { %v3532_v42 = vmax.f32 %v3498_v20, %v3500_v41 }
 0x51a   : > { %v3377_v2 = vmax.f32 %v3315_v40, 0.0 }
 0x51c   : > { %v3436_v53 = vrot.slane %v3377_v2, 1  ;;  %v3153_v21 = vpop.f32.mrf.mxu1 }
 0x51d   : > { %v3232_v50 = vpop.f32.mrf.mxu2  ;;  %v3154_v3 = vadd.f32 %v3153_v21, %v9889_v60 }
 0x51e   : > { %v3233_v61 = vadd.f32 %v3232_v50, %v3149_v51  ;;  %v3316_v12 = vpop.f32.mrf.mxu3  ;;  %v3437_v17 = vsel %vm1258_vm4, %v3434_v23, %v3436_v53  ;;  %v9890_v51 = vld [vmem:[#allocation3_spill] sm:$0xff] }
 0x51f   : > { %v3501_v38 = vmax.f32 %v3376_v8, %v3437_v17 }
 0x520   : > { %v3317_v27 = vadd.f32 %v3316_v12, %v3233_v61 }
 0x521   : > { %v3533_v45 = vmax.f32 %v3499_v14, %v3501_v38 }
 0x522   : > { %v3378_v26 = vmax.f32 %v3317_v27, 0.0  ;;  %3274 = vmatmul.bf16.gmra.mxu2 %v8429_v15 }
 0x523   : > { %3358 = vmatmul.bf16.gmra.mxu3 %v9870_v49  ;;  %v8770_v30 = vpack.c.bf16 %v3533_v45, %v3532_v42 }
 0x524   : > { %v3438_v58 = vrot.slane %v3378_v26, 1  ;;  %v3156_v0 = vpop.f32.mrf.mxu1 }
 0x525   : > { %v3157_v16 = vadd.f32 %v3156_v0, %v8661_v13  ;;  %v3235_v6 = vpop.f32.mrf.mxu2 }
 0x526   : > { %v3236_v47 = vadd.f32 %v3235_v6, %v3152_v11  ;;  %v3319_v35 = vpop.f32.mrf.mxu3  ;;  %v3439_v20 = vsel %vm1258_vm4, %v3436_v53, %v3438_v58 }
 0x527   : > { %v3502_v28 = vmax.f32 %v3377_v2, %v3439_v20  ;;  %3194 = vmatmul.bf16.gmra.mxu1 %v9866_v63 }
 0x528   : > { %v3320_v36 = vadd.f32 %v3319_v35, %v3236_v47 }
 0x529   : > { %v3534_v5 = vmax.f32 %v3500_v41, %v3502_v28 }
 0x52a   : > { %v3379_v54 = vmax.f32 %v3320_v36, 0.0 }
 0x52c   : > { %v3440_v32 = vrot.slane %v3379_v54, 1  ;;  %v3158_v57 = vpop.f32.mrf.mxu1 }
 0x52d   : > { %v3237_v48 = vpop.f32.mrf.mxu2  ;;  %v3159_v53 = vadd.f32 %v3158_v57, %v9890_v51 }
 0x52e   : > { %v3238_v14 = vadd.f32 %v3237_v48, %v3154_v3  ;;  %v3321_v18 = vpop.f32.mrf.mxu3  ;;  %v3441_v13 = vsel %vm1258_vm4, %v3438_v58, %v3440_v32 }
 0x52f   : > { %v3503_v44 = vmax.f32 %v3378_v26, %v3441_v13 }
 0x530   : > { %v3322_v8 = vadd.f32 %v3321_v18, %v3238_v14 }
 0x531   : > { %v3535_v23 = vmax.f32 %v3501_v38, %v3503_v44 }
 0x532   : > { %v3380_v9 = vmax.f32 %v3322_v8, 0.0  ;;  %3278 = vmatmul.bf16.gmra.mxu2 %v8429_v15 }
 0x533   : > { %v8778_v1 = vpack.c.bf16 %v3535_v23, %v3534_v5  ;;  %3362 = vmatmul.bf16.gmra.mxu3 %v9870_v49 }
 0x534   : > { %v3442_v11 = vrot.slane %v3380_v9, 1  ;;  %v3161_v7 = vpop.f32.mrf.mxu1 }
 0x535   : > { %v3240_v31 = vpop.f32.mrf.mxu2 }
 0x536   : > { %v3241_v19 = vadd.f32 %v3240_v31, %v3157_v16  ;;  %v3324_v59 = vpop.f32.mrf.mxu3  ;;  %v3443_v41 = vsel %vm1258_vm4, %v3440_v32, %v3442_v11 }
 0x537   : > { %v3504_v40 = vmax.f32 %v3379_v54, %v3443_v41  ;;  %3197 = vmatmul.bf16.gmra.mxu1 %v9866_v63  ;;  %v3162_v63 = vadd.f32 %v3161_v7, %v8670_v29 }
 0x538   : > { %v3325_v42 = vadd.f32 %v3324_v59, %v3241_v19 }
 0x539   : > { %v3536_v2 = vmax.f32 %v3502_v28, %v3504_v40 }
 0x53a   : > { %v3381_v39 = vmax.f32 %v3325_v42, 0.0 }
 0x53c   : > { %v3444_v21 = vrot.slane %v3381_v39, 1  ;;  %v3163_v50 = vpop.f32.mrf.mxu1 }
 0x53d   : > { %v3242_v61 = vpop.f32.mrf.mxu2  ;;  %v3164_v3 = vadd.f32 %v3163_v50, %v8673_v10 }
 0x53e   : > { %v3243_v12 = vadd.f32 %v3242_v61, %v3159_v53  ;;  %v3326_v17 = vpop.f32.mrf.mxu3  ;;  %v3445_v38 = vsel %vm1258_vm4, %v3442_v11, %v3444_v21 }
 0x53f   : > { %v3505_v27 = vmax.f32 %v3380_v9, %v3445_v38 }
 0x540   : > { %v3327_v45 = vadd.f32 %v3326_v17, %v3243_v12 }
 0x541   : > { %v3537_v26 = vmax.f32 %v3503_v44, %v3505_v27 }
 0x542   : > { %v3382_v58 = vmax.f32 %v3327_v45, 0.0  ;;  %3281 = vmatmul.bf16.gmra.mxu2 %v8429_v15 }
 0x543   : > { %v8786_v0 = vpack.c.bf16 %v3537_v26, %v3536_v2  ;;  %3365 = vmatmul.bf16.gmra.mxu3 %v9870_v49 }
 0x544   : > { %v3446_v16 = vrot.slane %v3382_v58, 1  ;;  %v3166_v6 = vpop.f32.mrf.mxu1 }
 0x545   : > { %v3245_v47 = vpop.f32.mrf.mxu2  ;;  %v3167_v23 = vadd.f32 %v3166_v6, %v8679_v33 }
 0x546   : > { %v3246_v35 = vadd.f32 %v3245_v47, %v3162_v63  ;;  %v3329_v20 = vpop.f32.mrf.mxu3  ;;  %v3447_v28 = vsel %vm1258_vm4, %v3444_v21, %v3446_v16 }
 0x547   : > { %v3506_v36 = vmax.f32 %v3381_v39, %v3447_v28 }
 0x548   : > { %v3330_v5 = vadd.f32 %v3329_v20, %v3246_v35 }
 0x549   : > { %v3538_v54 = vmax.f32 %v3504_v40, %v3506_v36 }
 0x54a   : > { %v3383_v60 = vmax.f32 %v3330_v5, 0.0 }
 0x54c   : > { %v3448_v15 = vrot.slane %v3383_v60, 1  ;;  %v3168_v32 = vpop.f32.mrf.mxu1 }
 0x54d   : > { %v3247_v57 = vpop.f32.mrf.mxu2  ;;  %v3169_v2 = vadd.f32 %v3168_v32, %v8682_v22 }
 0x54e   : > { %v3248_v48 = vadd.f32 %v3247_v57, %v3164_v3  ;;  %v3331_v49 = vpop.f32.mrf.mxu3  ;;  %v3449_v29 = vsel %vm1258_vm4, %v3446_v16, %v3448_v15 }
 0x54f   : > { %v3507_v14 = vmax.f32 %v3382_v58, %v3449_v29 }
 0x550   : > { %v3332_v18 = vadd.f32 %v3331_v49, %v3248_v48 }
 0x551   : > { %v3539_v13 = vmax.f32 %v3505_v27, %v3507_v14 }
 0x552   : > { %v3384_v44 = vmax.f32 %v3332_v18, 0.0 }
 0x553   : > { %v8793_v8 = vpack.c.bf16 %v3539_v13, %v3538_v54 }
 0x554   : > { %v3450_v9 = vrot.slane %v3384_v44, 1  ;;  %v3171_v11 = vpop.f32.mrf.mxu1 }
 0x555   : > { %v3250_v7 = vpop.f32.mrf.mxu2  ;;  %v3172_v45 = vadd.f32 %v3171_v11, %v8688_v52 }
 0x556   : > { %v3251_v31 = vadd.f32 %v3250_v7, %v3167_v23  ;;  %v3334_v10 = vpop.f32.mrf.mxu3  ;;  %v3451_v19 = vsel %vm1258_vm4, %v3448_v15, %v3450_v9 }
 0x557   : > { %v3508_v59 = vmax.f32 %v3383_v60, %v3451_v19 }
 0x558   : > { %v3335_v41 = vadd.f32 %v3334_v10, %v3251_v31 }
 0x559   : > { %v3540_v40 = vmax.f32 %v3506_v36, %v3508_v59 }
 0x55a   : > { %v3385_v42 = vmax.f32 %v3335_v41, 0.0 }
 0x55c   : > { %v3452_v39 = vrot.slane %v3385_v42, 1  ;;  %v3173_v51 = vpop.f32.mrf.mxu1 }
 0x55d   : > { %v3252_v53 = vpop.f32.mrf.mxu2  ;;  %v3174_v5 = vadd.f32 %v3173_v51, %v8691_v24 }
 0x55e   : > { %v3253_v21 = vadd.f32 %v3252_v53, %v3169_v2  ;;  %v3336_v50 = vpop.f32.mrf.mxu3  ;;  %v3453_v33 = vsel %vm1258_vm4, %v3450_v9, %v3452_v39 }
 0x55f   : > { %v3509_v61 = vmax.f32 %v3384_v44, %v3453_v33 }
 0x560   : > { %v3337_v12 = vadd.f32 %v3336_v50, %v3253_v21 }
 0x561   : > { %v3541_v17 = vmax.f32 %v3507_v14, %v3509_v61 }
 0x562   : > { %v3386_v38 = vmax.f32 %v3337_v12, 0.0 }
 0x563   : > { %v3566_v27 = vpack.c.bf16 %v3541_v17, %v3540_v40 }
 0x564   : > { %v3454_v26 = vrot.slane %v3386_v38, 1  ;;  %v3176_v58 = vpop.f32.mrf.mxu1 }
 0x565   : > { %v3177_v63 = vadd.f32 %v3176_v58, %v8697_v25  ;;  %v3255_v16 = vpop.f32.mrf.mxu2 }
 0x566   : > { %v3256_v22 = vadd.f32 %v3255_v16, %v3172_v45  ;;  %v3339_v6 = vpop.f32.mrf.mxu3  ;;  %v3455_v47 = vsel %vm1258_vm4, %v3452_v39, %v3454_v26 }
 0x567   : > { %v3510_v35 = vmax.f32 %v3385_v42, %v3455_v47 }
 0x568   : > { %v3340_v20 = vadd.f32 %v3339_v6, %v3256_v22  ;;  %v7258_v22 = vld [vmem:[%s9771_s13 + $0x4] sm:$0xf0] }
 0x569   : > { %v3542_v28 = vmax.f32 %v3508_v59, %v3510_v35 }
 0x56a   : > { %v3387_v36 = vmax.f32 %v3340_v20, 0.0 }
 0x56c   : > { %v3456_v54 = vrot.slane %v3387_v36, 1  ;;  %v3178_v60 = vpop.f32.mrf.mxu1 }
 0x56d   : > { %v3257_v3 = vpop.f32.mrf.mxu2  ;;  %v3179_v10 = vadd.f32 %v3178_v60, %v8700_v37 }
 0x56e   : > { %v3258_v15 = vadd.f32 %v3257_v3, %v3174_v5  ;;  %v3341_v52 = vpop.f32.mrf.mxu3  ;;  %v3457_v32 = vsel %vm1258_vm4, %v3454_v26, %v3456_v54 }
 0x56f   : > { %v3511_v57 = vmax.f32 %v3386_v38, %v3457_v32 }
 0x570   : > { %v3342_v25 = vadd.f32 %v3341_v52, %v3258_v15 }
 0x571   : > { %v3543_v48 = vmax.f32 %v3509_v61, %v3511_v57 }
 0x572   : > { %v3388_v49 = vmax.f32 %v3342_v25, 0.0 }
 0x573   : > { %v3567_v29 = vpack.c.bf16 %v3543_v48, %v3542_v28 }
 0x574   : > { %v3458_v14 = vrot.slane %v3388_v49, 1  ;;  %v3181_v18 = vpop.f32.mrf.mxu1 }
 0x575   : > { %v3260_v13 = vpop.f32.mrf.mxu2  ;;  %3621 = vmatpush.bf16.msrb.mxu0 %v3567_v29  ;;  %v3182_v33 = vadd.f32 %v3181_v18, %v8706_v34 }
 0x576   : > { %v3459_v44 = vsel %vm1258_vm4, %v3456_v54, %v3458_v14  ;;  %v3261_v23 = vadd.f32 %v3260_v13, %v3177_v63  ;;  %v3344_v24 = vpop.f32.mrf.mxu3  ;;  %v7260_v13 = vld [vmem:[%s9771_s13 + $0x14] sm:$0xf0] }
 0x577   : > { %v3512_v9 = vmax.f32 %v3387_v36, %v3459_v44 }
 0x578   : > { %v3345_v11 = vadd.f32 %v3344_v24, %v3261_v23 }
 0x579   : > { %3622 = vmatpush.bf16.msrb.mxu0 %v3566_v27  ;;  %v3544_v7 = vmax.f32 %v3510_v35, %v3512_v9 }
 0x57a   : > { %v3389_v31 = vmax.f32 %v3345_v11, 0.0 }
 0x57c   : > { %v3460_v19 = vrot.slane %v3389_v31, 1  ;;  %v3183_v59 = vpop.f32.mrf.mxu1 }
 0x57d   : > { %v3262_v41 = vpop.f32.mrf.mxu2  ;;  %3623 = vmatpush.bf16.msrb.mxu0 %v8793_v8  ;;  %v3184_v58 = vadd.f32 %v3183_v59, %v8709_v55 }
 0x57e   : > { %v3461_v40 = vsel %vm1258_vm4, %v3458_v14, %v3460_v19  ;;  %v3263_v42 = vadd.f32 %v3262_v41, %v3179_v10  ;;  %v3346_v2 = vpop.f32.mrf.mxu3 }
 0x57f   : > { %v3513_v39 = vmax.f32 %v3388_v49, %v3461_v40 }
 0x580   : > { %v3347_v51 = vadd.f32 %v3346_v2, %v3263_v42 }
 0x581   : > { %3624 = vmatpush.bf16.msrb.mxu0 %v8786_v0  ;;  %v3545_v53 = vmax.f32 %v3511_v57, %v3513_v39 }
 0x582   : > { %v3390_v21 = vmax.f32 %v3347_v51, 0.0 }
 0x583   : > { %v8809_v50 = vpack.c.bf16 %v3545_v53, %v3544_v7 }
 0x584   : > { %v3462_v37 = vrot.slane %v3390_v21, 1  ;;  %v3186_v61 = vpop.f32.mrf.mxu1 }
 0x585   : > { %v3265_v12 = vpop.f32.mrf.mxu2  ;;  %3625 = vmatpush.bf16.msrb.mxu0 %v8778_v1  ;;  %v6471_v1 = vld [vmem:[%s9771_s13] sm:$0xf]  ;;  %v3187_v5 = vadd.f32 %v3186_v61, %v8715_v43  ;;  %v6479_v43 = vld [vmem:[%s9771_s13 + $0x10] sm:$0xf] }
 0x586   : > { %v3463_v8 = vsel %vm1258_vm4, %v3460_v19, %v3462_v37  ;;  %v3266_v17 = vadd.f32 %v3265_v12, %v3182_v33  ;;  %v3349_v38 = vpop.f32.mrf.mxu3  ;;  %v6472_v55 = vor.u32 %v7258_v22, %v6471_v1  ;;  %v6480_v7 = vor.u32 %v7260_v13, %v6479_v43  ;;  %v6487_v12 = vld [vmem:[%s9771_s13 + $0x20] sm:$0xf]  ;;  %v6495_v1 = vld [vmem:[%s9771_s13 + $0x30] sm:$0xf]  ;;  %v7264_v22 = vld [vmem:[%s9771_s13 + $0x34] sm:$0xf0] }
 0x587   : > { %v3514_v27 = vmax.f32 %v3389_v31, %v3463_v8  ;;  %v7270_v43 = vld [vmem:[%s9763_s5 + $0x28] sm:$0xff] }
 0x588   : > { %v3350_v45 = vadd.f32 %v3349_v38, %v3266_v17 }
 0x589   : > { %3626 = vmatpush.bf16.msrb.mxu0 %v8770_v30  ;;  %v3546_v0 = vmax.f32 %v3512_v9, %v3514_v27 }
 0x58a   : > { %v3391_v26 = vmax.f32 %v3350_v45, 0.0 }
 0x58c   : > { %v3464_v63 = vrot.slane %v3391_v26, 1  ;;  %v3188_v16 = vpop.f32.mrf.mxu1 }
 0x58d   : > { %v3267_v34 = vpop.f32.mrf.mxu2  ;;  %3627 = vmatpush.bf16.msrb.mxu0 %v8761_v56  ;;  %v3189_v29 = vadd.f32 %v3188_v16, %v8717_v46 }
 0x58e   : > { %v3465_v6 = vsel %vm1258_vm4, %v3462_v37, %v3464_v63  ;;  %v3268_v30 = vadd.f32 %v3267_v34, %v3184_v58  ;;  %v3351_v47 = vpop.f32.mrf.mxu3 }
 0x58f   : > { %v3515_v35 = vmax.f32 %v3390_v21, %v3465_v6 }
 0x590   : > { %v3352_v20 = vadd.f32 %v3351_v47, %v3268_v30  ;;  %v6496_v47 = vor.u32 %v7264_v22, %v6495_v1  ;;  %v9893_v1 = vld [vmem:[#allocation6_spill] sm:$0xff] }
 0x591   : > { %3628 = vmatpush.bf16.msrb.mxu0 %v8753_v4  ;;  %v3547_v28 = vmax.f32 %v3513_v39, %v3515_v35 }
 0x592   : > { %v3392_v36 = vmax.f32 %v3352_v20, 0.0 }
 0x593   : > { %v3569_v56 = vpack.c.bf16 %v3547_v28, %v3546_v0  ;;  %v6473_v28 = vld [vmem:[%s9771_s13 + $0x8] sm:$0xf0] }
 0x594   : > { %v3466_v54 = vrot.slane %v3392_v36, 1  ;;  %v3191_v60 = vpop.f32.mrf.mxu1  ;;  %3629 = vmatmul.bf16.vlgmr.msrb.gmra.mxu0 %v6472_v55  ;;  %v7257_v55 = vld [vmem:[%s9771_s13 + $0x4] sm:$0xf] }
 0x595   : > { %v3270_v3 = vpop.f32.mrf.mxu2  ;;  %v3192_v19 = vadd.f32 %v3191_v60, %v8722_v62  ;;  %v7262_v62 = vld [vmem:[%s9771_s13 + $0x24] sm:$0xf0] }
 0x596   : > { %v3467_v15 = vsel %vm1258_vm4, %v3464_v63, %v3466_v54  ;;  %v3271_v52 = vadd.f32 %v3270_v3, %v3187_v5  ;;  %v3354_v32 = vpop.f32.mrf.mxu3  ;;  %v6488_v45 = vor.u32 %v7262_v62, %v6487_v12  ;;  %v6476_v5 = vor.u32 %v7257_v55, %v6473_v28  ;;  %v7261_v3 = vld [vmem:[%s9771_s13 + $0x24] sm:$0xf]  ;;  %v7291_v12 = vld [vmem:[%s9763_s5 + $0xd0] sm:$0xff] }
 0x597   : > { %v3516_v57 = vmax.f32 %v3391_v26, %v3467_v15  ;;  %v6489_v15 = vld [vmem:[%s9771_s13 + $0x28] sm:$0xf0] }
 0x598   : > { %v3355_v25 = vadd.f32 %v3354_v32, %v3271_v52  ;;  %v6492_v52 = vor.u32 %v7261_v3, %v6489_v15  ;;  %v7263_v32 = vld [vmem:[%s9771_s13 + $0x34] sm:$0xf] }
 0x599   : > { %v3548_v48 = vmax.f32 %v3514_v27, %v3516_v57 }
 0x59a   : > { %v3393_v49 = vmax.f32 %v3355_v25, 0.0 }
 0x59c   : > { %v3468_v4 = vrot.slane %v3393_v49, 1  ;;  %v3193_v14 = vpop.f32.mrf.mxu1 }
 0x59d   : > { %v3272_v18 = vpop.f32.mrf.mxu2 }
 0x59e   : > { %v3469_v44 = vsel %vm1258_vm4, %v3466_v54, %v3468_v4  ;;  %v3273_v23 = vadd.f32 %v3272_v18, %v3189_v29  ;;  %v3356_v24 = vpop.f32.mrf.mxu3  ;;  %v6481_v54 = vld [vmem:[%s9771_s13 + $0x18] sm:$0xf0]  ;;  %v7271_v18 = vld [vmem:[%s9763_s5 + $0x30] sm:$0xff] }
 0x59f   : > { %v3517_v9 = vmax.f32 %v3392_v36, %v3469_v44  ;;  %v7269_v44 = vld [vmem:[%s9763_s5 + $0x20] sm:$0xff] }
 0x5a0   : > { %v3357_v11 = vadd.f32 %v3356_v24, %v3273_v23  ;;  %v7268_v24 = vld [vmem:[%s9763_s5 + $0x18] sm:$0xff] }
 0x5a1   : > { %v3549_v31 = vmax.f32 %v3515_v35, %v3517_v9 }
 0x5a2   : > { %v3394_v46 = vmax.f32 %v3357_v11, 0.0  ;;  %v7267_v11 = vld [vmem:[%s9763_s5 + $0x10] sm:$0xff] }
 0x5a3   : > { %v3570_v10 = vpack.c.bf16 %v3549_v31, %v3548_v48 }
 0x5a4   : > { %v3520_v59 = vrot.slane %v3394_v46, 1  ;;  %3634 = vmatmul.bf16.gmra.mxu0 %v6480_v7  ;;  %v3195_v41 = vpop.f32.mrf.mxu1  ;;  %v7288_v7 = vld [vmem:[%s9763_s5 + $0xb8] sm:$0xff] }
 0x5a5   : > { %v3275_v40 = vpop.f32.mrf.mxu2  ;;  %4758 = vmatpush.bf16.msrb.mxu1 %v7288_v7  ;;  %v7265_v41 = vld [vmem:[%s9763_s5] sm:$0xff] }
 0x5a6   : > { %v3521_v42 = vsel %vm1258_vm4, %v3468_v4, %v3520_v59  ;;  %v3276_v2 = vadd.f32 %v3275_v40, %v3192_v19  ;;  %v3359_v39 = vpop.f32.mrf.mxu3  ;;  %v7272_v4 = vld [vmem:[%s9763_s5 + $0x38] sm:$0xff]  ;;  %v7287_v19 = vld [vmem:[%s9763_s5 + $0xb0] sm:$0xff] }
 0x5a7   : > { %v3526_v51 = vmax.f32 %v3393_v49, %v3521_v42  ;;  %v7304_v40 = vld [vmem:[%s9763_s5 + $0x138] sm:$0xff]  ;;  %v7286_v42 = vld [vmem:[%s9763_s5 + $0xa8] sm:$0xff] }
 0x5a8   : > { %v3360_v53 = vadd.f32 %v3359_v39, %v3276_v2  ;;  %v7293_v39 = vld [vmem:[%s9763_s5 + $0xe0] sm:$0xff]  ;;  %4812 = vmatpush.bf16.msrb.mxu3 %v7304_v40 }
 0x5a9   : > { %v3550_v21 = vmax.f32 %v3516_v57, %v3526_v51  ;;  %v6497_v57 = vld [vmem:[%s9771_s13 + $0x38] sm:$0xf0]  ;;  %4759 = vmatpush.bf16.msrb.mxu1 %v7287_v19  ;;  %v7303_v51 = vld [vmem:[%s9763_s5 + $0x130] sm:$0xff] }
 0x5aa   : > { %v3395_v33 = vmax.f32 %v3360_v53, 0.0  ;;  %v6500_v25 = vor.u32 %v7263_v32, %v6497_v57  ;;  %v7285_v53 = vld [vmem:[%s9763_s5 + $0xa0] sm:$0xff] }
 0x5ac   : > { %v3522_v37 = vrot.slane %v3395_v33, 1  ;;  %v3196_v61 = vpop.f32.mrf.mxu1  ;;  %4813 = vmatpush.bf16.msrb.mxu3 %v7303_v51  ;;  %v7302_v33 = vld [vmem:[%s9763_s5 + $0x128] sm:$0xff] }
 0x5ad   : > { %v3277_v8 = vpop.f32.mrf.mxu2  ;;  %4760 = vmatpush.bf16.msrb.mxu1 %v7286_v42 }
 0x5ae   : > { %v3523_v17 = vsel %vm1258_vm4, %v3520_v59, %v3522_v37  ;;  %v3361_v38 = vpop.f32.mrf.mxu3  ;;  %v7294_v59 = vld [vmem:[%s9763_s5 + $0xe8] sm:$0xff]  ;;  %v7284_v37 = vld [vmem:[%s9763_s5 + $0x98] sm:$0xff] }
 0x5af   : > { %v3527_v27 = vmax.f32 %v3394_v46, %v3523_v17  ;;  %v7295_v46 = vld [vmem:[%s9763_s5 + $0xf0] sm:$0xff]  ;;  %v7301_v17 = vld [vmem:[%s9763_s5 + $0x120] sm:$0xff] }
 0x5b0   : > { %4814 = vmatpush.bf16.msrb.mxu3 %v7302_v33  ;;  %v7283_v38 = vld [vmem:[%s9763_s5 + $0x90] sm:$0xff]  ;;  %v9894_v33 = vld [vmem:[#allocation7_spill] sm:$0xff] }
 0x5b1   : > { %v3551_v0 = vmax.f32 %v3517_v9, %v3527_v27  ;;  %v7296_v9 = vld [vmem:[%s9763_s5 + $0xf8] sm:$0xff]  ;;  %4761 = vmatpush.bf16.msrb.mxu1 %v7285_v53 }
 0x5b2   : > { %4785 = vmatpush.bf16.msrb.mxu2 %v7296_v9 }
 0x5b3   : > { %v3571_v26 = vpack.c.bf16 %v3551_v0, %v3550_v21  ;;  %v7292_v21 = vld [vmem:[%s9763_s5 + $0xd8] sm:$0xff] }
 0x5b4   : > { %3639 = vmatmul.bf16.gmra.mxu0 %v6488_v45  ;;  %v3198_v58 = vpop.f32.mrf.mxu1  ;;  %v7290_v45 = vld [vmem:[%s9763_s5 + $0xc8] sm:$0xff]  ;;  %v9891_v0 = vld [vmem:[#allocation5_spill] sm:$0xff]  ;;  %4815 = vmatpush.bf16.msrb.mxu3 %v7301_v17 }
 0x5b5   : > { %3654 = vmatpush.bf16.msra.mxu0 %v3571_v26  ;;  %v3279_v63 = vpop.f32.mrf.mxu2  ;;  %4762 = vmatpush.bf16.msrb.mxu1 %v7284_v37  ;;  %v9892_v58 = vmov 0.0  }
 0x5b6   : > { %v3363_v16 = vpop.f32.mrf.mxu3  ;;  %4786 = vmatpush.bf16.msrb.mxu2 %v7295_v46 }
 0x5b7   : > { %v7300_v16 = vld [vmem:[%s9763_s5 + $0x118] sm:$0xff] }
 0x5b8   : > { %4816 = vmatpush.bf16.msrb.mxu3 %v7300_v16 }
 0x5b9   : > { %3655 = vmatpush.bf16.msra.mxu0 %v3570_v10  ;;  %v7266_v10 = vld [vmem:[%s9763_s5 + $0x8] sm:$0xff]  ;;  %4763 = vmatpush.bf16.msrb.mxu1 %v7283_v38 }
 0x5ba   : > { %4787 = vmatpush.bf16.msrb.mxu2 %v7294_v59 }
 0x5bc   : > { %v3199_v34 = vpop.f32.mrf.mxu1 }
 0x5bd   : > { %3656 = vmatpush.bf16.msra.mxu0 %v3569_v56  ;;  %v3280_v6 = vpop.f32.mrf.mxu2  ;;  %v7282_v34 = vld [vmem:[%s9763_s5 + $0x88] sm:$0xff] }
 0x5be   : > { %v3364_v30 = vpop.f32.mrf.mxu3  ;;  %4788 = vmatpush.bf16.msrb.mxu2 %v7293_v39  ;;  %4764 = vmatpush.bf16.msrb.mxu1 %v7282_v34 }
 0x5c1   : > { %3657 = vmatpush.bf16.msra.mxu0 %v8809_v50  ;;  %v7259_v50 = vld [vmem:[%s9771_s13 + $0x14] sm:$0xf] }
 0x5c2   : > { %v6484_v60 = vor.u32 %v7259_v50, %v6481_v54  ;;  %4789 = vmatpush.bf16.msrb.mxu2 %v7292_v21  ;;  %v7299_v50 = vld [vmem:[%s9763_s5 + $0x110] sm:$0xff]  ;;  %v7281_v54 = vld [vmem:[%s9763_s5 + $0x80] sm:$0xff] }
 0x5c3   : > { %4817 = vmatpush.bf16.msrb.mxu3 %v7299_v50  ;;  %4765 = vmatpush.bf16.msrb.mxu1 %v7281_v54 }
 0x5c4   : > { %3644 = vmatmul.bf16.gmra.mxu0 %v6496_v47  ;;  %v7289_v47 = vld [vmem:[%s9763_s5 + $0xc0] sm:$0xff] }
 0x5c5   : > { %v3282_v35 = vpop.f32.mrf.mxu2  ;;  %4704 = vmatpush.bf16.msrb.mxu0 %v7272_v4 }
 0x5c6   : > { %v3366_v20 = vpop.f32.mrf.mxu3  ;;  %4790 = vmatpush.bf16.msrb.mxu2 %v7291_v12 }
 0x5c9   : > { %4705 = vmatpush.bf16.msrb.mxu0 %v7271_v18 }
 0x5ca   : > { %4791 = vmatpush.bf16.msrb.mxu2 %v7290_v45 }
 0x5cd   : > { %v3283_v36 = vpop.f32.mrf.mxu2  ;;  %4706 = vmatpush.bf16.msrb.mxu0 %v7270_v43 }
 0x5ce   : > { %v3367_v56 = vpop.f32.mrf.mxu3  ;;  %4792 = vmatpush.bf16.msrb.mxu2 %v7289_v47 }
 0x5d1   : > { %4707 = vmatpush.bf16.msrb.mxu0 %v7269_v44  ;;  %v7298_v44 = vld [vmem:[%s9763_s5 + $0x108] sm:$0xff] }
 0x5d2   : > { %4818 = vmatpush.bf16.msrb.mxu3 %v7298_v44 }
 0x5d4   : > { %6501 = vmatmul.msk.bf16.vlgmr.msra.gmra.mxu0 %vm3608_vm7, %v6476_v5 }
 0x5d5   : > { %4708 = vmatpush.bf16.msrb.mxu0 %v7268_v24 }
 0x5d9   : > { %4709 = vmatpush.bf16.msrb.mxu0 %v7267_v11 }
 0x5dd   : > { %4710 = vmatpush.bf16.msrb.mxu0 %v7266_v10 }
 0x5e1   : > { %4711 = vmatpush.bf16.msrb.mxu0 %v7265_v41 }
 0x5e4   : > { %6502 = vmatmul.msk.bf16.gmra.mxu0 %vm3608_vm7, %v6484_v60 }
 0x5f4   : > { %6503 = vmatmul.msk.bf16.gmra.mxu0 %vm3608_vm7, %v6492_v52 }
 0x604   : > { %6504 = vmatmul.msk.bf16.gmra.mxu0 %vm3608_vm7, %v6500_v25 }
 0x611   : > { %v3630_v48 = vpop.f32.mrf.mxu0 }
 0x619   : > { %v8875_v49 = vpop.f32.mrf.mxu0 }
 0x621   : > { %v8877_v29 = vpop.f32.mrf.mxu0 }
 0x629   : > { %v8882_v14 = vpop.f32.mrf.mxu0 }
 0x631   : > { %v8890_v13 = vpop.f32.mrf.mxu0 }
 0x639   : > { %v8895_v23 = vpop.f32.mrf.mxu0 }
 0x641   : > { %v8909_v31 = vpop.f32.mrf.mxu0 }
 0x649   : > { %v8932_v2 = vpop.f32.mrf.mxu0 }
 0x651   : > { %v3659_v61 = vpop.f32.mrf.mxu0 }
 0x652   : > { %v3660_v62 = vadd.f32 %v3659_v61, %v3630_v48  ;;  %v7280_v61 = vld [vmem:[%s9763_s5 + $0x78] sm:$0xff] }
 0x653   : > { %4731 = vmatpush.bf16.msra.mxu0 %v7280_v61 }
 0x654   : > { %v3686_v8 = vrot.slane %v3660_v62, 1  ;;  %v3709_v27 = vrot.slane %v3660_v62, 2  ;;  %v3747_v63 = vpack.c.bf16 %v3660_v62, %v9892_v58  ;;  %v7279_v58 = vld [vmem:[%s9763_s5 + $0x70] sm:$0xff] }
 0x656   : > { %v3687_v26 = vsel %vm1258_vm4, %v9891_v0, %v3686_v8  ;;  %v3710_v22 = vsel %vm1389_vm5, %v9893_v1, %v3709_v27  ;;  %v3972_v20 = vshrl.u32 %v3747_v63, 16  ;;  %v3975_v55 = vshll.u32 %v3747_v63, 16 }
 0x657   : > { %v3745_v6 = vpack.c.bf16 %v3687_v26, %v9891_v0  ;;  %v3746_v28 = vpack.c.bf16 %v3710_v22, %v9893_v1  ;;  %4732 = vmatpush.bf16.msra.mxu0 %v7279_v58 }
 0x658   : > { %v8992_v25 = vrot.slane %v3972_v20, 3  ;;  %v8994_v48 = vrot.slane %v3975_v55, 4 }
 0x659   : > { %v3661_v30 = vpop.f32.mrf.mxu0  ;;  %v3938_v60 = vshrl.u32 %v3745_v6, 16  ;;  %v3941_v3 = vshll.u32 %v3745_v6, 16  ;;  %v3955_v24 = vshrl.u32 %v3746_v28, 16  ;;  %v3958_v10 = vshll.u32 %v3746_v28, 16 }
 0x65a   : > { %v3662_v35 = vadd.f32 %v3661_v30, %v8875_v49  ;;  %v3978_v41 = vor.u32 %v8994_v48, %v8992_v25 }
 0x65b   : > { %v8999_v11 = vrot.slane %v3938_v60, 3  ;;  %v9001_v7 = vrot.slane %v3941_v3, 4  ;;  %v3960_v17 = vrot.slane %v3958_v10, 4 }
 0x65c   : > { %v8981_v36 = vrot.slane %v3662_v35, 1  ;;  %v3711_v56 = vrot.slane %v3662_v35, 2  ;;  %v3750_v5 = vpack.c.bf16 %v3662_v35, %v3660_v62 }
 0x65d   : > { %v3944_v12 = vor.u32 %v9001_v7, %v8999_v11 }
 0x65e   : > { %v3689_v15 = vsel %vm1258_vm4, %v3686_v8, %v8981_v36  ;;  %v3712_v52 = vsel %vm1389_vm5, %v3709_v27, %v3711_v56  ;;  %v3929_v32 = vshrl.u32 %v3750_v5, 16  ;;  %v3932_v57 = vshll.u32 %v3750_v5, 16 }
 0x65f   : > { %v3748_v49 = vpack.c.bf16 %v3689_v15, %v3686_v8  ;;  %v3749_v4 = vpack.c.bf16 %v3712_v52, %v3709_v27  ;;  %v3957_v8 = vrot.slane %v3955_v24, 3 }
 0x660   : > { %v3931_v18 = vrot.slane %v3929_v32, 3  ;;  %v3934_v43 = vrot.slane %v3932_v57, 4 }
 0x661   : > { %v3664_v9 = vpop.f32.mrf.mxu0  ;;  %v3989_v46 = vshrl.u32 %v3748_v49, 16  ;;  %v3992_v40 = vshll.u32 %v3748_v49, 16  ;;  %v4006_v42 = vshrl.u32 %v3749_v4, 16  ;;  %v4009_v39 = vshll.u32 %v3749_v4, 16 }
 0x662   : > { %v3665_v19 = vadd.f32 %v3664_v9, %v8877_v29  ;;  %v9004_v59 = vor.u32 %v3934_v43, %v3931_v18  ;;  %v7297_v29 = vld [vmem:[%s9763_s5 + $0x100] sm:$0xff]  ;;  %v3961_v3 = vor.u32 %v3960_v17, %v3957_v8 }
 0x663   : > { %v9019_v62 = vrot.slane %v3989_v46, 3  ;;  %4819 = vmatpush.bf16.msrb.mxu3 %v7297_v29  ;;  %v9027_v16 = vrot.slane %v3992_v40, 4  ;;  %v9031_v47 = vrot.slane %v4006_v42, 3  ;;  %v7277_v46 = vld [vmem:[%s9763_s5 + $0x60] sm:$0xff] }
 0x664   : > { %v3690_v51 = vrot.slane %v3665_v19, 1  ;;  %v3713_v53 = vrot.slane %v3665_v19, 2  ;;  %v3755_v21 = vpack.c.bf16 %v3665_v19, %v3662_v35  ;;  %v3936_v37 = vsel %vm1674_vm3, %v9894_v33, %v9004_v59 }
 0x665   : > { %4712 = vmatmul.bf16.vlgmr.msrb.gmra.mxu0 %v3936_v37  ;;  %v9033_v35 = vrot.slane %v4009_v39, 4  ;;  %v3995_v18 = vor.u32 %v9027_v16, %v9019_v62 }
 0x666   : > { %v3691_v38 = vsel %vm1258_vm4, %v8981_v36, %v3690_v51  ;;  %v3714_v27 = vsel %vm1389_vm5, %v3711_v56, %v3713_v53  ;;  %v3980_v45 = vshrl.u32 %v3755_v21, 16  ;;  %v3983_v26 = vshll.u32 %v3755_v21, 16 }
 0x667   : > { %v3753_v63 = vpack.c.bf16 %v3691_v38, %v3689_v15  ;;  %v3754_v34 = vpack.c.bf16 %v3714_v27, %v3712_v52  ;;  %v9029_v22 = vpack.c.bf16 %v3714_v27, %v3711_v56  ;;  %v3751_v56 = vpack.c.bf16 %v3691_v38, %v8981_v36  ;;  %v7278_v15 = vld [vmem:[%s9763_s5 + $0x68] sm:$0xff] }
 0x668   : > { %v3982_v6 = vrot.slane %v3980_v45, 3  ;;  %v3985_v30 = vrot.slane %v3983_v26, 4  ;;  %v4012_v44 = vor.u32 %v9033_v35, %v9031_v47  ;;  %4733 = vmatpush.bf16.msra.mxu0 %v7278_v15 }
 0x669   : > { %v3666_v20 = vpop.f32.mrf.mxu0  ;;  %v3946_v55 = vshrl.u32 %v3753_v63, 16  ;;  %v3949_v28 = vshll.u32 %v3753_v63, 16  ;;  %v3963_v5 = vshrl.u32 %v3754_v34, 16  ;;  %v3966_v50 = vshll.u32 %v3754_v34, 16 }
 0x66a   : > { %v9036_v54 = vadd.f32 %v3666_v20, %v8882_v14  ;;  %v9038_v60 = vor.u32 %v3985_v30, %v3982_v6  ;;  %v4035_v21 = vshll.u32 %v3751_v56, 16 }
 0x66b   : > { %v3948_v52 = vrot.slane %v3946_v55, 3  ;;  %v3951_v32 = vrot.slane %v3949_v28, 4  ;;  %v3965_v57 = vrot.slane %v3963_v5, 3  ;;  %v3968_v25 = vrot.slane %v3966_v50, 4 }
 0x66c   : > { %v3692_v48 = vrot.slane %v9036_v54, 1  ;;  %v3715_v49 = vrot.slane %v9036_v54, 2  ;;  %v3758_v14 = vpack.c.bf16 %v9036_v54, %v3665_v19  ;;  %v3987_v4 = vsel %vm1674_vm3, %v3978_v41, %v9038_v60  ;;  %4734 = vmatpush.bf16.msra.mxu0 %v7277_v46 }
 0x66d   : > { %4793 = vmatmul.bf16.vlgmr.msrb.gmra.mxu2 %v3987_v4  ;;  %v9049_v36 = vor.u32 %v3951_v32, %v3948_v52  ;;  %v9053_v43 = vor.u32 %v3968_v25, %v3965_v57  ;;  %v4037_v47 = vrot.slane %v4035_v21, 4 }
 0x66e   : > { %v3693_v24 = vsel %vm1258_vm4, %v3690_v51, %v3692_v48  ;;  %v4023_v9 = vshrl.u32 %v3758_v14, 16  ;;  %v4026_v11 = vshll.u32 %v3758_v14, 16  ;;  %v3716_v7 = vsel %vm1389_vm5, %v3713_v53, %v3715_v49 }
 0x66f   : > { %v9064_v10 = vsel %vm1674_vm3, %v3944_v12, %v9049_v36  ;;  %v3756_v19 = vpack.c.bf16 %v3693_v24, %v3691_v38  ;;  %v3970_v41 = vsel %vm1674_vm3, %v3961_v3, %v9053_v43  ;;  %v3757_v40 = vpack.c.bf16 %v3716_v7, %v3714_v27 }
 0x670   : > { %v4025_v42 = vrot.slane %v4023_v9, 3  ;;  %v4028_v39 = vrot.slane %v4026_v11, 4  ;;  %4766 = vmatmul.bf16.vlgmr.msrb.gmra.mxu1 %v3970_v41  ;;  %v4032_v51 = vshrl.u32 %v3751_v56, 16  ;;  %v4049_v12 = vshrl.u32 %v9029_v22, 16 }
 0x671   : > { %v3669_v53 = vpop.f32.mrf.mxu0  ;;  %v3997_v37 = vshrl.u32 %v3756_v19, 16  ;;  %v4000_v29 = vshll.u32 %v3756_v19, 16  ;;  %v4014_v61 = vshrl.u32 %v3757_v40, 16  ;;  %v4017_v62 = vshll.u32 %v3757_v40, 16 }
 0x672   : > { %v3670_v8 = vadd.f32 %v3669_v53, %v8890_v13  ;;  %v9069_v17 = vor.u32 %v4028_v39, %v4025_v42  ;;  %v4052_v38 = vshll.u32 %v9029_v22, 16  ;;  %v7276_v13 = vld [vmem:[%s9763_s5 + $0x58] sm:$0xff]  ;;  %v4034_v30 = vrot.slane %v4032_v51, 3 }
 0x673   : > { %v3999_v27 = vrot.slane %v3997_v37, 3  ;;  %v4002_v45 = vrot.slane %v4000_v29, 4  ;;  %v4016_v26 = vrot.slane %v4014_v61, 3  ;;  %v4019_v58 = vrot.slane %v4017_v62, 4  ;;  %4735 = vmatpush.bf16.msra.mxu0 %v7276_v13  ;;  %v7328_v51 = vld [vmem:[%s9763_s5 + $0x1f8] sm:$0xff] }
 0x674   : > { %v3694_v63 = vrot.slane %v3670_v8, 1  ;;  %v3717_v16 = vrot.slane %v3670_v8, 2  ;;  %v3761_v34 = vpack.c.bf16 %v3670_v8, %v9036_v54  ;;  %v9077_v6 = vsel %vm1674_vm3, %v9004_v59, %v9069_v17  ;;  %v7275_v59 = vld [vmem:[%s9763_s5 + $0x50] sm:$0xff]  ;;  %4893 = vmatpush.bf16.msra.mxu2 %v7328_v51 }
 0x675   : > { %4716 = vmatmul.bf16.gmra.mxu0 %v9077_v6  ;;  %v9083_v22 = vor.u32 %v4002_v45, %v3999_v27  ;;  %v9085_v35 = vor.u32 %v4019_v58, %v4016_v26  ;;  %v4051_v32 = vrot.slane %v4049_v12, 3  ;;  %v4054_v57 = vrot.slane %v4052_v38, 4  ;;  %v7320_v26 = vld [vmem:[%s9763_s5 + $0x1b8] sm:$0xff] }
 0x676   : > { %v4068_v20 = vshrl.u32 %v3761_v34, 16  ;;  %v4071_v55 = vshll.u32 %v3761_v34, 16  ;;  %v3695_v28 = vsel %vm1258_vm4, %v3692_v48, %v3694_v63  ;;  %v3718_v5 = vsel %vm1389_vm5, %v3715_v49, %v3717_v16  ;;  %4866 = vmatpush.bf16.msra.mxu1 %v7320_v26 }
 0x677   : > { %v4004_v50 = vsel %vm1674_vm3, %v3995_v18, %v9083_v22  ;;  %v3759_v54 = vpack.c.bf16 %v3695_v28, %v3693_v24  ;;  %v3760_v3 = vpack.c.bf16 %v3718_v5, %v3716_v7  ;;  %v9096_v56 = vsel %vm1674_vm3, %v4012_v44, %v9085_v35  ;;  %4736 = vmatpush.bf16.msra.mxu0 %v7275_v59  ;;  %v7274_v18 = vld [vmem:[%s9763_s5 + $0x48] sm:$0xff] }
 0x678   : > { %4820 = vmatmul.bf16.vlgmr.msrb.gmra.mxu3 %v4004_v50  ;;  %v4070_v15 = vrot.slane %v4068_v20, 3  ;;  %v4073_v52 = vrot.slane %v4071_v55, 4  ;;  %v4038_v21 = vor.u32 %v4037_v47, %v4034_v30  ;;  %v4055_v53 = vor.u32 %v4054_v57, %v4051_v32 }
 0x679   : > { %v3671_v25 = vpop.f32.mrf.mxu0  ;;  %v4040_v48 = vshrl.u32 %v3759_v54, 16  ;;  %v4043_v49 = vshll.u32 %v3759_v54, 16  ;;  %v4057_v14 = vshrl.u32 %v3760_v3, 16  ;;  %v4060_v4 = vshll.u32 %v3760_v3, 16 }
 0x67a   : > { %v3672_v9 = vadd.f32 %v3671_v25, %v8895_v23  ;;  %v9099_v11 = vor.u32 %v4073_v52, %v4070_v15 }
 0x67b   : > { %v4042_v44 = vrot.slane %v4040_v48, 3  ;;  %v4045_v24 = vrot.slane %v4043_v49, 4  ;;  %v4059_v7 = vrot.slane %v4057_v14, 3  ;;  %v4062_v46 = vrot.slane %v4060_v4, 4  ;;  %4737 = vmatpush.bf16.msra.mxu0 %v7274_v18 }
 0x67c   : > { %v3696_v19 = vrot.slane %v3672_v9, 1  ;;  %v3719_v41 = vrot.slane %v3672_v9, 2  ;;  %v3764_v40 = vpack.c.bf16 %v3672_v9, %v3670_v8  ;;  %v4075_v42 = vsel %vm1674_vm3, %v9038_v60, %v9099_v11  ;;  %v7273_v60 = vld [vmem:[%s9763_s5 + $0x40] sm:$0xff] }
 0x67d   : > { %4797 = vmatmul.bf16.gmra.mxu2 %v4075_v42  ;;  %v9107_v23 = vor.u32 %v4045_v24, %v4042_v44  ;;  %v9109_v39 = vor.u32 %v4062_v46, %v4059_v7  ;;  %v7336_v24 = vld [vmem:[%s9763_s5 + $0x238] sm:$0xff]  ;;  %v7318_v46 = vld [vmem:[%s9763_s5 + $0x1a8] sm:$0xff] }
 0x67e   : > { %v4095_v37 = vshrl.u32 %v3764_v40, 16  ;;  %v4098_v29 = vshll.u32 %v3764_v40, 16  ;;  %v3697_v61 = vsel %vm1258_vm4, %v3694_v63, %v3696_v19  ;;  %v3720_v62 = vsel %vm1389_vm5, %v3717_v16, %v3719_v41  ;;  %4920 = vmatpush.bf16.msra.mxu3 %v7336_v24 }
 0x67f   : > { %v9122_v8 = vsel %vm1674_vm3, %v9049_v36, %v9107_v23  ;;  %v3762_v12 = vpack.c.bf16 %v3697_v61, %v3695_v28  ;;  %v4066_v38 = vsel %vm1674_vm3, %v9053_v43, %v9109_v39  ;;  %v9132_v58 = vsel %vm1674_vm3, %v4038_v21, %v9107_v23  ;;  %v7327_v43 = vld [vmem:[%s9763_s5 + $0x1f0] sm:$0xff]  ;;  %4738 = vmatpush.bf16.msra.mxu0 %v7273_v60  ;;  %v7325_v21 = vld [vmem:[%s9763_s5 + $0x1e0] sm:$0xff] }
 0x680   : > { %v4097_v27 = vrot.slane %v4095_v37, 3  ;;  %v4100_v45 = vrot.slane %v4098_v29, 4  ;;  %4770 = vmatmul.bf16.gmra.mxu1 %v4066_v38  ;;  %v9136_v36 = vsel %vm1674_vm3, %v4055_v53, %v9109_v39  ;;  %v9141_v13 = vpack.c.bf16 %v3720_v62, %v3718_v5  ;;  %4894 = vmatpush.bf16.msra.mxu2 %v7327_v43 }
 0x681   : > { %v3674_v63 = vpop.f32.mrf.mxu0  ;;  %v4077_v16 = vshrl.u32 %v3762_v12, 16  ;;  %v4080_v34 = vshll.u32 %v3762_v12, 16 }
 0x682   : > { %v9143_v30 = vor.u32 %v4100_v45, %v4097_v27  ;;  %v9146_v47 = vadd.f32 %v3674_v63, %v8909_v31  ;;  %v7319_v31 = vld [vmem:[%s9763_s5 + $0x1b0] sm:$0xff]  ;;  %v4086_v15 = vshrl.u32 %v9141_v13, 16  ;;  %v4089_v52 = vshll.u32 %v9141_v13, 16  ;;  %v7317_v63 = vld [vmem:[%s9763_s5 + $0x1a0] sm:$0xff] }
 0x683   : > { %v4079_v20 = vrot.slane %v4077_v16, 3  ;;  %v4082_v55 = vrot.slane %v4080_v34, 4  ;;  %4867 = vmatpush.bf16.msra.mxu1 %v7319_v31 }
 0x684   : > { %v9151_v28 = vsel %vm1674_vm3, %v9069_v17, %v9143_v30  ;;  %v3698_v59 = vrot.slane %v9146_v47, 1  ;;  %v3721_v5 = vrot.slane %v9146_v47, 2  ;;  %v3773_v50 = vpack.c.bf16 %v9146_v47, %v9146_v47  ;;  %v7326_v17 = vld [vmem:[%s9763_s5 + $0x1e8] sm:$0xff] }
 0x685   : > { %4721 = vmatmul.bf16.gmra.mxu0 %v9151_v28  ;;  %v9161_v54 = vor.u32 %v4082_v55, %v4079_v20  ;;  %v3767_v3 = vpack.c.bf16 %v9146_v47, %v3672_v9  ;;  %4895 = vmatpush.bf16.msra.mxu2 %v7326_v17  ;;  %v4088_v16 = vrot.slane %v4086_v15, 3  ;;  %v7324_v55 = vld [vmem:[%s9763_s5 + $0x1d8] sm:$0xff] }
 0x686   : > { %v4176_v32 = vshrl.u32 %v3773_v50, 16  ;;  %v4179_v57 = vshll.u32 %v3773_v50, 16  ;;  %v3699_v25 = vsel %vm1258_vm4, %v3696_v19, %v3698_v59  ;;  %v9173_v48 = vsel %vm1389_vm5, %v3719_v41, %v3721_v5 }
 0x687   : > { %v4084_v49 = vsel %vm1674_vm3, %v9083_v22, %v9161_v54  ;;  %v4122_v14 = vshrl.u32 %v3767_v3, 16  ;;  %v4125_v4 = vshll.u32 %v3767_v3, 16  ;;  %v3765_v9 = vpack.c.bf16 %v3699_v25, %v3697_v61  ;;  %4868 = vmatpush.bf16.msra.mxu1 %v7318_v46 }
 0x688   : > { %v4178_v18 = vrot.slane %v4176_v32, 3  ;;  %v4181_v44 = vrot.slane %v4179_v57, 4  ;;  %4824 = vmatmul.bf16.gmra.mxu3 %v4084_v49  ;;  %v3766_v7 = vpack.c.bf16 %v9173_v48, %v3720_v62  ;;  %v3774_v19 = vpack.c.bf16 %v3698_v59, %v3698_v59 }
 0x689   : > { %v3676_v41 = vpop.f32.mrf.mxu0  ;;  %v4124_v22 = vrot.slane %v4122_v14, 3  ;;  %v4127_v40 = vrot.slane %v4125_v4, 4  ;;  %v4104_v42 = vshrl.u32 %v3765_v9, 16  ;;  %v4107_v51 = vshll.u32 %v3765_v9, 16  ;;  %4896 = vmatpush.bf16.msra.mxu2 %v7325_v21 }
 0x68a   : > { %v4182_v53 = vor.u32 %v4181_v44, %v4178_v18  ;;  %v9189_v37 = vadd.f32 %v3676_v41, %v8932_v2  ;;  %v4113_v29 = vshrl.u32 %v3766_v7, 16  ;;  %v4116_v61 = vshll.u32 %v3766_v7, 16  ;;  %v7335_v2 = vld [vmem:[%s9763_s5 + $0x230] sm:$0xff] }
 0x68b   : > { %v9191_v62 = vor.u32 %v4127_v40, %v4124_v22  ;;  %v4106_v60 = vrot.slane %v4104_v42, 3  ;;  %v4109_v12 = vrot.slane %v4107_v51, 4  ;;  %v4185_v38 = vshrl.u32 %v3774_v19, 16  ;;  %4921 = vmatpush.bf16.msra.mxu3 %v7335_v2  ;;  %4869 = vmatpush.bf16.msra.mxu1 %v7317_v63  ;;  %v7323_v44 = vld [vmem:[%s9763_s5 + $0x1d0] sm:$0xff]  ;;  %v7333_v22 = vld [vmem:[%s9763_s5 + $0x220] sm:$0xff] }
 0x68c   : > { %v4183_v27 = vsel %vm1674_vm3, %v9143_v30, %v4182_v53  ;;  %v3723_v45 = vrot.slane %v9189_v37, 2  ;;  %v3733_v26 = vrot.slane %v9189_v37, 1  ;;  %v3776_v34 = vpack.c.bf16 %v9189_v37, %v9189_v37 }
 0x68d   : > { %v4129_v43 = vsel %vm1674_vm3, %v9099_v11, %v9191_v62  ;;  %v9208_v13 = vor.u32 %v4109_v12, %v4106_v60  ;;  %v4115_v20 = vrot.slane %v4113_v29, 3  ;;  %v4118_v31 = vrot.slane %v4116_v61, 4  ;;  %4897 = vmatpush.bf16.msra.mxu2 %v7324_v55  ;;  %v7322_v60 = vld [vmem:[%s9763_s5 + $0x1c8] sm:$0xff] }
 0x68e   : > { %4802 = vmatmul.bf16.gmra.mxu2 %v4129_v43  ;;  %v3734_v50 = vsel %vm1258_vm4, %v3698_v59, %v3733_v26  ;;  %v4187_v3 = vrot.slane %v4185_v38, 3  ;;  %v4188_v17 = vshll.u32 %v3774_v19, 16  ;;  %v4203_v32 = vshrl.u32 %v3776_v34, 16  ;;  %v7334_v59 = vld [vmem:[%s9763_s5 + $0x228] sm:$0xff] }
 0x68f   : > { %v9217_v15 = vsel %vm1674_vm3, %v9107_v23, %v9208_v13  ;;  %v3768_v11 = vpack.c.bf16 %v3734_v50, %v3699_v25  ;;  %v4091_v57 = vrot.slane %v4089_v52, 4  ;;  %v9219_v49 = vor.u32 %v4118_v31, %v4115_v20  ;;  %v7316_v25 = vld [vmem:[%s9763_s5 + $0x198] sm:$0xff]  ;;  %4922 = vmatpush.bf16.msra.mxu3 %v7334_v59 }
 0x690   : > { %v4206_v14 = vshll.u32 %v3776_v34, 16  ;;  %v4190_v4 = vrot.slane %v4188_v17, 4  ;;  %v3724_v23 = vsel %vm1389_vm5, %v3721_v5, %v3723_v45  ;;  %v9232_v18 = vpack.c.bf16 %v3733_v26, %v3733_v26  ;;  %4870 = vmatpush.bf16.msra.mxu1 %v7316_v25 }
 0x691   : > { %v4131_v9 = vshrl.u32 %v3768_v11, 16  ;;  %v4134_v52 = vshll.u32 %v3768_v11, 16  ;;  %v9240_v24 = vsel %vm1674_vm3, %v9109_v39, %v9219_v49  ;;  %v3770_v5 = vpack.c.bf16 %v9189_v37, %v9146_v47  ;;  %4898 = vmatpush.bf16.msra.mxu2 %v7323_v44  ;;  %v7315_v47 = vld [vmem:[%s9763_s5 + $0x190] sm:$0xff] }
 0x692   : > { %v4191_v7 = vor.u32 %v4190_v4, %v4187_v3  ;;  %4775 = vmatmul.bf16.gmra.mxu1 %v9240_v24  ;;  %v3775_v41 = vpack.c.bf16 %v3724_v23, %v3724_v23  ;;  %v4205_v40 = vrot.slane %v4203_v32, 3  ;;  %v4208_v42 = vrot.slane %v4206_v14, 4  ;;  %v7331_v4 = vld [vmem:[%s9763_s5 + $0x210] sm:$0xff] }
 0x693   : > { %v4133_v46 = vrot.slane %v4131_v9, 3  ;;  %v4136_v19 = vrot.slane %v4134_v52, 4  ;;  %v4092_v51 = vor.u32 %v4091_v57, %v4088_v16  ;;  %v4212_v53 = vshrl.u32 %v9232_v18, 16  ;;  %4923 = vmatpush.bf16.msra.mxu3 %v7333_v22 }
 0x694   : > { %v9250_v39 = vsel %vm1674_vm3, %v9208_v13, %v4191_v7  ;;  %v4194_v29 = vshrl.u32 %v3775_v41, 16  ;;  %v4197_v61 = vshll.u32 %v3775_v41, 16  ;;  %v4215_v12 = vshll.u32 %v9232_v18, 16  ;;  %4871 = vmatpush.bf16.msra.mxu1 %v7315_v47  ;;  %v7330_v47 = vld [vmem:[%s9763_s5 + $0x208] sm:$0xff] }
 0x695   : > { %4726 = vmatmul.bf16.gmra.mxu0 %v4183_v27  ;;  %v9255_v21 = vor.u32 %v4136_v19, %v4133_v46  ;;  %v9264_v38 = vsel %vm1674_vm3, %v9085_v35, %v4092_v51  ;;  %v3741_v27 = vsel %vm1258_vm4, %v3733_v26, %v9891_v0  ;;  %v3769_v2 = vpack.c.bf16 %v3724_v23, %v9173_v48  ;;  %v7332_v35 = vld [vmem:[%s9763_s5 + $0x218] sm:$0xff]  ;;  %v7314_v0 = vld [vmem:[%s9763_s5 + $0x188] sm:$0xff] }
 0x696   : > { %v4196_v16 = vrot.slane %v4194_v29, 3  ;;  %v4199_v34 = vrot.slane %v4197_v61, 4  ;;  %4899 = vmatpush.bf16.msra.mxu2 %v7322_v60  ;;  %v3771_v43 = vpack.c.bf16 %v3741_v27, %v3734_v50  ;;  %v4209_v20 = vor.u32 %v4208_v42, %v4205_v40  ;;  %v7321_v50 = vld [vmem:[%s9763_s5 + $0x1c0] sm:$0xff]  ;;  %v7310_v60 = vld [vmem:[%s9763_s5 + $0x168] sm:$0xff] }
 0x697   : > { %v4138_v63 = vsel %vm1674_vm3, %v9161_v54, %v9255_v21  ;;  %v4140_v48 = vshrl.u32 %v3769_v2, 16  ;;  %v4143_v26 = vshll.u32 %v3769_v2, 16  ;;  %v9282_v54 = vsel %vm1389_vm5, %v3723_v45, %v9893_v1  ;;  %4924 = vmatpush.bf16.msra.mxu3 %v7332_v35 }
 0x698   : > { %4829 = vmatmul.bf16.gmra.mxu3 %v4138_v63  ;;  %v4200_v55 = vor.u32 %v4199_v34, %v4196_v16  ;;  %v4158_v31 = vshrl.u32 %v3771_v43, 16  ;;  %v4161_v3 = vshll.u32 %v3771_v43, 16  ;;  %v3772_v17 = vpack.c.bf16 %v9282_v54, %v3724_v23  ;;  %4872 = vmatpush.bf16.msra.mxu1 %v7314_v0  ;;  %v7313_v23 = vld [vmem:[%s9763_s5 + $0x180] sm:$0xff] }
 0x699   : > { %v4142_v11 = vrot.slane %v4140_v48, 3  ;;  %v4145_v32 = vrot.slane %v4143_v26, 4  ;;  %v4149_v57 = vshrl.u32 %v3770_v5, 16  ;;  %v4152_v59 = vshll.u32 %v3770_v5, 16 }
 0x69a   : > { %v4201_v37 = vsel %vm1674_vm3, %v9219_v49, %v4200_v55  ;;  %4900 = vmatpush.bf16.msra.mxu2 %v7321_v50  ;;  %v4160_v1 = vrot.slane %v4158_v31, 3  ;;  %v4163_v45 = vrot.slane %v4161_v3, 4  ;;  %v4167_v14 = vshrl.u32 %v3772_v17, 16 }
 0x69b   : > { %v9296_v25 = vor.u32 %v4145_v32, %v4142_v11  ;;  %v4170_v9 = vshll.u32 %v3772_v17, 16  ;;  %v4151_v52 = vrot.slane %v4149_v57, 3  ;;  %v4154_v18 = vrot.slane %v4152_v59, 4  ;;  %4925 = vmatpush.bf16.msra.mxu3 %v7331_v4 }
 0x69c   : > { %v4210_v44 = vsel %vm1674_vm3, %v9191_v62, %v4209_v20  ;;  %v4164_v7 = vor.u32 %v4163_v45, %v4160_v1  ;;  %v4169_v5 = vrot.slane %v4167_v14, 3  ;;  %v4214_v22 = vrot.slane %v4212_v53, 3  ;;  %4873 = vmatpush.bf16.msra.mxu1 %v7313_v23  ;;  %v7329_v53 = vld [vmem:[%s9763_s5 + $0x200] sm:$0xff] }
 0x69d   : > { %v9302_v46 = vsel %vm1674_vm3, %v4092_v51, %v9296_v25  ;;  %v4172_v19 = vrot.slane %v4170_v9, 4  ;;  %v4155_v41 = vor.u32 %v4154_v18, %v4151_v52  ;;  %v4217_v40 = vrot.slane %v4215_v12, 4  ;;  %v7307_v12 = vld [vmem:[%s9763_s5 + $0x150] sm:$0xff] }
 0x69e   : > { %4807 = vmatmul.bf16.gmra.mxu2 %v4210_v44  ;;  %v4165_v42 = vsel %vm1674_vm3, %v9208_v13, %v4164_v7  ;;  %v7312_v13 = vld [vmem:[%s9763_s5 + $0x178] sm:$0xff] }
 0x69f   : > { %v4173_v62 = vor.u32 %v4172_v19, %v4169_v5  ;;  %v4156_v29 = vsel %vm1674_vm3, %v9143_v30, %v4155_v41  ;;  %4926 = vmatpush.bf16.msra.mxu3 %v7330_v47  ;;  %v4218_v61 = vor.u32 %v4217_v40, %v4214_v22  ;;  %4839 = vmatpush.bf16.msrb.mxu0 %v7312_v13  ;;  %v7311_v30 = vld [vmem:[%s9763_s5 + $0x170] sm:$0xff]  ;;  %v9382_v5 = vld [vmem:[%s9764_s6] ss:$0 sm:$0xff] }
 0x6a0   : > { %v4229_v2 = vsel %vm1674_vm3, %v4155_v41, %v9894_v33 }
 0x6a1   : > { %v4174_v51 = vsel %vm1674_vm3, %v9219_v49, %v4173_v62  ;;  %v4219_v49 = vsel %vm1674_vm3, %v9255_v21, %v4218_v61  ;;  %v7308_v21 = vld [vmem:[%s9763_s5 + $0x158] sm:$0xff] }
 0x6a2   : > { %4780 = vmatmul.bf16.gmra.mxu1 %v4201_v37 }
 0x6a3   : > { %4927 = vmatpush.bf16.msra.mxu3 %v7329_v53  ;;  %4840 = vmatpush.bf16.msrb.mxu0 %v7311_v30 }
 0x6a5   : > { %4739 = vmatmul.bf16.vlgmr.msra.gmra.mxu0 %v9064_v10  ;;  %v7309_v10 = vld [vmem:[%s9763_s5 + $0x160] sm:$0xff] }
 0x6a7   : > { %4841 = vmatpush.bf16.msrb.mxu0 %v7310_v60 }
 0x6a8   : > { %4834 = vmatmul.bf16.gmra.mxu3 %v4219_v49 }
 0x6ab   : > { %4842 = vmatpush.bf16.msrb.mxu0 %v7309_v10  ;;  %v7344_v10 = vld [vmem:[%s9765_s7 + $0x38] sm:$0xff] }
 0x6ae   : > { %4901 = vmatmul.bf16.vlgmr.msra.gmra.mxu2 %v9132_v58  ;;  %v7306_v58 = vld [vmem:[%s9763_s5 + $0x148] sm:$0xff] }
 0x6af   : > { %4843 = vmatpush.bf16.msrb.mxu0 %v7308_v21 }
 0x6b2   : > { %4874 = vmatmul.bf16.vlgmr.msra.gmra.mxu1 %v9077_v6  ;;  %v7305_v6 = vld [vmem:[%s9763_s5 + $0x140] sm:$0xff] }
 0x6b3   : > { %4844 = vmatpush.bf16.msrb.mxu0 %v7307_v12 }
 0x6b5   : > { %4743 = vmatmul.bf16.gmra.mxu0 %v9122_v8  ;;  %v9895_v8 = vld [vmem:[#allocation8_spill] sm:$0xff] }
 0x6b7   : > { %4845 = vmatpush.bf16.msrb.mxu0 %v7306_v58 }
 0x6b8   : > { %4928 = vmatmul.bf16.vlgmr.msra.gmra.mxu3 %v9136_v36  ;;  %v4238_v36 = vsel %vm1674_vm3, %v4164_v7, %v9895_v8 }
 0x6bb   : > { %4846 = vmatpush.bf16.msrb.mxu0 %v7305_v6 }
 0x6be   : > { %4905 = vmatmul.bf16.gmra.mxu2 %v9217_v15 }
 0x6bf   : > { %5650 = vmatpush.bf16.msra.mxu0 %v7344_v10  ;;  %v7375_v10 = vld [vmem:[%s9765_s7 + $0x130] sm:$0xff] }
 0x6c2   : > { %4878 = vmatmul.bf16.gmra.mxu1 %v9151_v28  ;;  %v9896_v28 = vld [vmem:[#allocation9_spill] sm:$0xff] }
 0x6c5   : > { %4748 = vmatmul.bf16.gmra.mxu0 %v9217_v15  ;;  %v4239_v15 = vsel %vm1674_vm3, %v4173_v62, %v9896_v28 }
 0x6c8   : > { %4932 = vmatmul.bf16.gmra.mxu3 %v9240_v24 }
 0x6ce   : > { %4910 = vmatmul.bf16.gmra.mxu2 %v4165_v42 }
 0x6d2   : > { %4883 = vmatmul.bf16.gmra.mxu1 %v4156_v29 }
 0x6d5   : > { %4753 = vmatmul.bf16.gmra.mxu0 %v9250_v39 }
 0x6d8   : > { %4937 = vmatmul.bf16.gmra.mxu3 %v4174_v51 }
 0x6de   : > { %4915 = vmatmul.bf16.gmra.mxu2 %v4238_v36  ;;  %v7343_v36 = vld [vmem:[%s9765_s7 + $0x30] sm:$0xff] }
 0x6df   : > { %5651 = vmatpush.bf16.msra.mxu0 %v7343_v36 }
 0x6e2   : > { %v4713_v27 = vpop.f32.mrf.mxu0  ;;  %4888 = vmatmul.bf16.gmra.mxu1 %v4229_v2 }
 0x6e5   : > { %4847 = vmatmul.bf16.vlgmr.msrb.gmra.mxu0 %v9096_v56  ;;  %v3778_v56 = vpack.c.bf16 %v9282_v54, %v9282_v54 }
 0x6e7   : > { %v4221_v50 = vshrl.u32 %v3778_v56, 16  ;;  %v4224_v31 = vshll.u32 %v3778_v56, 16 }
 0x6e8   : > { %4942 = vmatmul.bf16.gmra.mxu3 %v4239_v15  ;;  %v7342_v15 = vld [vmem:[%s9765_s7 + $0x28] sm:$0xff] }
 0x6e9   : > { %v4223_v11 = vrot.slane %v4221_v50, 3  ;;  %v4226_v32 = vrot.slane %v4224_v31, 4  ;;  %5652 = vmatpush.bf16.msra.mxu0 %v7342_v15  ;;  %v7365_v15 = vld [vmem:[%s9765_s7 + $0xe0] sm:$0xff] }
 0x6ea   : > { %v4714_v24 = vpop.f32.mrf.mxu0 }
 0x6eb   : > { %v4227_v57 = vor.u32 %v4226_v32, %v4223_v11  ;;  %v7360_v11 = vld [vmem:[%s9765_s7 + $0xb8] sm:$0xff]  ;;  %v7339_v32 = vld [vmem:[%s9765_s7 + $0x10] sm:$0xff] }
 0x6ec   : > { %5676 = vmatpush.bf16.msrb.mxu2 %v7360_v11 }
 0x6ed   : > { %v4767_v63 = vpop.f32.mrf.mxu1  ;;  %v4228_v54 = vsel %vm1674_vm3, %v9296_v25, %v4227_v57  ;;  %v7352_v57 = vld [vmem:[%s9765_s7 + $0x78] sm:$0xff] }
 0x6ee   : > { %5663 = vmatpush.bf16.msrb.mxu1 %v7352_v57  ;;  %v7354_v57 = vld [vmem:[%s9765_s7 + $0x88] sm:$0xff] }
 0x6f0   : > { %v4794_v16 = vpop.f32.mrf.mxu2 }
 0x6f2   : > { %v4717_v39 = vpop.f32.mrf.mxu0 }
 0x6f3   : > { %v4718_v29 = vadd.f32 %v9382_v5, %v4717_v39 }
 0x6f5   : > { %4851 = vmatmul.bf16.gmra.mxu0 %v9264_v38  ;;  %v4768_v34 = vpop.f32.mrf.mxu1 }
 0x6f8   : > { %v4795_v43 = vpop.f32.mrf.mxu2 }
 0x6fa   : > { %v4719_v20 = vpop.f32.mrf.mxu0 }
 0x6fb   : > { %v4821_v35 = vpop.f32.mrf.mxu3  ;;  %v4720_v12 = vadd.f32 %v9382_v5, %v4719_v20  ;;  %v7341_v20 = vld [vmem:[%s9765_s7 + $0x20] sm:$0xff] }
 0x6fc   : > { %5653 = vmatpush.bf16.msra.mxu0 %v7341_v20  ;;  %v7355_v20 = vld [vmem:[%s9765_s7 + $0x90] sm:$0xff] }
 0x6fd   : > { %v4771_v0 = vpop.f32.mrf.mxu1 }
 0x700   : > { %v4798_v48 = vpop.f32.mrf.mxu2 }
 0x702   : > { %v4722_v33 = vpop.f32.mrf.mxu0 }
 0x703   : > { %v4822_v26 = vpop.f32.mrf.mxu3  ;;  %v4723_v16 = vadd.f32 %v9382_v5, %v4722_v33 }
 0x705   : > { %4856 = vmatmul.bf16.gmra.mxu0 %v9302_v46  ;;  %v4773_v55 = vpop.f32.mrf.mxu1  ;;  %v4715_v46 = vadd.f32 %v9382_v5, %v4714_v24 }
 0x708   : > { %v4800_v3 = vpop.f32.mrf.mxu2 }
 0x70a   : > { %v9363_v17 = vpop.f32.mrf.mxu0 }
 0x70b   : > { %v4825_v38 = vpop.f32.mrf.mxu3 }
 0x70f   : > { %v4776_v59 = vpop.f32.mrf.mxu1 }
 0x711   : > { %v4803_v37 = vpop.f32.mrf.mxu2 }
 0x712   : > { %v9365_v1 = vpop.f32.mrf.mxu0 }
 0x713   : > { %v4827_v45 = vpop.f32.mrf.mxu3 }
 0x715   : > { %4861 = vmatmul.bf16.gmra.mxu0 %v4228_v54  ;;  %v7359_v54 = vld [vmem:[%s9765_s7 + $0xb0] sm:$0xff] }
 0x716   : > { %5677 = vmatpush.bf16.msrb.mxu2 %v7359_v54  ;;  %v7362_v54 = vld [vmem:[%s9765_s7 + $0xc8] sm:$0xff] }
 0x717   : > { %v9369_v14 = vpop.f32.mrf.mxu1 }
 0x719   : > { %v9371_v4 = vpop.f32.mrf.mxu2 }
 0x71a   : > { %v4729_v23 = vpop.f32.mrf.mxu0 }
 0x71b   : > { %v4830_v9 = vpop.f32.mrf.mxu3  ;;  %v7338_v23 = vld [vmem:[%s9765_s7 + $0x8] sm:$0xff] }
 0x71f   : > { %v9373_v52 = vpop.f32.mrf.mxu1 }
 0x721   : > { %v9375_v18 = vpop.f32.mrf.mxu2 }
 0x722   : > { %v4740_v44 = vpop.f32.mrf.mxu0 }
 0x723   : > { %v9377_v7 = vpop.f32.mrf.mxu3  ;;  %v4728_v44 = vadd.f32 %v9382_v5, %v9365_v1  ;;  %v7367_v1 = vld [vmem:[%s9765_s7 + $0xf0] sm:$0xff] }
 0x727   : > { %v4783_v25 = vpop.f32.mrf.mxu1 }
 0x729   : > { %v4810_v19 = vpop.f32.mrf.mxu2 }
 0x72a   : > { %v4741_v41 = vpop.f32.mrf.mxu0 }
 0x72b   : > { %v4742_v22 = vadd.f32 %v4741_v41, %v4715_v46  ;;  %v9385_v40 = vpop.f32.mrf.mxu3  ;;  %v7350_v41 = vld [vmem:[%s9765_s7 + $0x68] sm:$0xff] }
 0x72d   : > { %v4769_v42 = vadd.f32 %v4768_v34, %v4742_v22 }
 0x72f   : > { %v4796_v47 = vadd.f32 %v4795_v43, %v4769_v42  ;;  %v4875_v62 = vpop.f32.mrf.mxu1 }
 0x731   : > { %v9388_v51 = vadd.f32 %v4822_v26, %v4796_v47  ;;  %v4902_v61 = vpop.f32.mrf.mxu2  ;;  %v7340_v26 = vld [vmem:[%s9765_s7 + $0x18] sm:$0xff] }
 0x732   : > { %v4744_v53 = vpop.f32.mrf.mxu0  ;;  %5654 = vmatpush.bf16.msra.mxu0 %v7340_v26  ;;  %v7376_v47 = vld [vmem:[%s9765_s7 + $0x138] sm:$0xff]  ;;  %v7349_v61 = vld [vmem:[%s9765_s7 + $0x60] sm:$0xff] }
 0x733   : > { %v4745_v13 = vadd.f32 %v4744_v53, %v4718_v29  ;;  %v4837_v30 = vpop.f32.mrf.mxu3  ;;  %v7357_v29 = vld [vmem:[%s9765_s7 + $0xa0] sm:$0xff] }
 0x734   : > { %v7345_v26 = vld [vmem:[%s9765_s7 + $0x40] sm:$0xff] }
 0x735   : > { %v4772_v49 = vadd.f32 %v4771_v0, %v4745_v13 }
 0x736   : > { %5655 = vmatpush.bf16.msra.mxu0 %v7339_v32  ;;  %v7363_v32 = vld [vmem:[%s9765_s7 + $0xd0] sm:$0xff] }
 0x737   : > { %v4799_v60 = vadd.f32 %v4798_v48, %v4772_v49  ;;  %v9393_v21 = vpop.f32.mrf.mxu1  ;;  %v7348_v49 = vld [vmem:[%s9765_s7 + $0x58] sm:$0xff] }
 0x739   : > { %v9396_v58 = vadd.f32 %v4825_v38, %v4799_v60  ;;  %v9398_v6 = vpop.f32.mrf.mxu2 }
 0x73a   : > { %v4746_v8 = vpop.f32.mrf.mxu0  ;;  %5656 = vmatpush.bf16.msra.mxu0 %v7338_v23  ;;  %v7392_v23 = vld [vmem:[%s9765_s7 + $0x1b8] sm:$0xff] }
 0x73b   : > { %v4747_v27 = vadd.f32 %v4746_v8, %v4720_v12  ;;  %v4929_v2 = vpop.f32.mrf.mxu3 }
 0x73c   : > { %v7346_v2 = vld [vmem:[%s9765_s7 + $0x48] sm:$0xff] }
 0x73d   : > { %v4774_v28 = vadd.f32 %v4773_v55, %v4747_v27  ;;  %v4725_v55 = vadd.f32 %v9382_v5, %v9363_v17  ;;  %v7337_v5 = vld [vmem:[%s9765_s7] sm:$0xff]  ;;  %v7374_v27 = vld [vmem:[%s9765_s7 + $0x128] sm:$0xff] }
 0x73e   : > { %5657 = vmatpush.bf16.msra.mxu0 %v7337_v5  ;;  %v7369_v5 = vld [vmem:[%s9765_s7 + $0x100] sm:$0xff] }
 0x73f   : > { %v4801_v24 = vadd.f32 %v4800_v3, %v4774_v28  ;;  %v9406_v63 = vpop.f32.mrf.mxu1 }
 0x741   : > { %v9409_v39 = vadd.f32 %v4827_v45, %v4801_v24  ;;  %v9411_v34 = vpop.f32.mrf.mxu2  ;;  %v7356_v24 = vld [vmem:[%s9765_s7 + $0x98] sm:$0xff] }
 0x742   : > { %v4749_v43 = vpop.f32.mrf.mxu0  ;;  %5702 = vmatpush.bf16.msrb.mxu0 %v7376_v47 }
 0x743   : > { %v4750_v35 = vadd.f32 %v4749_v43, %v4723_v16  ;;  %v9416_v0 = vpop.f32.mrf.mxu3  ;;  %v7373_v16 = vld [vmem:[%s9765_s7 + $0x120] sm:$0xff]  ;;  %v7364_v43 = vld [vmem:[%s9765_s7 + $0xd8] sm:$0xff] }
 0x745   : > { %v4777_v48 = vadd.f32 %v4776_v59, %v4750_v35 }
 0x746   : > { %5703 = vmatpush.bf16.msrb.mxu0 %v7375_v10 }
 0x747   : > { %v4804_v33 = vadd.f32 %v4803_v37, %v4777_v48  ;;  %v9421_v56 = vpop.f32.mrf.mxu1  ;;  %v7368_v37 = vld [vmem:[%s9765_s7 + $0xf8] sm:$0xff] }
 0x748   : > { %5689 = vmatpush.bf16.msrb.mxu3 %v7368_v37  ;;  %v7372_v48 = vld [vmem:[%s9765_s7 + $0x118] sm:$0xff]  ;;  %v7371_v37 = vld [vmem:[%s9765_s7 + $0x110] sm:$0xff] }
 0x749   : > { %v9425_v50 = vadd.f32 %v4830_v9, %v4804_v33  ;;  %v9427_v31 = vpop.f32.mrf.mxu2 }
 0x74a   : > { %v4751_v3 = vpop.f32.mrf.mxu0  ;;  %5704 = vmatpush.bf16.msrb.mxu0 %v7374_v27 }
 0x74b   : > { %v4752_v38 = vadd.f32 %v4751_v3, %v4725_v55  ;;  %v9438_v17 = vpop.f32.mrf.mxu3  ;;  %v7384_v3 = vld [vmem:[%s9765_s7 + $0x178] sm:$0xff] }
 0x74c   : > { %5690 = vmatpush.bf16.msrb.mxu3 %v7367_v1  ;;  %v7381_v1 = vld [vmem:[%s9765_s7 + $0x160] sm:$0xff] }
 0x74d   : > { %v4779_v59 = vadd.f32 %v9369_v14, %v4752_v38  ;;  %v7351_v14 = vld [vmem:[%s9765_s7 + $0x70] sm:$0xff] }
 0x74e   : > { %5664 = vmatpush.bf16.msrb.mxu1 %v7351_v14  ;;  %5705 = vmatpush.bf16.msrb.mxu0 %v7373_v16 }
 0x74f   : > { %v4806_v45 = vadd.f32 %v9371_v4, %v4779_v59  ;;  %v9454_v9 = vpop.f32.mrf.mxu1 }
 0x751   : > { %v9459_v4 = vadd.f32 %v9377_v7, %v4806_v45  ;;  %v9461_v25 = vpop.f32.mrf.mxu2  ;;  %v7358_v7 = vld [vmem:[%s9765_s7 + $0xa8] sm:$0xff] }
 0x752   : > { %v4754_v46 = vpop.f32.mrf.mxu0  ;;  %5665 = vmatpush.bf16.msrb.mxu1 %v7350_v41  ;;  %5678 = vmatpush.bf16.msrb.mxu2 %v7358_v7  ;;  %v7400_v7 = vld [vmem:[%s9765_s7 + $0x1f8] sm:$0xff] }
 0x753   : > { %v4755_v19 = vadd.f32 %v4754_v46, %v4728_v44  ;;  %v9466_v22 = vpop.f32.mrf.mxu3  ;;  %5706 = vmatpush.bf16.msrb.mxu0 %v7372_v48  ;;  %v7370_v46 = vld [vmem:[%s9765_s7 + $0x108] sm:$0xff] }
 0x755   : > { %v4782_v42 = vadd.f32 %v9373_v52, %v4755_v19  ;;  %v7366_v52 = vld [vmem:[%s9765_s7 + $0xe8] sm:$0xff] }
 0x756   : > { %5666 = vmatpush.bf16.msrb.mxu1 %v7349_v61  ;;  %5691 = vmatpush.bf16.msrb.mxu3 %v7366_v52  ;;  %v7399_v52 = vld [vmem:[%s9765_s7 + $0x1f0] sm:$0xff] }
 0x757   : > { %v4809_v62 = vadd.f32 %v9375_v18, %v4782_v42  ;;  %v9491_v53 = vpop.f32.mrf.mxu1  ;;  %5679 = vmatpush.bf16.msrb.mxu2 %v7357_v29  ;;  %5707 = vmatpush.bf16.msrb.mxu0 %v7371_v37  ;;  %v7390_v29 = vld [vmem:[%s9765_s7 + $0x1a8] sm:$0xff] }
 0x759   : > { %v9494_v13 = vadd.f32 %v9385_v40, %v4809_v62  ;;  %v9496_v18 = vpop.f32.mrf.mxu2  ;;  %v7347_v40 = vld [vmem:[%s9765_s7 + $0x50] sm:$0xff] }
 0x75a   : > { %v4756_v30 = vpop.f32.mrf.mxu0  ;;  %5667 = vmatpush.bf16.msrb.mxu1 %v7348_v49  ;;  %5692 = vmatpush.bf16.msrb.mxu3 %v7365_v15  ;;  %v7398_v15 = vld [vmem:[%s9765_s7 + $0x1e8] sm:$0xff] }
 0x75b   : > { %v9501_v60 = vpop.f32.mrf.mxu3  ;;  %5680 = vmatpush.bf16.msrb.mxu2 %v7356_v24  ;;  %5708 = vmatpush.bf16.msrb.mxu0 %v7370_v46  ;;  %v7389_v24 = vld [vmem:[%s9765_s7 + $0x1a0] sm:$0xff] }
 0x75e   : > { %5668 = vmatpush.bf16.msrb.mxu1 %v7347_v40  ;;  %5693 = vmatpush.bf16.msrb.mxu3 %v7364_v43 }
 0x75f   : > { %v9509_v12 = vpop.f32.mrf.mxu1  ;;  %5681 = vmatpush.bf16.msrb.mxu2 %v7355_v20  ;;  %5709 = vmatpush.bf16.msrb.mxu0 %v7369_v5 }
 0x761   : > { %v9511_v8 = vpop.f32.mrf.mxu2 }
 0x762   : > { %v4848_v36 = vpop.f32.mrf.mxu0  ;;  %5669 = vmatpush.bf16.msrb.mxu1 %v7346_v2  ;;  %5694 = vmatpush.bf16.msrb.mxu3 %v7363_v32 }
 0x763   : > { %v9519_v28 = vpop.f32.mrf.mxu3  ;;  %5682 = vmatpush.bf16.msrb.mxu2 %v7354_v57  ;;  %v7408_v57 = vld [vmem:[%s9765_s7 + $0x238] sm:$0xff] }
 0x766   : > { %5670 = vmatpush.bf16.msrb.mxu1 %v7345_v26  ;;  %5695 = vmatpush.bf16.msrb.mxu3 %v7362_v54 }
 0x767   : > { %v4891_v35 = vpop.f32.mrf.mxu1 }
 0x769   : > { %v4918_v33 = vpop.f32.mrf.mxu2 }
 0x76a   : > { %v4849_v55 = vpop.f32.mrf.mxu0  ;;  %5715 = vmatpush.bf16.msra.mxu1 %v7384_v3 }
 0x76b   : > { %v4850_v38 = vadd.f32 %v4849_v55, %v9388_v51  ;;  %v9546_v11 = vpop.f32.mrf.mxu3  ;;  %v7383_v51 = vld [vmem:[%s9765_s7 + $0x170] sm:$0xff]  ;;  %v7397_v55 = vld [vmem:[%s9765_s7 + $0x1e0] sm:$0xff] }
 0x76d   : > { %v4877_v59 = vadd.f32 %v9393_v21, %v4850_v38  ;;  %v7353_v21 = vld [vmem:[%s9765_s7 + $0x80] sm:$0xff] }
 0x76e   : > { %5716 = vmatpush.bf16.msra.mxu1 %v7383_v51  ;;  %5683 = vmatpush.bf16.msrb.mxu2 %v7353_v21 }
 0x76f   : > { %v4904_v45 = vadd.f32 %v9398_v6, %v4877_v59  ;;  %v7382_v6 = vld [vmem:[%s9765_s7 + $0x168] sm:$0xff]  ;;  %v7388_v59 = vld [vmem:[%s9765_s7 + $0x198] sm:$0xff] }
 0x771   : > { %v4931_v41 = vadd.f32 %v9416_v0, %v4904_v45  ;;  %v7391_v0 = vld [vmem:[%s9765_s7 + $0x1b0] sm:$0xff]  ;;  %v7378_v45 = vld [vmem:[%s9765_s7 + $0x148] sm:$0xff] }
 0x772   : > { %v4852_v14 = vpop.f32.mrf.mxu0  ;;  %5728 = vmatpush.bf16.msra.mxu2 %v7392_v23  ;;  %5717 = vmatpush.bf16.msra.mxu1 %v7382_v6 }
 0x773   : > { %v4853_v44 = vadd.f32 %v4852_v14, %v9396_v58  ;;  %v4945_v19 = vpop.f32.mrf.mxu3  ;;  %v7361_v58 = vld [vmem:[%s9765_s7 + $0xc0] sm:$0xff]  ;;  %v4947_v47 = vmax.f32 %v4931_v41, 0.0 }
 0x774   : > { %5696 = vmatpush.bf16.msrb.mxu3 %v7361_v58  ;;  %v7396_v19 = vld [vmem:[%s9765_s7 + $0x1d8] sm:$0xff]  ;;  %v7377_v41 = vld [vmem:[%s9765_s7 + $0x140] sm:$0xff]  ;;  %v7395_v58 = vld [vmem:[%s9765_s7 + $0x1d0] sm:$0xff] }
 0x775   : > { %v4880_v42 = vadd.f32 %v9406_v63, %v4853_v44  ;;  %v4955_v49 = vrot.slane %v4947_v47, 2  ;;  %v4960_v10 = vrot.slane %v4947_v47, 4 }
 0x776   : > { %5729 = vmatpush.bf16.msra.mxu2 %v7391_v0  ;;  %5718 = vmatpush.bf16.msra.mxu1 %v7381_v1  ;;  %v7386_v0 = vld [vmem:[%s9765_s7 + $0x188] sm:$0xff] }
 0x777   : > { %v4907_v63 = vadd.f32 %v9411_v34, %v4880_v42  ;;  %v7380_v34 = vld [vmem:[%s9765_s7 + $0x158] sm:$0xff] }
 0x778   : > { %5741 = vmatpush.bf16.msra.mxu3 %v7400_v7 }
 0x779   : > { %v4934_v62 = vadd.f32 %v9438_v17, %v4907_v63 }
 0x77a   : > { %v4854_v61 = vpop.f32.mrf.mxu0  ;;  %5730 = vmatpush.bf16.msra.mxu2 %v7390_v29  ;;  %5719 = vmatpush.bf16.msra.mxu1 %v7380_v34  ;;  %v7394_v34 = vld [vmem:[%s9765_s7 + $0x1c8] sm:$0xff] }
 0x77b   : > { %v4948_v30 = vmax.f32 %v4934_v62, 0.0  ;;  %v4855_v17 = vadd.f32 %v4854_v61, %v9409_v39  ;;  %v7379_v39 = vld [vmem:[%s9765_s7 + $0x150] sm:$0xff] }
 0x77c   : > { %5742 = vmatpush.bf16.msra.mxu3 %v7399_v52 }
 0x77d   : > { %v4956_v40 = vrot.slane %v4948_v30, 2  ;;  %v4961_v36 = vrot.slane %v4948_v30, 4  ;;  %v4989_v27 = vpack.c.bf16 %v4948_v30, %v4947_v47  ;;  %v4882_v2 = vadd.f32 %v9421_v56, %v4855_v17  ;;  %v7405_v30 = vld [vmem:[%s9765_s7 + $0x220] sm:$0xff] }
 0x77e   : > { %5731 = vmatpush.bf16.msra.mxu2 %v7389_v24  ;;  %5720 = vmatpush.bf16.msra.mxu1 %v7379_v39 }
 0x77f   : > { %v4957_v16 = vsel %vm1389_vm5, %v4955_v49, %v4956_v40  ;;  %v4962_v43 = vsel %vm1252_vm6, %v4960_v10, %v4961_v36  ;;  %v5149_v56 = vshll.u32 %v4989_v27, 16  ;;  %v4909_v48 = vadd.f32 %v9427_v31, %v4882_v2 }
 0x780   : > { %v4990_v20 = vpack.c.bf16 %v4956_v40, %v4957_v16  ;;  %v4991_v35 = vpack.c.bf16 %v4961_v36, %v4962_v43  ;;  %v5147_v26 = vshrl.u32 %v4989_v27, 16  ;;  %5743 = vmatpush.bf16.msra.mxu3 %v7398_v15  ;;  %v7404_v16 = vld [vmem:[%s9765_s7 + $0x218] sm:$0xff]  ;;  %v7393_v43 = vld [vmem:[%s9765_s7 + $0x1c0] sm:$0xff] }
 0x781   : > { %v5151_v33 = vrot.slane %v5149_v56, 1  ;;  %v4936_v14 = vadd.f32 %v9466_v22, %v4909_v48  ;;  %v7387_v22 = vld [vmem:[%s9765_s7 + $0x190] sm:$0xff] }
 0x782   : > { %v5156_v3 = vshll.u32 %v4990_v20, 16  ;;  %v5163_v38 = vshll.u32 %v4991_v35, 16  ;;  %v4857_v32 = vpop.f32.mrf.mxu0  ;;  %v5154_v51 = vshrl.u32 %v4990_v20, 16  ;;  %v5161_v21 = vshrl.u32 %v4991_v35, 16  ;;  %5732 = vmatpush.bf16.msra.mxu2 %v7388_v59  ;;  %5721 = vmatpush.bf16.msra.mxu1 %v7378_v45 }
 0x783   : > { %v5152_v31 = vor.u32 %v5151_v33, %v5147_v26  ;;  %v4858_v37 = vadd.f32 %v4857_v32, %v9425_v50  ;;  %v7407_v50 = vld [vmem:[%s9765_s7 + $0x230] sm:$0xff]  ;;  %v4949_v42 = vmax.f32 %v4936_v14, 0.0 }
 0x784   : > { %v5158_v54 = vrot.slane %v5156_v3, 1  ;;  %v5165_v23 = vrot.slane %v5163_v38, 1  ;;  %5744 = vmatpush.bf16.msra.mxu3 %v7397_v55  ;;  %v7403_v32 = vld [vmem:[%s9765_s7 + $0x210] sm:$0xff] }
 0x785   : > { %v4885_v6 = vadd.f32 %v9454_v9, %v4858_v37  ;;  %5658 = vmatmul.bf16.vlgmr.msra.gmra.mxu0 %v5152_v31  ;;  %v4972_v47 = vrot.slane %v4949_v42, 4 }
 0x786   : > { %v5159_v44 = vor.u32 %v5158_v54, %v5154_v51  ;;  %v5166_v46 = vor.u32 %v5165_v23, %v5161_v21  ;;  %5754 = vmatpush.bf16.msra.mxu0 %v7408_v57  ;;  %5733 = vmatpush.bf16.msra.mxu2 %v7387_v22 }
 0x787   : > { %v4912_v9 = vadd.f32 %v9461_v25, %v4885_v6  ;;  %v7406_v25 = vld [vmem:[%s9765_s7 + $0x228] sm:$0xff]  ;;  %5722 = vmatpush.bf16.msra.mxu1 %v7377_v41 }
 0x788   : > { %5684 = vmatmul.bf16.vlgmr.msrb.gmra.mxu2 %v5166_v46  ;;  %5671 = vmatmul.bf16.vlgmr.msrb.gmra.mxu1 %v5159_v44 }
 0x789   : > { %v4939_v1 = vadd.f32 %v9501_v60, %v4912_v9  ;;  %5745 = vmatpush.bf16.msra.mxu3 %v7396_v19  ;;  %v4967_v60 = vrot.slane %v4949_v42, 2 }
 0x78a   : > { %v4859_v7 = vpop.f32.mrf.mxu0  ;;  %5755 = vmatpush.bf16.msra.mxu0 %v7407_v50  ;;  %5734 = vmatpush.bf16.msra.mxu2 %v7386_v0  ;;  %v7416_v0 = vld [vmem:[%s9767_s9 + $0x38] sm:$0xff] }
 0x78b   : > { %v4950_v63 = vmax.f32 %v4939_v1, 0.0  ;;  %v4860_v5 = vadd.f32 %v4859_v7, %v9459_v4  ;;  %v7385_v4 = vld [vmem:[%s9765_s7 + $0x180] sm:$0xff]  ;;  %5836 = vmatpush.bf16.msrb.mxu1 %v7416_v0 }
 0x78d   : > { %v4968_v62 = vrot.slane %v4950_v63, 2  ;;  %v4973_v52 = vrot.slane %v4950_v63, 4  ;;  %v4992_v29 = vpack.c.bf16 %v4950_v63, %v4949_v42  ;;  %v4887_v61 = vadd.f32 %v9491_v53, %v4860_v5  ;;  %5746 = vmatpush.bf16.msra.mxu3 %v7395_v58  ;;  %v7415_v63 = vld [vmem:[%s9767_s9 + $0x30] sm:$0xff]  ;;  %v7414_v5 = vld [vmem:[%s9767_s9 + $0x28] sm:$0xff] }
 0x78e   : > { %5756 = vmatpush.bf16.msra.mxu0 %v7406_v25  ;;  %5735 = vmatpush.bf16.msra.mxu2 %v7385_v4 }
 0x78f   : > { %v4969_v17 = vsel %vm1389_vm5, %v4967_v60, %v4968_v62  ;;  %v4974_v49 = vsel %vm1252_vm6, %v4972_v47, %v4973_v52  ;;  %v5170_v53 = vshll.u32 %v4992_v29, 16  ;;  %v4914_v36 = vadd.f32 %v9496_v18, %v4887_v61  ;;  %5837 = vmatpush.bf16.msrb.mxu1 %v7415_v63  ;;  %v7413_v60 = vld [vmem:[%s9767_s9 + $0x20] sm:$0xff]  ;;  %v7412_v47 = vld [vmem:[%s9767_s9 + $0x18] sm:$0xff] }
 0x790   : > { %v4993_v10 = vpack.c.bf16 %v4968_v62, %v4969_v17  ;;  %v4994_v40 = vpack.c.bf16 %v4973_v52, %v4974_v49  ;;  %v5168_v27 = vshrl.u32 %v4992_v29, 16  ;;  %v7411_v52 = vld [vmem:[%s9767_s9 + $0x10] sm:$0xff]  ;;  %v7409_v17 = vld [vmem:[%s9767_s9] sm:$0xff] }
 0x791   : > { %v5172_v2 = vrot.slane %v5170_v53, 1  ;;  %5747 = vmatpush.bf16.msra.mxu3 %v7394_v34  ;;  %v4941_v33 = vadd.f32 %v9519_v28, %v4914_v36  ;;  %v7439_v49 = vld [vmem:[%s9766_s8] ss:$0 sm:$0xff] }
 0x792   : > { %v5177_v15 = vshll.u32 %v4993_v10, 16  ;;  %v5184_v24 = vshll.u32 %v4994_v40, 16  ;;  %v4862_v39 = vpop.f32.mrf.mxu0  ;;  %5757 = vmatpush.bf16.msra.mxu0 %v7405_v30  ;;  %v5175_v20 = vshrl.u32 %v4993_v10, 16  ;;  %v5182_v48 = vshrl.u32 %v4994_v40, 16  ;;  %v7410_v30 = vld [vmem:[%s9767_s9 + $0x8] sm:$0xff]  ;;  %v7424_v10 = vld [vmem:[%s9769_s11 + $0x38] sm:$0xff] }
 0x793   : > { %v5173_v56 = vor.u32 %v5172_v2, %v5168_v27  ;;  %v4863_v18 = vadd.f32 %v4862_v39, %v9494_v13  ;;  %v4951_v59 = vmax.f32 %v4941_v33, 0.0  ;;  %5838 = vmatpush.bf16.msrb.mxu1 %v7414_v5  ;;  %5919 = vmatpush.bf16.msrb.mxu2 %v7424_v10  ;;  %v7423_v27 = vld [vmem:[%s9769_s11 + $0x30] sm:$0xff] }
 0x794   : > { %v5179_v35 = vrot.slane %v5177_v15, 1  ;;  %v5186_v26 = vrot.slane %v5184_v24, 1  ;;  %v7422_v24 = vld [vmem:[%s9769_s11 + $0x28] sm:$0xff] }
 0x795   : > { %v4890_v55 = vadd.f32 %v9509_v12, %v4863_v18  ;;  %5697 = vmatmul.bf16.vlgmr.msrb.gmra.mxu3 %v5173_v56  ;;  %v7402_v12 = vld [vmem:[%s9765_s7 + $0x208] sm:$0xff]  ;;  %v4979_v51 = vrot.slane %v4951_v59, 2  ;;  %v4984_v37 = vrot.slane %v4951_v59, 4 }
 0x796   : > { %v5180_v3 = vor.u32 %v5179_v35, %v5175_v20  ;;  %v5187_v38 = vor.u32 %v5186_v26, %v5182_v48  ;;  %5758 = vmatpush.bf16.msra.mxu0 %v7404_v16  ;;  %5748 = vmatpush.bf16.msra.mxu3 %v7393_v43  ;;  %v7421_v20 = vld [vmem:[%s9769_s11 + $0x20] sm:$0xff]  ;;  %v7420_v48 = vld [vmem:[%s9769_s11 + $0x18] sm:$0xff] }
 0x797   : > { %v4917_v57 = vadd.f32 %v9511_v8, %v4890_v55  ;;  %v7401_v8 = vld [vmem:[%s9765_s7 + $0x200] sm:$0xff]  ;;  %5839 = vmatpush.bf16.msrb.mxu1 %v7413_v60  ;;  %5920 = vmatpush.bf16.msrb.mxu2 %v7423_v27  ;;  %v7419_v55 = vld [vmem:[%s9769_s11 + $0x10] sm:$0xff] }
 0x798   : > { %5710 = vmatmul.bf16.vlgmr.msrb.gmra.mxu0 %v5180_v3  ;;  %5723 = vmatmul.bf16.vlgmr.msra.gmra.mxu1 %v5187_v38 }
 0x799   : > { %v4944_v13 = vadd.f32 %v9546_v11, %v4917_v57 }
 0x79a   : > { %5759 = vmatpush.bf16.msra.mxu0 %v7403_v32  ;;  %v4864_v28 = vpop.f32.mrf.mxu0 }
 0x79b   : > { %v4952_v31 = vmax.f32 %v4944_v13, 0.0  ;;  %5840 = vmatpush.bf16.msrb.mxu1 %v7412_v47  ;;  %5921 = vmatpush.bf16.msrb.mxu2 %v7422_v24 }
 0x79d   : > { %v4980_v45 = vrot.slane %v4952_v31, 2  ;;  %v4985_v54 = vrot.slane %v4952_v31, 4  ;;  %v4995_v21 = vpack.c.bf16 %v4952_v31, %v4951_v59 }
 0x79e   : > { %5760 = vmatpush.bf16.msra.mxu0 %v7402_v12 }
 0x79f   : > { %v4981_v23 = vsel %vm1389_vm5, %v4979_v51, %v4980_v45  ;;  %v4986_v11 = vsel %vm1252_vm6, %v4984_v37, %v4985_v54  ;;  %v5191_v14 = vshll.u32 %v4995_v21, 16  ;;  %v5189_v46 = vshrl.u32 %v4995_v21, 16  ;;  %5841 = vmatpush.bf16.msrb.mxu1 %v7411_v52  ;;  %5922 = vmatpush.bf16.msrb.mxu2 %v7421_v20  ;;  %v7418_v37 = vld [vmem:[%s9769_s11 + $0x8] sm:$0xff] }
 0x7a0   : > { %v4996_v6 = vpack.c.bf16 %v4980_v45, %v4981_v23  ;;  %v4997_v44 = vpack.c.bf16 %v4985_v54, %v4986_v11  ;;  %v7417_v45 = vld [vmem:[%s9769_s11] sm:$0xff] }
 0x7a1   : > { %v5193_v50 = vrot.slane %v5191_v14, 1  ;;  %v7440_v54 = vld [vmem:[%s9768_s10] ss:$0 sm:$0xff] }
 0x7a2   : > { %v5198_v19 = vshll.u32 %v4996_v6, 16  ;;  %v5205_v22 = vshll.u32 %v4997_v44, 16  ;;  %5761 = vmatpush.bf16.msra.mxu0 %v7401_v8  ;;  %v5196_v41 = vshrl.u32 %v4996_v6, 16  ;;  %v5203_v1 = vshrl.u32 %v4997_v44, 16  ;;  %v7441_v6 = vld [vmem:[%s9770_s12] ss:$0 sm:$0xff] }
 0x7a3   : > { %v5194_v9 = vor.u32 %v5193_v50, %v5189_v46  ;;  %5842 = vmatpush.bf16.msrb.mxu1 %v7410_v30  ;;  %5923 = vmatpush.bf16.msrb.mxu2 %v7420_v48 }
 0x7a4   : > { %v5200_v42 = vrot.slane %v5198_v19, 1  ;;  %v5207_v58 = vrot.slane %v5205_v22, 1 }
 0x7a5   : > { %5736 = vmatmul.bf16.vlgmr.msra.gmra.mxu2 %v5194_v9 }
 0x7a6   : > { %v5201_v7 = vor.u32 %v5200_v42, %v5196_v41  ;;  %v5208_v25 = vor.u32 %v5207_v58, %v5203_v1 }
 0x7a7   : > { %5843 = vmatpush.bf16.msrb.mxu1 %v7409_v17  ;;  %5924 = vmatpush.bf16.msrb.mxu2 %v7419_v55 }
 0x7a8   : > { %5749 = vmatmul.bf16.vlgmr.msra.gmra.mxu3 %v5201_v7  ;;  %5762 = vmatmul.bf16.vlgmr.msra.gmra.mxu0 %v5208_v25 }
 0x7ab   : > { %5925 = vmatpush.bf16.msrb.mxu2 %v7418_v37 }
 0x7af   : > { %5926 = vmatpush.bf16.msrb.mxu2 %v7417_v45 }
 0x802   : > { %v5659_v62 = vpop.f32.mrf.mxu0 }
 0x803   : > { %v5660_v2 = vadd.f32 %v7439_v49, %v5659_v62 }
 0x805   : > { %v5672_v29 = vpop.f32.mrf.mxu1 }
 0x806   : > { %v5673_v39 = vadd.f32 %v5672_v29, %v5660_v2 }
 0x80a   : > { %v5661_v61 = vpop.f32.mrf.mxu0 }
 0x80b   : > { %v5685_v34 = vpop.f32.mrf.mxu2 }
 0x80c   : > { %v5686_v16 = vadd.f32 %v5685_v34, %v5673_v39 }
 0x80d   : > { %v5674_v4 = vpop.f32.mrf.mxu1 }
 0x813   : > { %v5687_v53 = vpop.f32.mrf.mxu2 }
 0x815   : > { %v5711_v40 = vpop.f32.mrf.mxu0  ;;  %v5724_v36 = vpop.f32.mrf.mxu1 }
 0x818   : > { %v5698_v15 = vpop.f32.mrf.mxu3 }
 0x819   : > { %v5699_v18 = vadd.f32 %v5698_v15, %v5686_v16 }
 0x81b   : > { %v5712_v26 = vadd.f32 %v5711_v40, %v5699_v18 }
 0x81d   : > { %v5713_v43 = vpop.f32.mrf.mxu0  ;;  %v5726_v56 = vpop.f32.mrf.mxu1  ;;  %v5725_v3 = vadd.f32 %v5724_v36, %v5712_v26 }
 0x820   : > { %v5700_v35 = vpop.f32.mrf.mxu3 }
 0x825   : > { %v5763_v33 = vpop.f32.mrf.mxu0 }
 0x828   : > { %v5737_v38 = vpop.f32.mrf.mxu2 }
 0x829   : > { %v5738_v32 = vadd.f32 %v5737_v38, %v5725_v3 }
 0x82b   : > { %v5750_v57 = vpop.f32.mrf.mxu3 }
 0x82c   : > { %v5751_v59 = vadd.f32 %v5750_v57, %v5738_v32 }
 0x82d   : > { %v5765_v13 = vpop.f32.mrf.mxu0 }
 0x82e   : > { %v5764_v12 = vadd.f32 %v5763_v33, %v5751_v59 }
 0x830   : > { %v5767_v28 = vpack.c.bf16 %v5764_v12, %v5764_v12  ;;  %v5739_v31 = vpop.f32.mrf.mxu2 }
 0x832   : > { %5844 = vmatmul.bf16.vlgmr.msrb.gmra.mxu1 %v5767_v28 }
 0x833   : > { %v5752_v51 = vpop.f32.mrf.mxu3 }
 0x8af   : > { %v5845_v21 = vpop.f32.mrf.mxu1 }
 0x8b0   : > { %v5846_v8 = vadd.f32 %v7440_v54, %v5845_v21 }
 0x8b2   : > { %v5849_v23 = vmax.f32 %v5846_v8, 0.0 }
 0x8b4   : > { %v5850_v11 = vpack.c.bf16 %v5849_v23, %v5849_v23 }
 0x8b6   : > { %5927 = vmatmul.bf16.vlgmr.msrb.gmra.mxu2 %v5850_v11 }
 0x8b7   : > { %v5847_v14 = vpop.f32.mrf.mxu1 }
 0x939   : > { %v5928_v44 = vpop.f32.mrf.mxu2 }
 0x93a   : > { %v5929_v46 = vadd.f32 %v7441_v6, %v5928_v44 }
 0x93c   : > { %5932 = vst [vmem:[%s465_s20] sm:$0xff] %v5929_v46 }
 0x941   : > { %v5930_v50 = vpop.f32.mrf.mxu2 }
 0x942 PF: > { %s24_s29 = sadd.s32 1, %s7449_s29  }
 0x943   : > { %p21_p4 = scmp.ge.s32.totalorder %s24_s29, 4  }
 0x945   :  { %23 = sbr.rel (!%p21_p4) target bundleno = 1 (0x1), region = 106 }

</bundles_post_ra>
